<compile_context>
chip_gen: v7x
topology: tpu7x:2x2x1
jax: 0.10.0
libtpu: 0.0.40
codegen_flags: <defaults>
</compile_context>

<pallas_src>
import math

import jax
import jax.numpy as jnp
from jax import lax
from jax.experimental import pallas as pl
from jax.experimental.pallas import tpu as pltpu

# ---------------- small, module-consistent dims ----------------
B = 2            # batch
V = 2            # num_views
C_IN = 3         # image channels
H = 16
W = 16
LATENT = 128     # stands in for latent_dim = 1024
PROPRIO = 9      # proprio_input_dim
C_MID = 32       # FiLM conv channels
VIS_DIM = 64     # per-view vision feature dim (stands in for resnet34's 512)
HIDDEN = 128     # policy_hidden_dim (scaled down from 256)
NUM_BLOCKS = 3   # policy_num_blocks
ACTION = 7 * 4   # action_size * chunk_length
NUM_ATTN_LAYERS = 3
RECURSIVE_STEP = 2   # number of planned subgoals
INSTR_LEN = 8
INSTR_DIM = 32
K_PATCH = 32     # im2col contraction (9*C_IN=27 zero-padded to 32)

_VMEM = pl.BlockSpec(memory_space=pltpu.MemorySpace.VMEM)
_SMEM = pl.BlockSpec(memory_space=pltpu.MemorySpace.SMEM)


# ---------------- the fused Pallas kernel ----------------
def _lbp_fused_kernel(
        # activations / targets
        patch_ref, imgfeat_ref, langfeat_ref, prop_ref, act_ref,
        # synthetic-imaginator weights
        img_w_ref, lang_w_ref, step_w_ref,
        # goal-fusion cross-attention weights
        wq_ref, wk_ref, wv_ref, wo_ref,
        # FiLM vision-encoder weights
        wconv_ref, bconv_ref, wg_ref, bg_ref, wb_ref, bb_ref,
        wproj_ref, bproj_ref,
        # BaseHead weights (input Linear split per modality)
        w_in_vis_ref, w_in_prop_ref, w_in_goal_ref, b_in_ref,
        w_blk_ref, b_blk_ref, w_out_ref, b_out_ref,
        # output
        loss_ref):
    f32, bf16 = jnp.float32, jnp.bfloat16
    HW = H * W

    # ---- 1) synthetic imaginator stand-in: latents + planned subgoals -------
    # TODO(synk): the frozen pretrained mid_planner_dnce_noise checkpoint cannot
    # be reproduced here; replaced by deterministic tiny matmuls with the same
    # downstream interface (lang_latent, img_latent, planned subgoals).
    img_latent = jnp.tanh(jnp.dot(imgfeat_ref[...].astype(bf16), img_w_ref[...],
                                  preferred_element_type=f32))            # (B, D)
    lang_latent = jnp.tanh(jnp.dot(langfeat_ref[...].astype(bf16),
                                   lang_w_ref[...],
                                   preferred_element_type=f32))           # (B, D)
    il_b = img_latent.astype(bf16)
    subgoals = [jnp.tanh(jnp.dot(il_b, step_w_ref[s],
                                 preferred_element_type=f32) + lang_latent)
                for s in range(RECURSIVE_STEP)]                           # S x (B, D)

    # ---- 2) goal_fusion: multi-layer cross-attention, batched over B --------
    # D x D projections run with M=B rows on the MXU (bf16 operands, f32 acc);
    # per-subgoal score / softmax / context stays on the VPU/EUP (f32).
    scale = 1.0 / math.sqrt(LATENT)
    sg_b = [sg.astype(bf16) for sg in subgoals]
    q = img_latent                                                        # (B, D)
    for l in range(NUM_ATTN_LAYERS):
        qp = jnp.dot(q.astype(bf16), wq_ref[l], preferred_element_type=f32)
        kps = [jnp.dot(sg, wk_ref[l], preferred_element_type=f32) for sg in sg_b]
        vps = [jnp.dot(sg, wv_ref[l], preferred_element_type=f32) for sg in sg_b]
        scores = [jnp.sum(qp * kp, axis=-1, keepdims=True) * scale
                  for kp in kps]                                          # S x (B, 1)
        m = scores[0]
        for s in range(1, RECURSIVE_STEP):
            m = jnp.maximum(m, scores[s])
        probs = [jnp.exp(sc - m) for sc in scores]
        denom = probs[0]
        for s in range(1, RECURSIVE_STEP):
            denom = denom + probs[s]
        inv_denom = pl.reciprocal(denom, approx=True)                     # (B, 1)
        ctx = probs[0] * inv_denom * vps[0]
        for s in range(1, RECURSIVE_STEP):
            ctx = ctx + probs[s] * inv_denom * vps[s]                     # (B, D)
        q = q + jnp.dot(ctx.astype(bf16), wo_ref[l],
                        preferred_element_type=f32)
    fused_goal = q                                                        # (B, D)

    # ---- 3) FiLM vision encoder: 3x3 conv as one MXU matmul + FiLM ----------
    conv = jnp.dot(patch_ref[...], wconv_ref[...],
                   preferred_element_type=f32) + bconv_ref[...]           # (BV*HW, Cm)
    cond_b = lang_latent.astype(bf16)            # conditions == language latent
    gamma = jnp.dot(cond_b, wg_ref[...], preferred_element_type=f32) + bg_ref[...]
    beta = jnp.dot(cond_b, wb_ref[...], preferred_element_type=f32) + bb_ref[...]

    # Per-sample FiLM broadcast (VPU) + mean pool (sublane reduce).  Replaces
    # the old one-hot expand / pooling matmuls and their input DMAs.
    inv_hw = 1.0 / float(HW)
    row_ids = lax.broadcasted_iota(jnp.int32, (B, 1), 0)                  # (B, 1)
    pooled_views = [jnp.zeros((B, C_MID), f32) for _ in range(V)]
    for bv in range(B * V):                       # static unroll, BV = 4
        b, v = bv // V, bv % V
        y = conv[bv * HW:(bv + 1) * HW, :]
        y = jnp.maximum(y * (1.0 + gamma[b:b + 1, :]) + beta[b:b + 1, :], 0.0)
        pooled = jnp.sum(y, axis=0, keepdims=True) * inv_hw               # (1, Cm)
        onehot = (row_ids == b).astype(f32)                               # (B, 1)
        pooled_views[v] = pooled_views[v] + onehot * pooled               # scatter row b

    # ---- 4) BaseHead MLP + MSE loss ------------------------------------------
    # Input Linear split per modality so the (vision | proprio | goal) concat of
    # all_obs never materializes (mathematically identical to one big Linear).
    h = jnp.dot(prop_ref[...].astype(bf16), w_in_prop_ref[...],
                preferred_element_type=f32)
    h = h + jnp.dot(fused_goal.astype(bf16), w_in_goal_ref[...],
                    preferred_element_type=f32)
    for v in range(V):
        vis_v = jnp.dot(pooled_views[v].astype(bf16), wproj_ref[...],
                        preferred_element_type=f32) + bproj_ref[...]      # (B, VIS)
        h = h + jnp.dot(vis_v.astype(bf16), w_in_vis_ref[v],
                        preferred_element_type=f32)
    h = jnp.maximum(h + b_in_ref[...], 0.0)
    # TODO(synk): BaseHead internals are not given in the reference; assumed a
    # Linear+ReLU input, NUM_BLOCKS hidden Linear+ReLU blocks, Linear output.
    for i in range(NUM_BLOCKS):
        h = jnp.maximum(jnp.dot(h.astype(bf16), w_blk_ref[i],
                                preferred_element_type=f32) + b_blk_ref[i], 0.0)
    pred = jnp.dot(h.astype(bf16), w_out_ref[...],
                   preferred_element_type=f32) + b_out_ref[...]           # (B, A)

    diff = pred - act_ref[...]
    # nn.MSELoss(reduction='mean'): mean over all elements -> scalar in SMEM.
    loss_ref[0, 0] = jnp.sum(diff * diff) * (1.0 / float(B * ACTION))


# ---------------- pallas_call wrapper ----------------
def lbp_fused_forward(patches, img_feat, lang_feat, proprio, actions, p):
    out = pl.pallas_call(
        _lbp_fused_kernel,
        out_shape=jax.ShapeDtypeStruct((1, 1), jnp.float32),
        in_specs=[_VMEM] * 28,
        out_specs=_SMEM,
    )(patches, img_feat, lang_feat, proprio, actions,
      p['img_w'], p['lang_w'], p['step_w'],
      p['wq'], p['wk'], p['wv'], p['wo'],
      p['wconv'], p['bconv'], p['wg'], p['bg'], p['wb'], p['bb'],
      p['wproj'], p['bproj'],
      p['w_in_vis'], p['w_in_prop'], p['w_in_goal'], p['b_in'],
      p['w_blk'], p['b_blk'], p['w_out'], p['b_out'])
    return out[0, 0]


# ---------------- params (deterministic init; MXU weights in bf16) ----------------
def init_params(key):
    ks = jax.random.split(key, 16)
    f32, bf16 = jnp.float32, jnp.bfloat16

    def lin(k, fan_in, shape, dtype=bf16):
        return (jax.random.normal(k, shape, f32) / math.sqrt(fan_in)).astype(dtype)

    in_dim = V * VIS_DIM + PROPRIO + LATENT
    p = dict(
        # synthetic imaginator stand-in
        img_w=lin(ks[0], C_IN, (C_IN, LATENT)),
        lang_w=lin(ks[1], INSTR_DIM, (INSTR_DIM, LATENT)),
        step_w=lin(ks[2], LATENT, (RECURSIVE_STEP, LATENT, LATENT)),
        # goal_fusion cross-attention
        wq=lin(ks[3], LATENT, (NUM_ATTN_LAYERS, LATENT, LATENT)),
        wk=lin(ks[4], LATENT, (NUM_ATTN_LAYERS, LATENT, LATENT)),
        wv=lin(ks[5], LATENT, (NUM_ATTN_LAYERS, LATENT, LATENT)),
        wo=lin(ks[6], LATENT, (NUM_ATTN_LAYERS, LATENT, LATENT)),
        # FiLM vision encoder (conv stem stand-in for FilmResNet)
        wconv=lin(ks[7], 9 * C_IN, (K_PATCH, C_MID)),   # rows 27..31 hit zero cols
        bconv=jnp.zeros((1, C_MID), f32),
        wg=lin(ks[8], LATENT, (LATENT, C_MID)),
        bg=jnp.zeros((1, C_MID), f32),
        wb=lin(ks[9], LATENT, (LATENT, C_MID)),
        bb=jnp.zeros((1, C_MID), f32),
        wproj=lin(ks[10], C_MID, (C_MID, VIS_DIM)),
        bproj=jnp.zeros((1, VIS_DIM), f32),
        # BaseHead MLP (input Linear split per modality)
        w_in_vis=lin(ks[11], in_dim, (V, VIS_DIM, HIDDEN)),
        w_in_prop=lin(ks[12], in_dim, (PROPRIO, HIDDEN)),
        w_in_goal=lin(ks[13], in_dim, (LATENT, HIDDEN)),
        b_in=jnp.zeros((1, HIDDEN), f32),
        w_blk=lin(ks[14], HIDDEN, (NUM_BLOCKS, HIDDEN, HIDDEN)),
        b_blk=jnp.zeros((NUM_BLOCKS, 1, HIDDEN), f32),
        w_out=lin(ks[15], HIDDEN, (HIDDEN, ACTION)),
        b_out=jnp.zeros((1, ACTION), f32),
    )
    return p


# ---------------- glue (layout / parameter plumbing only) ----------------
def _im2col_3x3(x_nhwc):
    bv, hh, ww, cc = x_nhwc.shape
    xp = jnp.pad(x_nhwc, ((0, 0), (1, 1), (1, 1), (0, 0)))
    cols = [xp[:, dh:dh + hh, dw:dw + ww, :]
            for dh in range(3) for dw in range(3)]
    patches = jnp.concatenate(cols, axis=-1)            # (BV, H, W, 9*C)
    return patches.reshape(bv * hh * ww, 9 * cc)


def forward(p, cur_images, cur_proprios, cur_actions, instruction):
    b, v, c, h, w = cur_images.shape
    # Layout plumbing: NCHW -> NHWC, im2col the 3x3 neighbourhoods, zero-pad the
    # contraction 9*C=27 -> 32, and feed the MXU operand as bf16.
    x_nhwc = jnp.transpose(cur_images.reshape(b * v, c, h, w), (0, 2, 3, 1))
    patches = _im2col_3x3(x_nhwc)                                    # (BV*H*W, 9C)
    patches = jnp.pad(patches, ((0, 0), (0, K_PATCH - 9 * c))).astype(jnp.bfloat16)
    # TODO(synk): frozen pretrained imaginator replaced by a synthetic latent
    # generator; these pooled stats feed tiny in-kernel matmuls.
    img_feat = cur_images.mean(axis=(1, 3, 4))                       # (B, C)
    lang_feat = instruction.mean(axis=1)                             # (B, INSTR_DIM)
    loss = lbp_fused_forward(patches, img_feat, lang_feat,
                             cur_proprios, cur_actions, p)           # fused kernel
    return loss, dict(loss=loss)


if __name__ == "__main__":
    key = jax.random.PRNGKey(0)
    kparams, k1, k2, k3, k4 = jax.random.split(key, 5)
    params = init_params(kparams)

    cur_images = jax.random.normal(k1, (B, V, C_IN, H, W), jnp.float32)
    cur_proprios = jax.random.normal(k2, (B, PROPRIO), jnp.float32)
    cur_actions = jax.random.normal(k3, (B, ACTION), jnp.float32)
    instruction = jax.random.normal(k4, (B, INSTR_LEN, INSTR_DIM), jnp.float32)

    fwd = jax.jit(forward)
    loss, aux = fwd(params, cur_images, cur_proprios, cur_actions, instruction)
    loss = jax.block_until_ready(loss)
    assert jnp.isfinite(loss), "loss is not finite"
    print("KERNEL_OK")
</pallas_src>

<mosaic_0001>
module attributes {stable_mosaic.version = 11 : i64} {
  func.func @_lbp_fused_kernel(%arg0: memref<1024x32xbf16, #tpu.memory_space<vmem>>, %arg1: memref<2x3xf32, #tpu.memory_space<vmem>>, %arg2: memref<2x32xf32, #tpu.memory_space<vmem>>, %arg3: memref<2x9xf32, #tpu.memory_space<vmem>>, %arg4: memref<2x28xf32, #tpu.memory_space<vmem>>, %arg5: memref<3x128xbf16, #tpu.memory_space<vmem>>, %arg6: memref<32x128xbf16, #tpu.memory_space<vmem>>, %arg7: memref<2x128x128xbf16, #tpu.memory_space<vmem>>, %arg8: memref<3x128x128xbf16, #tpu.memory_space<vmem>>, %arg9: memref<3x128x128xbf16, #tpu.memory_space<vmem>>, %arg10: memref<3x128x128xbf16, #tpu.memory_space<vmem>>, %arg11: memref<3x128x128xbf16, #tpu.memory_space<vmem>>, %arg12: memref<32x32xbf16, #tpu.memory_space<vmem>>, %arg13: memref<1x32xf32, #tpu.memory_space<vmem>>, %arg14: memref<128x32xbf16, #tpu.memory_space<vmem>>, %arg15: memref<1x32xf32, #tpu.memory_space<vmem>>, %arg16: memref<128x32xbf16, #tpu.memory_space<vmem>>, %arg17: memref<1x32xf32, #tpu.memory_space<vmem>>, %arg18: memref<32x64xbf16, #tpu.memory_space<vmem>>, %arg19: memref<1x64xf32, #tpu.memory_space<vmem>>, %arg20: memref<2x64x128xbf16, #tpu.memory_space<vmem>>, %arg21: memref<9x128xbf16, #tpu.memory_space<vmem>>, %arg22: memref<128x128xbf16, #tpu.memory_space<vmem>>, %arg23: memref<1x128xf32, #tpu.memory_space<vmem>>, %arg24: memref<3x128x128xbf16, #tpu.memory_space<vmem>>, %arg25: memref<3x1x128xf32, #tpu.memory_space<vmem>>, %arg26: memref<128x28xbf16, #tpu.memory_space<vmem>>, %arg27: memref<1x28xf32, #tpu.memory_space<vmem>>, %arg28: memref<1x1xf32, #tpu.memory_space<smem>>) attributes {dimension_semantics = [], scalar_prefetch = 0 : i64, scratch_operands = 0 : i64, tpu.core_type = #tpu.core_type<tc>} {
    %c0 = arith.constant 0 : index
    %c0_0 = arith.constant 0 : index
    %0 = vector.load %arg1[%c0, %c0_0] : memref<2x3xf32, #tpu.memory_space<vmem>>, vector<2x3xf32>
    %1 = arith.truncf %0 : vector<2x3xf32> to vector<2x3xbf16>
    %c0_1 = arith.constant 0 : index
    %c0_2 = arith.constant 0 : index
    %2 = vector.load %arg5[%c0_1, %c0_2] : memref<3x128xbf16, #tpu.memory_space<vmem>>, vector<3x128xbf16>
    %cst = arith.constant dense<0.000000e+00> : vector<2x128xf32>
    %3 = tpu.matmul %1, %2, %cst {dimension_numbers = #tpu.dot_dimension_numbers<[1], [0], [0], [1], [0, 0, 1, 1], [], []>} : vector<2x3xbf16>, vector<3x128xbf16>, vector<2x128xf32> -> vector<2x128xf32>
    %4 = math.tanh %3 : vector<2x128xf32>
    %c0_3 = arith.constant 0 : index
    %c0_4 = arith.constant 0 : index
    %5 = vector.load %arg2[%c0_3, %c0_4] : memref<2x32xf32, #tpu.memory_space<vmem>>, vector<2x32xf32>
    %6 = arith.truncf %5 : vector<2x32xf32> to vector<2x32xbf16>
    %c0_5 = arith.constant 0 : index
    %c0_6 = arith.constant 0 : index
    %7 = vector.load %arg6[%c0_5, %c0_6] : memref<32x128xbf16, #tpu.memory_space<vmem>>, vector<32x128xbf16>
    %cst_7 = arith.constant dense<0.000000e+00> : vector<2x128xf32>
    %8 = tpu.matmul %6, %7, %cst_7 {dimension_numbers = #tpu.dot_dimension_numbers<[1], [0], [0], [1], [0, 0, 1, 1], [], []>} : vector<2x32xbf16>, vector<32x128xbf16>, vector<2x128xf32> -> vector<2x128xf32>
    %9 = math.tanh %8 : vector<2x128xf32>
    %10 = arith.truncf %4 : vector<2x128xf32> to vector<2x128xbf16>
    %c0_8 = arith.constant 0 : index
    %c0_9 = arith.constant 0 : index
    %c0_10 = arith.constant 0 : index
    %11 = vector.load %arg7[%c0_8, %c0_9, %c0_10] : memref<2x128x128xbf16, #tpu.memory_space<vmem>>, vector<1x128x128xbf16>
    %12 = vector.shape_cast %11 : vector<1x128x128xbf16> to vector<128x128xbf16>
    %cst_11 = arith.constant dense<0.000000e+00> : vector<2x128xf32>
    %13 = tpu.matmul %10, %12, %cst_11 {dimension_numbers = #tpu.dot_dimension_numbers<[1], [0], [0], [1], [0, 0, 1, 1], [], []>} : vector<2x128xbf16>, vector<128x128xbf16>, vector<2x128xf32> -> vector<2x128xf32>
    %14 = arith.addf %13, %9 : vector<2x128xf32>
    %15 = math.tanh %14 : vector<2x128xf32>
    %c1 = arith.constant 1 : index
    %c0_12 = arith.constant 0 : index
    %c0_13 = arith.constant 0 : index
    %16 = vector.load %arg7[%c1, %c0_12, %c0_13] : memref<2x128x128xbf16, #tpu.memory_space<vmem>>, vector<1x128x128xbf16>
    %17 = vector.shape_cast %16 : vector<1x128x128xbf16> to vector<128x128xbf16>
    %cst_14 = arith.constant dense<0.000000e+00> : vector<2x128xf32>
    %18 = tpu.matmul %10, %17, %cst_14 {dimension_numbers = #tpu.dot_dimension_numbers<[1], [0], [0], [1], [0, 0, 1, 1], [], []>} : vector<2x128xbf16>, vector<128x128xbf16>, vector<2x128xf32> -> vector<2x128xf32>
    %19 = arith.addf %18, %9 : vector<2x128xf32>
    %20 = math.tanh %19 : vector<2x128xf32>
    %21 = arith.truncf %15 : vector<2x128xf32> to vector<2x128xbf16>
    %22 = arith.truncf %20 : vector<2x128xf32> to vector<2x128xbf16>
    %23 = arith.truncf %4 : vector<2x128xf32> to vector<2x128xbf16>
    %c0_15 = arith.constant 0 : index
    %c0_16 = arith.constant 0 : index
    %c0_17 = arith.constant 0 : index
    %24 = vector.load %arg8[%c0_15, %c0_16, %c0_17] : memref<3x128x128xbf16, #tpu.memory_space<vmem>>, vector<1x128x128xbf16>
    %25 = vector.shape_cast %24 : vector<1x128x128xbf16> to vector<128x128xbf16>
    %cst_18 = arith.constant dense<0.000000e+00> : vector<2x128xf32>
    %26 = tpu.matmul %23, %25, %cst_18 {dimension_numbers = #tpu.dot_dimension_numbers<[1], [0], [0], [1], [0, 0, 1, 1], [], []>} : vector<2x128xbf16>, vector<128x128xbf16>, vector<2x128xf32> -> vector<2x128xf32>
    %c0_19 = arith.constant 0 : index
    %c0_20 = arith.constant 0 : index
    %c0_21 = arith.constant 0 : index
    %27 = vector.load %arg9[%c0_19, %c0_20, %c0_21] : memref<3x128x128xbf16, #tpu.memory_space<vmem>>, vector<1x128x128xbf16>
    %28 = vector.shape_cast %27 : vector<1x128x128xbf16> to vector<128x128xbf16>
    %cst_22 = arith.constant dense<0.000000e+00> : vector<2x128xf32>
    %29 = tpu.matmul %21, %28, %cst_22 {dimension_numbers = #tpu.dot_dimension_numbers<[1], [0], [0], [1], [0, 0, 1, 1], [], []>} : vector<2x128xbf16>, vector<128x128xbf16>, vector<2x128xf32> -> vector<2x128xf32>
    %c0_23 = arith.constant 0 : index
    %c0_24 = arith.constant 0 : index
    %c0_25 = arith.constant 0 : index
    %30 = vector.load %arg9[%c0_23, %c0_24, %c0_25] : memref<3x128x128xbf16, #tpu.memory_space<vmem>>, vector<1x128x128xbf16>
    %31 = vector.shape_cast %30 : vector<1x128x128xbf16> to vector<128x128xbf16>
    %cst_26 = arith.constant dense<0.000000e+00> : vector<2x128xf32>
    %32 = tpu.matmul %22, %31, %cst_26 {dimension_numbers = #tpu.dot_dimension_numbers<[1], [0], [0], [1], [0, 0, 1, 1], [], []>} : vector<2x128xbf16>, vector<128x128xbf16>, vector<2x128xf32> -> vector<2x128xf32>
    %c0_27 = arith.constant 0 : index
    %c0_28 = arith.constant 0 : index
    %c0_29 = arith.constant 0 : index
    %33 = vector.load %arg10[%c0_27, %c0_28, %c0_29] : memref<3x128x128xbf16, #tpu.memory_space<vmem>>, vector<1x128x128xbf16>
    %34 = vector.shape_cast %33 : vector<1x128x128xbf16> to vector<128x128xbf16>
    %cst_30 = arith.constant dense<0.000000e+00> : vector<2x128xf32>
    %35 = tpu.matmul %21, %34, %cst_30 {dimension_numbers = #tpu.dot_dimension_numbers<[1], [0], [0], [1], [0, 0, 1, 1], [], []>} : vector<2x128xbf16>, vector<128x128xbf16>, vector<2x128xf32> -> vector<2x128xf32>
    %c0_31 = arith.constant 0 : index
    %c0_32 = arith.constant 0 : index
    %c0_33 = arith.constant 0 : index
    %36 = vector.load %arg10[%c0_31, %c0_32, %c0_33] : memref<3x128x128xbf16, #tpu.memory_space<vmem>>, vector<1x128x128xbf16>
    %37 = vector.shape_cast %36 : vector<1x128x128xbf16> to vector<128x128xbf16>
    %cst_34 = arith.constant dense<0.000000e+00> : vector<2x128xf32>
    %38 = tpu.matmul %22, %37, %cst_34 {dimension_numbers = #tpu.dot_dimension_numbers<[1], [0], [0], [1], [0, 0, 1, 1], [], []>} : vector<2x128xbf16>, vector<128x128xbf16>, vector<2x128xf32> -> vector<2x128xf32>
    %39 = arith.mulf %26, %29 : vector<2x128xf32>
    %cst_35 = arith.constant dense<0.000000e+00> : vector<2xf32>
    %40 = vector.multi_reduction <add>, %39, %cst_35 [1] : vector<2x128xf32> to vector<2xf32>
    %41 = vector.shape_cast %40 : vector<2xf32> to vector<2x1xf32>
    %cst_36 = arith.constant 0.0883883461 : f32
    %42 = vector.broadcast %cst_36 : f32 to vector<2x1xf32>
    %43 = arith.mulf %41, %42 : vector<2x1xf32>
    %44 = arith.mulf %26, %32 : vector<2x128xf32>
    %cst_37 = arith.constant dense<0.000000e+00> : vector<2xf32>
    %45 = vector.multi_reduction <add>, %44, %cst_37 [1] : vector<2x128xf32> to vector<2xf32>
    %46 = vector.shape_cast %45 : vector<2xf32> to vector<2x1xf32>
    %cst_38 = arith.constant 0.0883883461 : f32
    %47 = vector.broadcast %cst_38 : f32 to vector<2x1xf32>
    %48 = arith.mulf %46, %47 : vector<2x1xf32>
    %49 = arith.maximumf %43, %48 : vector<2x1xf32>
    %50 = arith.subf %43, %49 : vector<2x1xf32>
    %51 = math.exp %50 : vector<2x1xf32>
    %52 = arith.subf %48, %49 : vector<2x1xf32>
    %53 = math.exp %52 : vector<2x1xf32>
    %54 = arith.addf %51, %53 : vector<2x1xf32>
    %55 = tpu.reciprocal %54 {approx = true} : vector<2x1xf32> -> vector<2x1xf32>
    %56 = arith.mulf %51, %55 : vector<2x1xf32>
    %57 = vector.broadcast %56 : vector<2x1xf32> to vector<2x128xf32>
    %58 = arith.mulf %57, %35 : vector<2x128xf32>
    %59 = arith.mulf %53, %55 : vector<2x1xf32>
    %60 = vector.broadcast %59 : vector<2x1xf32> to vector<2x128xf32>
    %61 = arith.mulf %60, %38 : vector<2x128xf32>
    %62 = arith.addf %58, %61 : vector<2x128xf32>
    %63 = arith.truncf %62 : vector<2x128xf32> to vector<2x128xbf16>
    %c0_39 = arith.constant 0 : index
    %c0_40 = arith.constant 0 : index
    %c0_41 = arith.constant 0 : index
    %64 = vector.load %arg11[%c0_39, %c0_40, %c0_41] : memref<3x128x128xbf16, #tpu.memory_space<vmem>>, vector<1x128x128xbf16>
    %65 = vector.shape_cast %64 : vector<1x128x128xbf16> to vector<128x128xbf16>
    %cst_42 = arith.constant dense<0.000000e+00> : vector<2x128xf32>
    %66 = tpu.matmul %63, %65, %cst_42 {dimension_numbers = #tpu.dot_dimension_numbers<[1], [0], [0], [1], [0, 0, 1, 1], [], []>} : vector<2x128xbf16>, vector<128x128xbf16>, vector<2x128xf32> -> vector<2x128xf32>
    %67 = arith.addf %4, %66 : vector<2x128xf32>
    %68 = arith.truncf %67 : vector<2x128xf32> to vector<2x128xbf16>
    %c1_43 = arith.constant 1 : index
    %c0_44 = arith.constant 0 : index
    %c0_45 = arith.constant 0 : index
    %69 = vector.load %arg8[%c1_43, %c0_44, %c0_45] : memref<3x128x128xbf16, #tpu.memory_space<vmem>>, vector<1x128x128xbf16>
    %70 = vector.shape_cast %69 : vector<1x128x128xbf16> to vector<128x128xbf16>
    %cst_46 = arith.constant dense<0.000000e+00> : vector<2x128xf32>
    %71 = tpu.matmul %68, %70, %cst_46 {dimension_numbers = #tpu.dot_dimension_numbers<[1], [0], [0], [1], [0, 0, 1, 1], [], []>} : vector<2x128xbf16>, vector<128x128xbf16>, vector<2x128xf32> -> vector<2x128xf32>
    %c1_47 = arith.constant 1 : index
    %c0_48 = arith.constant 0 : index
    %c0_49 = arith.constant 0 : index
    %72 = vector.load %arg9[%c1_47, %c0_48, %c0_49] : memref<3x128x128xbf16, #tpu.memory_space<vmem>>, vector<1x128x128xbf16>
    %73 = vector.shape_cast %72 : vector<1x128x128xbf16> to vector<128x128xbf16>
    %cst_50 = arith.constant dense<0.000000e+00> : vector<2x128xf32>
    %74 = tpu.matmul %21, %73, %cst_50 {dimension_numbers = #tpu.dot_dimension_numbers<[1], [0], [0], [1], [0, 0, 1, 1], [], []>} : vector<2x128xbf16>, vector<128x128xbf16>, vector<2x128xf32> -> vector<2x128xf32>
    %c1_51 = arith.constant 1 : index
    %c0_52 = arith.constant 0 : index
    %c0_53 = arith.constant 0 : index
    %75 = vector.load %arg9[%c1_51, %c0_52, %c0_53] : memref<3x128x128xbf16, #tpu.memory_space<vmem>>, vector<1x128x128xbf16>
    %76 = vector.shape_cast %75 : vector<1x128x128xbf16> to vector<128x128xbf16>
    %cst_54 = arith.constant dense<0.000000e+00> : vector<2x128xf32>
    %77 = tpu.matmul %22, %76, %cst_54 {dimension_numbers = #tpu.dot_dimension_numbers<[1], [0], [0], [1], [0, 0, 1, 1], [], []>} : vector<2x128xbf16>, vector<128x128xbf16>, vector<2x128xf32> -> vector<2x128xf32>
    %c1_55 = arith.constant 1 : index
    %c0_56 = arith.constant 0 : index
    %c0_57 = arith.constant 0 : index
    %78 = vector.load %arg10[%c1_55, %c0_56, %c0_57] : memref<3x128x128xbf16, #tpu.memory_space<vmem>>, vector<1x128x128xbf16>
    %79 = vector.shape_cast %78 : vector<1x128x128xbf16> to vector<128x128xbf16>
    %cst_58 = arith.constant dense<0.000000e+00> : vector<2x128xf32>
    %80 = tpu.matmul %21, %79, %cst_58 {dimension_numbers = #tpu.dot_dimension_numbers<[1], [0], [0], [1], [0, 0, 1, 1], [], []>} : vector<2x128xbf16>, vector<128x128xbf16>, vector<2x128xf32> -> vector<2x128xf32>
    %c1_59 = arith.constant 1 : index
    %c0_60 = arith.constant 0 : index
    %c0_61 = arith.constant 0 : index
    %81 = vector.load %arg10[%c1_59, %c0_60, %c0_61] : memref<3x128x128xbf16, #tpu.memory_space<vmem>>, vector<1x128x128xbf16>
    %82 = vector.shape_cast %81 : vector<1x128x128xbf16> to vector<128x128xbf16>
    %cst_62 = arith.constant dense<0.000000e+00> : vector<2x128xf32>
    %83 = tpu.matmul %22, %82, %cst_62 {dimension_numbers = #tpu.dot_dimension_numbers<[1], [0], [0], [1], [0, 0, 1, 1], [], []>} : vector<2x128xbf16>, vector<128x128xbf16>, vector<2x128xf32> -> vector<2x128xf32>
    %84 = arith.mulf %71, %74 : vector<2x128xf32>
    %cst_63 = arith.constant dense<0.000000e+00> : vector<2xf32>
    %85 = vector.multi_reduction <add>, %84, %cst_63 [1] : vector<2x128xf32> to vector<2xf32>
    %86 = vector.shape_cast %85 : vector<2xf32> to vector<2x1xf32>
    %cst_64 = arith.constant 0.0883883461 : f32
    %87 = vector.broadcast %cst_64 : f32 to vector<2x1xf32>
    %88 = arith.mulf %86, %87 : vector<2x1xf32>
    %89 = arith.mulf %71, %77 : vector<2x128xf32>
    %cst_65 = arith.constant dense<0.000000e+00> : vector<2xf32>
    %90 = vector.multi_reduction <add>, %89, %cst_65 [1] : vector<2x128xf32> to vector<2xf32>
    %91 = vector.shape_cast %90 : vector<2xf32> to vector<2x1xf32>
    %cst_66 = arith.constant 0.0883883461 : f32
    %92 = vector.broadcast %cst_66 : f32 to vector<2x1xf32>
    %93 = arith.mulf %91, %92 : vector<2x1xf32>
    %94 = arith.maximumf %88, %93 : vector<2x1xf32>
    %95 = arith.subf %88, %94 : vector<2x1xf32>
    %96 = math.exp %95 : vector<2x1xf32>
    %97 = arith.subf %93, %94 : vector<2x1xf32>
    %98 = math.exp %97 : vector<2x1xf32>
    %99 = arith.addf %96, %98 : vector<2x1xf32>
    %100 = tpu.reciprocal %99 {approx = true} : vector<2x1xf32> -> vector<2x1xf32>
    %101 = arith.mulf %96, %100 : vector<2x1xf32>
    %102 = vector.broadcast %101 : vector<2x1xf32> to vector<2x128xf32>
    %103 = arith.mulf %102, %80 : vector<2x128xf32>
    %104 = arith.mulf %98, %100 : vector<2x1xf32>
    %105 = vector.broadcast %104 : vector<2x1xf32> to vector<2x128xf32>
    %106 = arith.mulf %105, %83 : vector<2x128xf32>
    %107 = arith.addf %103, %106 : vector<2x128xf32>
    %108 = arith.truncf %107 : vector<2x128xf32> to vector<2x128xbf16>
    %c1_67 = arith.constant 1 : index
    %c0_68 = arith.constant 0 : index
    %c0_69 = arith.constant 0 : index
    %109 = vector.load %arg11[%c1_67, %c0_68, %c0_69] : memref<3x128x128xbf16, #tpu.memory_space<vmem>>, vector<1x128x128xbf16>
    %110 = vector.shape_cast %109 : vector<1x128x128xbf16> to vector<128x128xbf16>
    %cst_70 = arith.constant dense<0.000000e+00> : vector<2x128xf32>
    %111 = tpu.matmul %108, %110, %cst_70 {dimension_numbers = #tpu.dot_dimension_numbers<[1], [0], [0], [1], [0, 0, 1, 1], [], []>} : vector<2x128xbf16>, vector<128x128xbf16>, vector<2x128xf32> -> vector<2x128xf32>
    %112 = arith.addf %67, %111 : vector<2x128xf32>
    %113 = arith.truncf %112 : vector<2x128xf32> to vector<2x128xbf16>
    %c2 = arith.constant 2 : index
    %c0_71 = arith.constant 0 : index
    %c0_72 = arith.constant 0 : index
    %114 = vector.load %arg8[%c2, %c0_71, %c0_72] : memref<3x128x128xbf16, #tpu.memory_space<vmem>>, vector<1x128x128xbf16>
    %115 = vector.shape_cast %114 : vector<1x128x128xbf16> to vector<128x128xbf16>
    %cst_73 = arith.constant dense<0.000000e+00> : vector<2x128xf32>
    %116 = tpu.matmul %113, %115, %cst_73 {dimension_numbers = #tpu.dot_dimension_numbers<[1], [0], [0], [1], [0, 0, 1, 1], [], []>} : vector<2x128xbf16>, vector<128x128xbf16>, vector<2x128xf32> -> vector<2x128xf32>
    %c2_74 = arith.constant 2 : index
    %c0_75 = arith.constant 0 : index
    %c0_76 = arith.constant 0 : index
    %117 = vector.load %arg9[%c2_74, %c0_75, %c0_76] : memref<3x128x128xbf16, #tpu.memory_space<vmem>>, vector<1x128x128xbf16>
    %118 = vector.shape_cast %117 : vector<1x128x128xbf16> to vector<128x128xbf16>
    %cst_77 = arith.constant dense<0.000000e+00> : vector<2x128xf32>
    %119 = tpu.matmul %21, %118, %cst_77 {dimension_numbers = #tpu.dot_dimension_numbers<[1], [0], [0], [1], [0, 0, 1, 1], [], []>} : vector<2x128xbf16>, vector<128x128xbf16>, vector<2x128xf32> -> vector<2x128xf32>
    %c2_78 = arith.constant 2 : index
    %c0_79 = arith.constant 0 : index
    %c0_80 = arith.constant 0 : index
    %120 = vector.load %arg9[%c2_78, %c0_79, %c0_80] : memref<3x128x128xbf16, #tpu.memory_space<vmem>>, vector<1x128x128xbf16>
    %121 = vector.shape_cast %120 : vector<1x128x128xbf16> to vector<128x128xbf16>
    %cst_81 = arith.constant dense<0.000000e+00> : vector<2x128xf32>
    %122 = tpu.matmul %22, %121, %cst_81 {dimension_numbers = #tpu.dot_dimension_numbers<[1], [0], [0], [1], [0, 0, 1, 1], [], []>} : vector<2x128xbf16>, vector<128x128xbf16>, vector<2x128xf32> -> vector<2x128xf32>
    %c2_82 = arith.constant 2 : index
    %c0_83 = arith.constant 0 : index
    %c0_84 = arith.constant 0 : index
    %123 = vector.load %arg10[%c2_82, %c0_83, %c0_84] : memref<3x128x128xbf16, #tpu.memory_space<vmem>>, vector<1x128x128xbf16>
    %124 = vector.shape_cast %123 : vector<1x128x128xbf16> to vector<128x128xbf16>
    %cst_85 = arith.constant dense<0.000000e+00> : vector<2x128xf32>
    %125 = tpu.matmul %21, %124, %cst_85 {dimension_numbers = #tpu.dot_dimension_numbers<[1], [0], [0], [1], [0, 0, 1, 1], [], []>} : vector<2x128xbf16>, vector<128x128xbf16>, vector<2x128xf32> -> vector<2x128xf32>
    %c2_86 = arith.constant 2 : index
    %c0_87 = arith.constant 0 : index
    %c0_88 = arith.constant 0 : index
    %126 = vector.load %arg10[%c2_86, %c0_87, %c0_88] : memref<3x128x128xbf16, #tpu.memory_space<vmem>>, vector<1x128x128xbf16>
    %127 = vector.shape_cast %126 : vector<1x128x128xbf16> to vector<128x128xbf16>
    %cst_89 = arith.constant dense<0.000000e+00> : vector<2x128xf32>
    %128 = tpu.matmul %22, %127, %cst_89 {dimension_numbers = #tpu.dot_dimension_numbers<[1], [0], [0], [1], [0, 0, 1, 1], [], []>} : vector<2x128xbf16>, vector<128x128xbf16>, vector<2x128xf32> -> vector<2x128xf32>
    %129 = arith.mulf %116, %119 : vector<2x128xf32>
    %cst_90 = arith.constant dense<0.000000e+00> : vector<2xf32>
    %130 = vector.multi_reduction <add>, %129, %cst_90 [1] : vector<2x128xf32> to vector<2xf32>
    %131 = vector.shape_cast %130 : vector<2xf32> to vector<2x1xf32>
    %cst_91 = arith.constant 0.0883883461 : f32
    %132 = vector.broadcast %cst_91 : f32 to vector<2x1xf32>
    %133 = arith.mulf %131, %132 : vector<2x1xf32>
    %134 = arith.mulf %116, %122 : vector<2x128xf32>
    %cst_92 = arith.constant dense<0.000000e+00> : vector<2xf32>
    %135 = vector.multi_reduction <add>, %134, %cst_92 [1] : vector<2x128xf32> to vector<2xf32>
    %136 = vector.shape_cast %135 : vector<2xf32> to vector<2x1xf32>
    %cst_93 = arith.constant 0.0883883461 : f32
    %137 = vector.broadcast %cst_93 : f32 to vector<2x1xf32>
    %138 = arith.mulf %136, %137 : vector<2x1xf32>
    %139 = arith.maximumf %133, %138 : vector<2x1xf32>
    %140 = arith.subf %133, %139 : vector<2x1xf32>
    %141 = math.exp %140 : vector<2x1xf32>
    %142 = arith.subf %138, %139 : vector<2x1xf32>
    %143 = math.exp %142 : vector<2x1xf32>
    %144 = arith.addf %141, %143 : vector<2x1xf32>
    %145 = tpu.reciprocal %144 {approx = true} : vector<2x1xf32> -> vector<2x1xf32>
    %146 = arith.mulf %141, %145 : vector<2x1xf32>
    %147 = vector.broadcast %146 : vector<2x1xf32> to vector<2x128xf32>
    %148 = arith.mulf %147, %125 : vector<2x128xf32>
    %149 = arith.mulf %143, %145 : vector<2x1xf32>
    %150 = vector.broadcast %149 : vector<2x1xf32> to vector<2x128xf32>
    %151 = arith.mulf %150, %128 : vector<2x128xf32>
    %152 = arith.addf %148, %151 : vector<2x128xf32>
    %153 = arith.truncf %152 : vector<2x128xf32> to vector<2x128xbf16>
    %c2_94 = arith.constant 2 : index
    %c0_95 = arith.constant 0 : index
    %c0_96 = arith.constant 0 : index
    %154 = vector.load %arg11[%c2_94, %c0_95, %c0_96] : memref<3x128x128xbf16, #tpu.memory_space<vmem>>, vector<1x128x128xbf16>
    %155 = vector.shape_cast %154 : vector<1x128x128xbf16> to vector<128x128xbf16>
    %cst_97 = arith.constant dense<0.000000e+00> : vector<2x128xf32>
    %156 = tpu.matmul %153, %155, %cst_97 {dimension_numbers = #tpu.dot_dimension_numbers<[1], [0], [0], [1], [0, 0, 1, 1], [], []>} : vector<2x128xbf16>, vector<128x128xbf16>, vector<2x128xf32> -> vector<2x128xf32>
    %157 = arith.addf %112, %156 : vector<2x128xf32>
    %c0_98 = arith.constant 0 : index
    %c0_99 = arith.constant 0 : index
    %158 = vector.load %arg0[%c0_98, %c0_99] : memref<1024x32xbf16, #tpu.memory_space<vmem>>, vector<1024x32xbf16>
    %c0_100 = arith.constant 0 : index
    %c0_101 = arith.constant 0 : index
    %159 = vector.load %arg12[%c0_100, %c0_101] : memref<32x32xbf16, #tpu.memory_space<vmem>>, vector<32x32xbf16>
    %cst_102 = arith.constant dense<0.000000e+00> : vector<1024x32xf32>
    %160 = tpu.matmul %158, %159, %cst_102 {dimension_numbers = #tpu.dot_dimension_numbers<[1], [0], [0], [1], [0, 0, 1, 1], [], []>} : vector<1024x32xbf16>, vector<32x32xbf16>, vector<1024x32xf32> -> vector<1024x32xf32>
    %c0_103 = arith.constant 0 : index
    %c0_104 = arith.constant 0 : index
    %161 = vector.load %arg13[%c0_103, %c0_104] : memref<1x32xf32, #tpu.memory_space<vmem>>, vector<1x32xf32>
    %162 = vector.broadcast %161 : vector<1x32xf32> to vector<1024x32xf32>
    %163 = arith.addf %160, %162 : vector<1024x32xf32>
    %164 = arith.truncf %9 : vector<2x128xf32> to vector<2x128xbf16>
    %c0_105 = arith.constant 0 : index
    %c0_106 = arith.constant 0 : index
    %165 = vector.load %arg14[%c0_105, %c0_106] : memref<128x32xbf16, #tpu.memory_space<vmem>>, vector<128x32xbf16>
    %cst_107 = arith.constant dense<0.000000e+00> : vector<2x32xf32>
    %166 = tpu.matmul %164, %165, %cst_107 {dimension_numbers = #tpu.dot_dimension_numbers<[1], [0], [0], [1], [0, 0, 1, 1], [], []>} : vector<2x128xbf16>, vector<128x32xbf16>, vector<2x32xf32> -> vector<2x32xf32>
    %c0_108 = arith.constant 0 : index
    %c0_109 = arith.constant 0 : index
    %167 = vector.load %arg15[%c0_108, %c0_109] : memref<1x32xf32, #tpu.memory_space<vmem>>, vector<1x32xf32>
    %168 = vector.broadcast %167 : vector<1x32xf32> to vector<2x32xf32>
    %169 = arith.addf %166, %168 : vector<2x32xf32>
    %c0_110 = arith.constant 0 : index
    %c0_111 = arith.constant 0 : index
    %170 = vector.load %arg16[%c0_110, %c0_111] : memref<128x32xbf16, #tpu.memory_space<vmem>>, vector<128x32xbf16>
    %cst_112 = arith.constant dense<0.000000e+00> : vector<2x32xf32>
    %171 = tpu.matmul %164, %170, %cst_112 {dimension_numbers = #tpu.dot_dimension_numbers<[1], [0], [0], [1], [0, 0, 1, 1], [], []>} : vector<2x128xbf16>, vector<128x32xbf16>, vector<2x32xf32> -> vector<2x32xf32>
    %c0_113 = arith.constant 0 : index
    %c0_114 = arith.constant 0 : index
    %172 = vector.load %arg17[%c0_113, %c0_114] : memref<1x32xf32, #tpu.memory_space<vmem>>, vector<1x32xf32>
    %173 = vector.broadcast %172 : vector<1x32xf32> to vector<2x32xf32>
    %174 = arith.addf %171, %173 : vector<2x32xf32>
    %175 = tpu.iota {dimensions = array<i32: 0>} : vector<2x1xi32>
    %cst_115 = arith.constant 0.000000e+00 : f32
    %176 = vector.broadcast %cst_115 : f32 to vector<2x32xf32>
    %cst_116 = arith.constant 0.000000e+00 : f32
    %177 = vector.broadcast %cst_116 : f32 to vector<2x32xf32>
    %178 = vector.extract_strided_slice %163 {offsets = [0, 0], sizes = [256, 32], strides = [1, 1]} : vector<1024x32xf32> to vector<256x32xf32>
    %179 = vector.extract_strided_slice %169 {offsets = [0, 0], sizes = [1, 32], strides = [1, 1]} : vector<2x32xf32> to vector<1x32xf32>
    %cst_117 = arith.constant 1.000000e+00 : f32
    %180 = vector.broadcast %cst_117 : f32 to vector<1x32xf32>
    %181 = arith.addf %180, %179 : vector<1x32xf32>
    %182 = vector.broadcast %181 : vector<1x32xf32> to vector<256x32xf32>
    %183 = arith.mulf %178, %182 : vector<256x32xf32>
    %184 = vector.extract_strided_slice %174 {offsets = [0, 0], sizes = [1, 32], strides = [1, 1]} : vector<2x32xf32> to vector<1x32xf32>
    %185 = vector.broadcast %184 : vector<1x32xf32> to vector<256x32xf32>
    %186 = arith.addf %183, %185 : vector<256x32xf32>
    %cst_118 = arith.constant 0.000000e+00 : f32
    %187 = vector.broadcast %cst_118 : f32 to vector<256x32xf32>
    %188 = arith.maximumf %186, %187 : vector<256x32xf32>
    %cst_119 = arith.constant dense<0.000000e+00> : vector<32xf32>
    %189 = vector.multi_reduction <add>, %188, %cst_119 [0] : vector<256x32xf32> to vector<32xf32>
    %190 = vector.shape_cast %189 : vector<32xf32> to vector<1x32xf32>
    %cst_120 = arith.constant 3.906250e-03 : f32
    %191 = vector.broadcast %cst_120 : f32 to vector<1x32xf32>
    %192 = arith.mulf %190, %191 : vector<1x32xf32>
    %c0_i32 = arith.constant 0 : i32
    %193 = vector.broadcast %c0_i32 : i32 to vector<2x1xi32>
    %194 = arith.cmpi eq, %175, %193 : vector<2x1xi32>
    %195 = arith.extui %194 : vector<2x1xi1> to vector<2x1xi32>
    %196 = arith.sitofp %195 : vector<2x1xi32> to vector<2x1xf32>
    %197 = vector.broadcast %196 : vector<2x1xf32> to vector<2x32xf32>
    %198 = vector.broadcast %192 : vector<1x32xf32> to vector<2x32xf32>
    %199 = arith.mulf %197, %198 : vector<2x32xf32>
    %200 = arith.addf %176, %199 : vector<2x32xf32>
    %201 = vector.extract_strided_slice %163 {offsets = [256, 0], sizes = [256, 32], strides = [1, 1]} : vector<1024x32xf32> to vector<256x32xf32>
    %202 = vector.extract_strided_slice %169 {offsets = [0, 0], sizes = [1, 32], strides = [1, 1]} : vector<2x32xf32> to vector<1x32xf32>
    %cst_121 = arith.constant 1.000000e+00 : f32
    %203 = vector.broadcast %cst_121 : f32 to vector<1x32xf32>
    %204 = arith.addf %203, %202 : vector<1x32xf32>
    %205 = vector.broadcast %204 : vector<1x32xf32> to vector<256x32xf32>
    %206 = arith.mulf %201, %205 : vector<256x32xf32>
    %207 = vector.extract_strided_slice %174 {offsets = [0, 0], sizes = [1, 32], strides = [1, 1]} : vector<2x32xf32> to vector<1x32xf32>
    %208 = vector.broadcast %207 : vector<1x32xf32> to vector<256x32xf32>
    %209 = arith.addf %206, %208 : vector<256x32xf32>
    %cst_122 = arith.constant 0.000000e+00 : f32
    %210 = vector.broadcast %cst_122 : f32 to vector<256x32xf32>
    %211 = arith.maximumf %209, %210 : vector<256x32xf32>
    %cst_123 = arith.constant dense<0.000000e+00> : vector<32xf32>
    %212 = vector.multi_reduction <add>, %211, %cst_123 [0] : vector<256x32xf32> to vector<32xf32>
    %213 = vector.shape_cast %212 : vector<32xf32> to vector<1x32xf32>
    %cst_124 = arith.constant 3.906250e-03 : f32
    %214 = vector.broadcast %cst_124 : f32 to vector<1x32xf32>
    %215 = arith.mulf %213, %214 : vector<1x32xf32>
    %c0_i32_125 = arith.constant 0 : i32
    %216 = vector.broadcast %c0_i32_125 : i32 to vector<2x1xi32>
    %217 = arith.cmpi eq, %175, %216 : vector<2x1xi32>
    %218 = arith.extui %217 : vector<2x1xi1> to vector<2x1xi32>
    %219 = arith.sitofp %218 : vector<2x1xi32> to vector<2x1xf32>
    %220 = vector.broadcast %219 : vector<2x1xf32> to vector<2x32xf32>
    %221 = vector.broadcast %215 : vector<1x32xf32> to vector<2x32xf32>
    %222 = arith.mulf %220, %221 : vector<2x32xf32>
    %223 = arith.addf %177, %222 : vector<2x32xf32>
    %224 = vector.extract_strided_slice %163 {offsets = [512, 0], sizes = [256, 32], strides = [1, 1]} : vector<1024x32xf32> to vector<256x32xf32>
    %225 = vector.extract_strided_slice %169 {offsets = [1, 0], sizes = [1, 32], strides = [1, 1]} : vector<2x32xf32> to vector<1x32xf32>
    %cst_126 = arith.constant 1.000000e+00 : f32
    %226 = vector.broadcast %cst_126 : f32 to vector<1x32xf32>
    %227 = arith.addf %226, %225 : vector<1x32xf32>
    %228 = vector.broadcast %227 : vector<1x32xf32> to vector<256x32xf32>
    %229 = arith.mulf %224, %228 : vector<256x32xf32>
    %230 = vector.extract_strided_slice %174 {offsets = [1, 0], sizes = [1, 32], strides = [1, 1]} : vector<2x32xf32> to vector<1x32xf32>
    %231 = vector.broadcast %230 : vector<1x32xf32> to vector<256x32xf32>
    %232 = arith.addf %229, %231 : vector<256x32xf32>
    %cst_127 = arith.constant 0.000000e+00 : f32
    %233 = vector.broadcast %cst_127 : f32 to vector<256x32xf32>
    %234 = arith.maximumf %232, %233 : vector<256x32xf32>
    %cst_128 = arith.constant dense<0.000000e+00> : vector<32xf32>
    %235 = vector.multi_reduction <add>, %234, %cst_128 [0] : vector<256x32xf32> to vector<32xf32>
    %236 = vector.shape_cast %235 : vector<32xf32> to vector<1x32xf32>
    %cst_129 = arith.constant 3.906250e-03 : f32
    %237 = vector.broadcast %cst_129 : f32 to vector<1x32xf32>
    %238 = arith.mulf %236, %237 : vector<1x32xf32>
    %c1_i32 = arith.constant 1 : i32
    %239 = vector.broadcast %c1_i32 : i32 to vector<2x1xi32>
    %240 = arith.cmpi eq, %175, %239 : vector<2x1xi32>
    %241 = arith.extui %240 : vector<2x1xi1> to vector<2x1xi32>
    %242 = arith.sitofp %241 : vector<2x1xi32> to vector<2x1xf32>
    %243 = vector.broadcast %242 : vector<2x1xf32> to vector<2x32xf32>
    %244 = vector.broadcast %238 : vector<1x32xf32> to vector<2x32xf32>
    %245 = arith.mulf %243, %244 : vector<2x32xf32>
    %246 = arith.addf %200, %245 : vector<2x32xf32>
    %247 = vector.extract_strided_slice %163 {offsets = [768, 0], sizes = [256, 32], strides = [1, 1]} : vector<1024x32xf32> to vector<256x32xf32>
    %248 = vector.extract_strided_slice %169 {offsets = [1, 0], sizes = [1, 32], strides = [1, 1]} : vector<2x32xf32> to vector<1x32xf32>
    %cst_130 = arith.constant 1.000000e+00 : f32
    %249 = vector.broadcast %cst_130 : f32 to vector<1x32xf32>
    %250 = arith.addf %249, %248 : vector<1x32xf32>
    %251 = vector.broadcast %250 : vector<1x32xf32> to vector<256x32xf32>
    %252 = arith.mulf %247, %251 : vector<256x32xf32>
    %253 = vector.extract_strided_slice %174 {offsets = [1, 0], sizes = [1, 32], strides = [1, 1]} : vector<2x32xf32> to vector<1x32xf32>
    %254 = vector.broadcast %253 : vector<1x32xf32> to vector<256x32xf32>
    %255 = arith.addf %252, %254 : vector<256x32xf32>
    %cst_131 = arith.constant 0.000000e+00 : f32
    %256 = vector.broadcast %cst_131 : f32 to vector<256x32xf32>
    %257 = arith.maximumf %255, %256 : vector<256x32xf32>
    %cst_132 = arith.constant dense<0.000000e+00> : vector<32xf32>
    %258 = vector.multi_reduction <add>, %257, %cst_132 [0] : vector<256x32xf32> to vector<32xf32>
    %259 = vector.shape_cast %258 : vector<32xf32> to vector<1x32xf32>
    %cst_133 = arith.constant 3.906250e-03 : f32
    %260 = vector.broadcast %cst_133 : f32 to vector<1x32xf32>
    %261 = arith.mulf %259, %260 : vector<1x32xf32>
    %c1_i32_134 = arith.constant 1 : i32
    %262 = vector.broadcast %c1_i32_134 : i32 to vector<2x1xi32>
    %263 = arith.cmpi eq, %175, %262 : vector<2x1xi32>
    %264 = arith.extui %263 : vector<2x1xi1> to vector<2x1xi32>
    %265 = arith.sitofp %264 : vector<2x1xi32> to vector<2x1xf32>
    %266 = vector.broadcast %265 : vector<2x1xf32> to vector<2x32xf32>
    %267 = vector.broadcast %261 : vector<1x32xf32> to vector<2x32xf32>
    %268 = arith.mulf %266, %267 : vector<2x32xf32>
    %269 = arith.addf %223, %268 : vector<2x32xf32>
    %c0_135 = arith.constant 0 : index
    %c0_136 = arith.constant 0 : index
    %270 = vector.load %arg3[%c0_135, %c0_136] : memref<2x9xf32, #tpu.memory_space<vmem>>, vector<2x9xf32>
    %271 = arith.truncf %270 : vector<2x9xf32> to vector<2x9xbf16>
    %c0_137 = arith.constant 0 : index
    %c0_138 = arith.constant 0 : index
    %272 = vector.load %arg21[%c0_137, %c0_138] : memref<9x128xbf16, #tpu.memory_space<vmem>>, vector<9x128xbf16>
    %cst_139 = arith.constant dense<0.000000e+00> : vector<2x128xf32>
    %273 = tpu.matmul %271, %272, %cst_139 {dimension_numbers = #tpu.dot_dimension_numbers<[1], [0], [0], [1], [0, 0, 1, 1], [], []>} : vector<2x9xbf16>, vector<9x128xbf16>, vector<2x128xf32> -> vector<2x128xf32>
    %274 = arith.truncf %157 : vector<2x128xf32> to vector<2x128xbf16>
    %c0_140 = arith.constant 0 : index
    %c0_141 = arith.constant 0 : index
    %275 = vector.load %arg22[%c0_140, %c0_141] : memref<128x128xbf16, #tpu.memory_space<vmem>>, vector<128x128xbf16>
    %cst_142 = arith.constant dense<0.000000e+00> : vector<2x128xf32>
    %276 = tpu.matmul %274, %275, %cst_142 {dimension_numbers = #tpu.dot_dimension_numbers<[1], [0], [0], [1], [0, 0, 1, 1], [], []>} : vector<2x128xbf16>, vector<128x128xbf16>, vector<2x128xf32> -> vector<2x128xf32>
    %277 = arith.addf %273, %276 : vector<2x128xf32>
    %278 = arith.truncf %246 : vector<2x32xf32> to vector<2x32xbf16>
    %c0_143 = arith.constant 0 : index
    %c0_144 = arith.constant 0 : index
    %279 = vector.load %arg18[%c0_143, %c0_144] : memref<32x64xbf16, #tpu.memory_space<vmem>>, vector<32x64xbf16>
    %cst_145 = arith.constant dense<0.000000e+00> : vector<2x64xf32>
    %280 = tpu.matmul %278, %279, %cst_145 {dimension_numbers = #tpu.dot_dimension_numbers<[1], [0], [0], [1], [0, 0, 1, 1], [], []>} : vector<2x32xbf16>, vector<32x64xbf16>, vector<2x64xf32> -> vector<2x64xf32>
    %c0_146 = arith.constant 0 : index
    %c0_147 = arith.constant 0 : index
    %281 = vector.load %arg19[%c0_146, %c0_147] : memref<1x64xf32, #tpu.memory_space<vmem>>, vector<1x64xf32>
    %282 = vector.broadcast %281 : vector<1x64xf32> to vector<2x64xf32>
    %283 = arith.addf %280, %282 : vector<2x64xf32>
    %284 = arith.truncf %283 : vector<2x64xf32> to vector<2x64xbf16>
    %c0_148 = arith.constant 0 : index
    %c0_149 = arith.constant 0 : index
    %c0_150 = arith.constant 0 : index
    %285 = vector.load %arg20[%c0_148, %c0_149, %c0_150] : memref<2x64x128xbf16, #tpu.memory_space<vmem>>, vector<1x64x128xbf16>
    %286 = vector.shape_cast %285 : vector<1x64x128xbf16> to vector<64x128xbf16>
    %cst_151 = arith.constant dense<0.000000e+00> : vector<2x128xf32>
    %287 = tpu.matmul %284, %286, %cst_151 {dimension_numbers = #tpu.dot_dimension_numbers<[1], [0], [0], [1], [0, 0, 1, 1], [], []>} : vector<2x64xbf16>, vector<64x128xbf16>, vector<2x128xf32> -> vector<2x128xf32>
    %288 = arith.addf %277, %287 : vector<2x128xf32>
    %289 = arith.truncf %269 : vector<2x32xf32> to vector<2x32xbf16>
    %c0_152 = arith.constant 0 : index
    %c0_153 = arith.constant 0 : index
    %290 = vector.load %arg18[%c0_152, %c0_153] : memref<32x64xbf16, #tpu.memory_space<vmem>>, vector<32x64xbf16>
    %cst_154 = arith.constant dense<0.000000e+00> : vector<2x64xf32>
    %291 = tpu.matmul %289, %290, %cst_154 {dimension_numbers = #tpu.dot_dimension_numbers<[1], [0], [0], [1], [0, 0, 1, 1], [], []>} : vector<2x32xbf16>, vector<32x64xbf16>, vector<2x64xf32> -> vector<2x64xf32>
    %c0_155 = arith.constant 0 : index
    %c0_156 = arith.constant 0 : index
    %292 = vector.load %arg19[%c0_155, %c0_156] : memref<1x64xf32, #tpu.memory_space<vmem>>, vector<1x64xf32>
    %293 = vector.broadcast %292 : vector<1x64xf32> to vector<2x64xf32>
    %294 = arith.addf %291, %293 : vector<2x64xf32>
    %295 = arith.truncf %294 : vector<2x64xf32> to vector<2x64xbf16>
    %c1_157 = arith.constant 1 : index
    %c0_158 = arith.constant 0 : index
    %c0_159 = arith.constant 0 : index
    %296 = vector.load %arg20[%c1_157, %c0_158, %c0_159] : memref<2x64x128xbf16, #tpu.memory_space<vmem>>, vector<1x64x128xbf16>
    %297 = vector.shape_cast %296 : vector<1x64x128xbf16> to vector<64x128xbf16>
    %cst_160 = arith.constant dense<0.000000e+00> : vector<2x128xf32>
    %298 = tpu.matmul %295, %297, %cst_160 {dimension_numbers = #tpu.dot_dimension_numbers<[1], [0], [0], [1], [0, 0, 1, 1], [], []>} : vector<2x64xbf16>, vector<64x128xbf16>, vector<2x128xf32> -> vector<2x128xf32>
    %299 = arith.addf %288, %298 : vector<2x128xf32>
    %c0_161 = arith.constant 0 : index
    %c0_162 = arith.constant 0 : index
    %300 = vector.load %arg23[%c0_161, %c0_162] : memref<1x128xf32, #tpu.memory_space<vmem>>, vector<1x128xf32>
    %301 = vector.broadcast %300 : vector<1x128xf32> to vector<2x128xf32>
    %302 = arith.addf %299, %301 : vector<2x128xf32>
    %cst_163 = arith.constant 0.000000e+00 : f32
    %303 = vector.broadcast %cst_163 : f32 to vector<2x128xf32>
    %304 = arith.maximumf %302, %303 : vector<2x128xf32>
    %305 = arith.truncf %304 : vector<2x128xf32> to vector<2x128xbf16>
    %c0_164 = arith.constant 0 : index
    %c0_165 = arith.constant 0 : index
    %c0_166 = arith.constant 0 : index
    %306 = vector.load %arg24[%c0_164, %c0_165, %c0_166] : memref<3x128x128xbf16, #tpu.memory_space<vmem>>, vector<1x128x128xbf16>
    %307 = vector.shape_cast %306 : vector<1x128x128xbf16> to vector<128x128xbf16>
    %cst_167 = arith.constant dense<0.000000e+00> : vector<2x128xf32>
    %308 = tpu.matmul %305, %307, %cst_167 {dimension_numbers = #tpu.dot_dimension_numbers<[1], [0], [0], [1], [0, 0, 1, 1], [], []>} : vector<2x128xbf16>, vector<128x128xbf16>, vector<2x128xf32> -> vector<2x128xf32>
    %c0_168 = arith.constant 0 : index
    %c0_169 = arith.constant 0 : index
    %c0_170 = arith.constant 0 : index
    %309 = vector.load %arg25[%c0_168, %c0_169, %c0_170] : memref<3x1x128xf32, #tpu.memory_space<vmem>>, vector<1x1x128xf32>
    %310 = vector.shape_cast %309 : vector<1x1x128xf32> to vector<1x128xf32>
    %311 = vector.broadcast %310 : vector<1x128xf32> to vector<2x128xf32>
    %312 = arith.addf %308, %311 : vector<2x128xf32>
    %cst_171 = arith.constant 0.000000e+00 : f32
    %313 = vector.broadcast %cst_171 : f32 to vector<2x128xf32>
    %314 = arith.maximumf %312, %313 : vector<2x128xf32>
    %315 = arith.truncf %314 : vector<2x128xf32> to vector<2x128xbf16>
    %c1_172 = arith.constant 1 : index
    %c0_173 = arith.constant 0 : index
    %c0_174 = arith.constant 0 : index
    %316 = vector.load %arg24[%c1_172, %c0_173, %c0_174] : memref<3x128x128xbf16, #tpu.memory_space<vmem>>, vector<1x128x128xbf16>
    %317 = vector.shape_cast %316 : vector<1x128x128xbf16> to vector<128x128xbf16>
    %cst_175 = arith.constant dense<0.000000e+00> : vector<2x128xf32>
    %318 = tpu.matmul %315, %317, %cst_175 {dimension_numbers = #tpu.dot_dimension_numbers<[1], [0], [0], [1], [0, 0, 1, 1], [], []>} : vector<2x128xbf16>, vector<128x128xbf16>, vector<2x128xf32> -> vector<2x128xf32>
    %c1_176 = arith.constant 1 : index
    %c0_177 = arith.constant 0 : index
    %c0_178 = arith.constant 0 : index
    %319 = vector.load %arg25[%c1_176, %c0_177, %c0_178] : memref<3x1x128xf32, #tpu.memory_space<vmem>>, vector<1x1x128xf32>
    %320 = vector.shape_cast %319 : vector<1x1x128xf32> to vector<1x128xf32>
    %321 = vector.broadcast %320 : vector<1x128xf32> to vector<2x128xf32>
    %322 = arith.addf %318, %321 : vector<2x128xf32>
    %cst_179 = arith.constant 0.000000e+00 : f32
    %323 = vector.broadcast %cst_179 : f32 to vector<2x128xf32>
    %324 = arith.maximumf %322, %323 : vector<2x128xf32>
    %325 = arith.truncf %324 : vector<2x128xf32> to vector<2x128xbf16>
    %c2_180 = arith.constant 2 : index
    %c0_181 = arith.constant 0 : index
    %c0_182 = arith.constant 0 : index
    %326 = vector.load %arg24[%c2_180, %c0_181, %c0_182] : memref<3x128x128xbf16, #tpu.memory_space<vmem>>, vector<1x128x128xbf16>
    %327 = vector.shape_cast %326 : vector<1x128x128xbf16> to vector<128x128xbf16>
    %cst_183 = arith.constant dense<0.000000e+00> : vector<2x128xf32>
    %328 = tpu.matmul %325, %327, %cst_183 {dimension_numbers = #tpu.dot_dimension_numbers<[1], [0], [0], [1], [0, 0, 1, 1], [], []>} : vector<2x128xbf16>, vector<128x128xbf16>, vector<2x128xf32> -> vector<2x128xf32>
    %c2_184 = arith.constant 2 : index
    %c0_185 = arith.constant 0 : index
    %c0_186 = arith.constant 0 : index
    %329 = vector.load %arg25[%c2_184, %c0_185, %c0_186] : memref<3x1x128xf32, #tpu.memory_space<vmem>>, vector<1x1x128xf32>
    %330 = vector.shape_cast %329 : vector<1x1x128xf32> to vector<1x128xf32>
    %331 = vector.broadcast %330 : vector<1x128xf32> to vector<2x128xf32>
    %332 = arith.addf %328, %331 : vector<2x128xf32>
    %cst_187 = arith.constant 0.000000e+00 : f32
    %333 = vector.broadcast %cst_187 : f32 to vector<2x128xf32>
    %334 = arith.maximumf %332, %333 : vector<2x128xf32>
    %335 = arith.truncf %334 : vector<2x128xf32> to vector<2x128xbf16>
    %c0_188 = arith.constant 0 : index
    %c0_189 = arith.constant 0 : index
    %336 = vector.load %arg26[%c0_188, %c0_189] : memref<128x28xbf16, #tpu.memory_space<vmem>>, vector<128x28xbf16>
    %cst_190 = arith.constant dense<0.000000e+00> : vector<2x28xf32>
    %337 = tpu.matmul %335, %336, %cst_190 {dimension_numbers = #tpu.dot_dimension_numbers<[1], [0], [0], [1], [0, 0, 1, 1], [], []>} : vector<2x128xbf16>, vector<128x28xbf16>, vector<2x28xf32> -> vector<2x28xf32>
    %c0_191 = arith.constant 0 : index
    %c0_192 = arith.constant 0 : index
    %338 = vector.load %arg27[%c0_191, %c0_192] : memref<1x28xf32, #tpu.memory_space<vmem>>, vector<1x28xf32>
    %339 = vector.broadcast %338 : vector<1x28xf32> to vector<2x28xf32>
    %340 = arith.addf %337, %339 : vector<2x28xf32>
    %c0_193 = arith.constant 0 : index
    %c0_194 = arith.constant 0 : index
    %341 = vector.load %arg4[%c0_193, %c0_194] : memref<2x28xf32, #tpu.memory_space<vmem>>, vector<2x28xf32>
    %342 = arith.subf %340, %341 : vector<2x28xf32>
    %343 = arith.mulf %342, %342 : vector<2x28xf32>
    %344 = vector.shape_cast %343 : vector<2x28xf32> to vector<1x2x28xf32>
    %cst_195 = arith.constant dense<0.000000e+00> : vector<1xf32>
    %345 = vector.multi_reduction <add>, %344, %cst_195 [1, 2] : vector<1x2x28xf32> to vector<1xf32>
    %346 = vector.shape_cast %345 : vector<1xf32> to vector<1x1x1xf32>
    %347 = vector.extract %346[0, 0, 0] : f32 from vector<1x1x1xf32>
    %cst_196 = arith.constant 0.0178571437 : f32
    %348 = arith.mulf %347, %cst_196 : f32
    %c0_197 = arith.constant 0 : index
    %c0_198 = arith.constant 0 : index
    %349 = memref.load %arg28[%c0_197, %c0_198] : memref<1x1xf32, #tpu.memory_space<smem>>
    memref.store %348, %arg28[%c0_197, %c0_198] : memref<1x1xf32, #tpu.memory_space<smem>>
    return
  }
}

</mosaic_0001>

<bundles_post_ra>
// kernel: forward.1
= control target key start
LH: loop header
LB: loop body
LE: loop exit
PB: predicated region body
PF: predicated region fallthrough
CT: control target
= control target key end

     0   :  { %s10649_s0 = inlined_call_operand.vmem [shape: bf16[1024,32], index: 0, kind: input, shape index: {}]   ;;  %s10650_s1 = inlined_call_operand.vmem [shape: f32[2,3], index: 1, kind: input, shape index: {}]   ;;  %s10651_s2 = inlined_call_operand.vmem [shape: f32[2,32], index: 2, kind: input, shape index: {}]   ;;  %s10652_s3 = inlined_call_operand.vmem [shape: f32[2,9], index: 3, kind: input, shape index: {}]   ;;  %s10653_s4 = inlined_call_operand.vmem [shape: f32[2,28], index: 4, kind: input, shape index: {}]   ;;  %s10654_s5 = inlined_call_operand.vmem [shape: bf16[3,128], index: 5, kind: input, shape index: {}]   ;;  %s10655_s6 = inlined_call_operand.vmem [shape: bf16[32,128], index: 6, kind: input, shape index: {}]   ;;  %s10656_s7 = inlined_call_operand.vmem [shape: bf16[2,128,128], index: 7, kind: input, shape index: {}]   ;;  %s10657_s8 = inlined_call_operand.vmem [shape: bf16[3,128,128], index: 8, kind: input, shape index: {}]   ;;  %s10658_s9 = inlined_call_operand.vmem [shape: bf16[3,128,128], index: 9, kind: input, shape index: {}]   ;;  %s10659_s10 = inlined_call_operand.vmem [shape: bf16[3,128,128], index: 10, kind: input, shape index: {}]   ;;  %s10660_s11 = inlined_call_operand.vmem [shape: bf16[3,128,128], index: 11, kind: input, shape index: {}]   ;;  %s10661_s12 = inlined_call_operand.vmem [shape: bf16[32,32], index: 12, kind: input, shape index: {}]   ;;  %s10662_s13 = inlined_call_operand.vmem [shape: f32[1,32], index: 13, kind: input, shape index: {}]   ;;  %s10663_s14 = inlined_call_operand.vmem [shape: bf16[128,32], index: 14, kind: input, shape index: {}]   ;;  %s10664_s15 = inlined_call_operand.vmem [shape: f32[1,32], index: 15, kind: input, shape index: {}]   ;;  %s10665_s16 = inlined_call_operand.vmem [shape: bf16[128,32], index: 16, kind: input, shape index: {}]   ;;  %s10666_s17 = inlined_call_operand.vmem [shape: f32[1,32], index: 17, kind: input, shape index: {}]   ;;  %s10667_s18 = inlined_call_operand.vmem [shape: bf16[32,64], index: 18, kind: input, shape index: {}]   ;;  %s10668_s19 = inlined_call_operand.vmem [shape: f32[1,64], index: 19, kind: input, shape index: {}]   ;;  %s10669_s20 = inlined_call_operand.vmem [shape: bf16[2,64,128], index: 20, kind: input, shape index: {}]   ;;  %s10670_s21 = inlined_call_operand.vmem [shape: bf16[9,128], index: 21, kind: input, shape index: {}]   ;;  %s10671_s22 = inlined_call_operand.vmem [shape: bf16[128,128], index: 22, kind: input, shape index: {}]   ;;  %s10672_s23 = inlined_call_operand.vmem [shape: f32[1,128], index: 23, kind: input, shape index: {}]   ;;  %s10673_s24 = inlined_call_operand.vmem [shape: bf16[3,128,128], index: 24, kind: input, shape index: {}]   ;;  %s10674_s25 = inlined_call_operand.vmem [shape: f32[3,1,128], index: 25, kind: input, shape index: {}]   ;;  %s10675_s26 = inlined_call_operand.vmem [shape: bf16[128,28], index: 26, kind: input, shape index: {}]   ;;  %s10676_s27 = inlined_call_operand.vmem [shape: f32[1,28], index: 27, kind: input, shape index: {}]   ;;  %s10677_s28 = inlined_call_operand.hbm [shape: f32[1,1], index: 28, kind: output, shape index: {}]  }
   0x1   :  { %10790 = sst [smem:[#allocation111_spill]] %s10649_s0 }
   0x2   :  { %10791 = sst [smem:[#allocation112_spill]] %s10650_s1 }
   0x3   :  { %10792 = sst [smem:[#allocation113_spill]] %s10651_s2 }
   0x4   :  { %10793 = sst [smem:[#allocation114_spill]] %s10652_s3 }
   0x5   :  { %10794 = sst [smem:[#allocation115_spill]] %s10653_s4 }
   0x6   :  { %10795 = sst [smem:[#allocation116_spill]] %s10654_s5 }
   0x7   :  { %10796 = sst [smem:[#allocation117_spill]] %s10655_s6 }
   0x8   :  { %10797 = sst [smem:[#allocation118_spill]] %s10656_s7 }
   0x9   :  { %10798 = sst [smem:[#allocation119_spill]] %s10657_s8 }
   0xa   :  { %10799 = sst [smem:[#allocation120_spill]] %s10658_s9 }
   0xb   :  { %10800 = sst [smem:[#allocation121_spill]] %s10659_s10 }
   0xc   :  { %10801 = sst [smem:[#allocation122_spill]] %s10660_s11 }
   0xd   :  { %10802 = sst [smem:[#allocation123_spill]] %s10661_s12 }
   0xe   :  { %s10803_s9 = sld [smem:[#allocation116_spill]]  ;;  %vm98_vm0 = vcmask 1040384   ;;  %vm99_vm1 = vcmask 1041408   ;;  %v10687_v1 = vmov 0.0   ;;  %v10686_v2 = vmov 65535   ;;  %s10804_s6 = sld [smem:[#allocation112_spill]] }
   0xf   :  { %5900 = vmatprep.subr.bf16.mxu1 %v10687_v1  ;;  %v100_v3 = vsel %vm98_vm0, 4294967295, %v10686_v2  ;;  %5914 = vmatprep.subr.bf16.mxu0 %v10687_v1  ;;  %vm6927_vm2 = vmmov 0   ;;  %vm94_vm3 = vcmask 23552   ;;  %s10805_s11 = sld [smem:[#allocation117_spill]]  ;;  %s10806_s7 = sld [smem:[#allocation118_spill]]  ;;  %vm164_vm4 = vcmask 261120  }
  0x10   :  { %v101_v5 = vsel %vm99_vm1, %v100_v3, 0  ;;  %5902 = vmatprep.mubr.msk.bf16.mxu1 %vm6927_vm2, %v10687_v1  ;;  %5930 = vmatprep.mubr.msk.bf16.mxu0 %vm6927_vm2, %v10687_v1  ;;  %s10807_s30 = sld [smem:[#allocation113_spill]] }
  0x14   :  { %v93_v0 = vld [vmem:[%s10803_s9] sm:$0x3] }
  0x15   :  { %v91_v4 = vld [vmem:[%s10804_s6] sm:$0x3]  ;;  %v103_v6 = vand.u32 %v101_v5, %v93_v0  ;;  %v6642_v10 = vld [vmem:[%s10806_s7 + $0x8] sm:$0xff]   ;;  %v6644_v13 = vld [vmem:[%s10806_s7 + $0x10] sm:$0xff]  }
  0x16   :  { %v92_v7 = vpack.c.bf16 %v91_v4, %v91_v4  ;;  %v6638_v8 = vld [vmem:[%s10805_s11] sm:$0xff]   ;;  %v6639_v11 = vld [vmem:[%s10805_s11 + $0x8] sm:$0xff]   ;;  %v6646_v16 = vld [vmem:[%s10806_s7 + $0x18] sm:$0xff]  }
  0x17   :  { %5901 = vmatpush3.bf16.msra.mxu1 %v103_v6  ;;  %v6640_v9 = vld [vmem:[%s10806_s7] sm:$0xff]   ;;  %v6643_v17 = vld [vmem:[%s10806_s7 + $0x48] sm:$0xff]   ;;  %v6645_v19 = vld [vmem:[%s10806_s7 + $0x50] sm:$0xff]  }
  0x18   :  { %5906 = vmatprep.subr.bf16.mxu1 %v10687_v1  ;;  %5915 = vmatpush3.bf16.msra.mxu0 %v6640_v9  ;;  %v146_v12 = vld [vmem:[%s10807_s30] sm:$0x3]  ;;  %v6647_v20 = vld [vmem:[%s10806_s7 + $0x58] sm:$0xff]   ;;  %v6650_v22 = vld [vmem:[%s10806_s7 + $0x28] sm:$0xff]  }
  0x19   :  { %5916 = vmatprep.subr.bf16.mxu0 %v10687_v1  ;;  %v147_v14 = vpack.c.bf16 %v146_v12, %v146_v12  ;;  %v6641_v15 = vld [vmem:[%s10806_s7 + $0x40] sm:$0xff]   ;;  %v6651_v23 = vld [vmem:[%s10806_s7 + $0x68] sm:$0xff]   ;;  %v6652_v24 = vld [vmem:[%s10806_s7 + $0x30] sm:$0xff]  }
  0x1a   :  { %5903 = vmatmul.mubr.msk.bf16.vlgmr.msra.gmra.mrb[0].mxu1 %vm94_vm3, %v92_v7  ;;  %v6648_v18 = vld [vmem:[%s10806_s7 + $0x20] sm:$0xff]   ;;  %v6653_v25 = vld [vmem:[%s10806_s7 + $0x70] sm:$0xff]   ;;  %v6654_v26 = vld [vmem:[%s10806_s7 + $0x38] sm:$0xff]  }
  0x1b   :  { %5907 = vmatpush3.bf16.msra.mxu1 %v6638_v8  ;;  %5910 = vmatprep.mubr.msk.bf16.mxu1 %vm6927_vm2, %v10687_v1  ;;  %v6649_v21 = vld [vmem:[%s10806_s7 + $0x60] sm:$0xff]   ;;  %v6655_v27 = vld [vmem:[%s10806_s7 + $0x78] sm:$0xff]  }
  0x1c   :  { %5908 = vmatprep.subr.bf16.mxu1 %v10687_v1  ;;  %5917 = vmatpush3.bf16.msra.mxu0 %v6642_v10 }
  0x1d   :  { %5918 = vmatprep.subr.bf16.mxu0 %v10687_v1 }
  0x1f   :  { %5909 = vmatpush3.bf16.msra.mxu1 %v6639_v11 }
  0x20   :  { %5934 = vmatprep.subr.bf16.mxu1 %v10687_v1  ;;  %5919 = vmatpush3.bf16.msra.mxu0 %v6644_v13 }
  0x21   :  { %5920 = vmatprep.subr.bf16.mxu0 %v10687_v1 }
  0x22   :  { %5911 = vmatmul.mubr.msk.bf16.vlgmr.msra.gmra.mrb[4].mxu1 %vm164_vm4, %v147_v14 }
  0x23   :  { %5935 = vmatpush3.bf16.msra.mxu1 %v6641_v15  ;;  %5950 = vmatprep.mubr.msk.bf16.mxu1 %vm6927_vm2, %v10687_v1 }
  0x24   :  { %5936 = vmatprep.subr.bf16.mxu1 %v10687_v1  ;;  %5921 = vmatpush3.bf16.msra.mxu0 %v6646_v16 }
  0x25   :  { %5922 = vmatprep.subr.bf16.mxu0 %v10687_v1 }
  0x27   :  { %5937 = vmatpush3.bf16.msra.mxu1 %v6643_v17 }
  0x28   :  { %5938 = vmatprep.subr.bf16.mxu1 %v10687_v1  ;;  %5923 = vmatpush3.bf16.msra.mxu0 %v6648_v18 }
  0x29   :  { %5924 = vmatprep.subr.bf16.mxu0 %v10687_v1 }
  0x2b   :  { %5939 = vmatpush3.bf16.msra.mxu1 %v6645_v19 }
  0x2c   :  { %5940 = vmatprep.subr.bf16.mxu1 %v10687_v1  ;;  %5925 = vmatpush3.bf16.msra.mxu0 %v6650_v22 }
  0x2d   :  { %5926 = vmatprep.subr.bf16.mxu0 %v10687_v1 }
  0x2f   :  { %5941 = vmatpush3.bf16.msra.mxu1 %v6647_v20 }
  0x30   :  { %5942 = vmatprep.subr.bf16.mxu1 %v10687_v1  ;;  %5927 = vmatpush3.bf16.msra.mxu0 %v6652_v24 }
  0x31   :  { %5928 = vmatprep.subr.bf16.mxu0 %v10687_v1 }
  0x33   :  { %5943 = vmatpush3.bf16.msra.mxu1 %v6649_v21 }
  0x34   :  { %5944 = vmatprep.subr.bf16.mxu1 %v10687_v1  ;;  %5929 = vmatpush3.bf16.msra.mxu0 %v6654_v26 }
  0x35   :  { %5954 = vmatprep.subr.bf16.mxu0 %v10687_v1 }
  0x37   :  { %5945 = vmatpush3.bf16.msra.mxu1 %v6651_v23 }
  0x38   :  { %5946 = vmatprep.subr.bf16.mxu1 %v10687_v1 }
  0x3b   :  { %5947 = vmatpush3.bf16.msra.mxu1 %v6653_v25 }
  0x3c   :  { %5948 = vmatprep.subr.bf16.mxu1 %v10687_v1 }
  0x3f   :  { %5949 = vmatpush3.bf16.msra.mxu1 %v6655_v27 }
  0x40   :  { %5974 = vmatprep.subr.bf16.mxu1 %v10687_v1 }
  0x41   :  { %33 = vsyncpa [#allocation3], 0  ;;  %s10808_s6 = sld [smem:[#allocation119_spill]]  ;;  %s10809_s11 = sld [smem:[#allocation120_spill]]  ;;  %vm4245_vm5 = vcmask 1043456   ;;  %vm4246_vm6 = vcmask 1044480  }
  0x42   :  { %s10810_s4 = sld [smem:[#allocation121_spill]]  ;;  %s10811_s7 = sld [smem:[#allocation122_spill]]  ;;  %vm4241_vm7 = vcmask 72704   ;;  %vm4392_vm10 = vcmask 523264   ;;  %vm5026_vm11 = vcmask 222208  }
  0x43   :  { %s10812_s29 = sld [smem:[#allocation123_spill]]  ;;  %s10813_s5 = sld [smem:[#allocation111_spill]] }
  0x44   :  { %s6913_s3 = scalar_lea.hbm %s10677_s28, 16 }
  0x45   :  { %p6914_p0 = scmp.ne.s32.totalorder %s10677_s28, %s6913_s3  ;;  %p6917_p1 = scmp.lt.u32.totalorder %s6913_s3, %s10677_s28 }
  0x47   :  { %v6656_v36 = vld [vmem:[%s10808_s6] sm:$0xff]   ;;  %v6657_v40 = vld [vmem:[%s10808_s6 + $0x8] sm:$0xff]   ;;  %v6658_v42 = vld [vmem:[%s10808_s6 + $0x10] sm:$0xff]   ;;  %p6919_p2 = pnand %p6917_p1, %p6914_p0 }
  0x48   :  { %v6664_v39 = vld [vmem:[%s10809_s11] sm:$0xff]   ;;  %v6665_v41 = vld [vmem:[%s10809_s11 + $0x8] sm:$0xff]   ;;  %v6666_v43 = vld [vmem:[%s10809_s11 + $0x10] sm:$0xff]  }
  0x49   :  { %v6659_v44 = vld [vmem:[%s10808_s6 + $0x18] sm:$0xff]   ;;  %v6660_v46 = vld [vmem:[%s10808_s6 + $0x20] sm:$0xff]   ;;  %v6661_v47 = vld [vmem:[%s10808_s6 + $0x28] sm:$0xff]  }
  0x4a   :  { %v6667_v45 = vld [vmem:[%s10809_s11 + $0x18] sm:$0xff]   ;;  %v6662_v48 = vld [vmem:[%s10808_s6 + $0x30] sm:$0xff]   ;;  %v6668_v50 = vld [vmem:[%s10809_s11 + $0x20] sm:$0xff]  }
  0x4b   :  { %v6663_v49 = vld [vmem:[%s10808_s6 + $0x38] sm:$0xff]   ;;  %v6669_v51 = vld [vmem:[%s10809_s11 + $0x28] sm:$0xff]   ;;  %v6670_v52 = vld [vmem:[%s10809_s11 + $0x30] sm:$0xff]  }
  0x4c   :  { %v6671_v53 = vld [vmem:[%s10809_s11 + $0x38] sm:$0xff]   ;;  %v6672_v4 = vld [vmem:[%s10810_s4] sm:$0xff]   ;;  %v6673_v8 = vld [vmem:[%s10810_s4 + $0x8] sm:$0xff]  }
  0x4d   :  { %v6674_v9 = vld [vmem:[%s10810_s4 + $0x10] sm:$0xff]   ;;  %v6675_v10 = vld [vmem:[%s10810_s4 + $0x18] sm:$0xff]   ;;  %v6676_v11 = vld [vmem:[%s10810_s4 + $0x20] sm:$0xff]  }
  0x4e   :  { %v6677_v14 = vld [vmem:[%s10810_s4 + $0x28] sm:$0xff]   ;;  %v6678_v17 = vld [vmem:[%s10810_s4 + $0x30] sm:$0xff]   ;;  %v6679_v18 = vld [vmem:[%s10810_s4 + $0x38] sm:$0xff]  }
  0xed   :  { %v139_v28 = vpop.f32.mrb[0].mxu1 }
  0xee   :  { %6885 = vtanh.f32 %v139_v28  ;;  %v5904_v29 = vpop.f32.mrb[1].mxu1 }
  0xef   :  { %v142_v30 = vpop.f32.mrb[2].mxu1 }
  0xf0   :  { %v5905_v31 = vpop.f32.mrb[3].mxu1 }
  0xf1   :  { %v6680_v31 = vld [vmem:[%s10811_s7] sm:$0xff]  }
  0xf5   :  { %v7169_v32 = vpop.f32.mrb[4].mxu1 }
  0xf6   :  { %v5912_v33 = vpop.f32.mrb[5].mxu1  ;;  %6887 = vtanh.f32 %v7169_v32 }
  0xf7   :  { %v205_v34 = vpop.f32.mrb[6].mxu1 }
  0xf8   :  { %v7171_v35 = vpop.eup %6885  ;;  %v5913_v37 = vpop.f32.mrb[7].mxu1 }
  0xf9   :  { %v209_v38 = vpack.c.bf16 %v7171_v35, %v7171_v35 }
  0xfb   :  { %5931 = vmatmul.mubr.bf16.vlgmr.msra.gmra.mrb[0].mxu0 %v209_v38  ;;  %5951 = vmatmul.mubr.bf16.vlgmr.msra.gmra.mrb[8].mxu1 %v209_v38 }
  0xfc   :  { %5955 = vmatpush3.bf16.msra.mxu0 %v6656_v36  ;;  %5970 = vmatprep.mubr.msk.bf16.mxu0 %vm6927_vm2, %v10687_v1 }
  0xfd   :  { %5956 = vmatprep.subr.bf16.mxu0 %v10687_v1  ;;  %5975 = vmatpush3.bf16.msra.mxu1 %v6664_v39 }
  0xfe   :  { %5976 = vmatprep.subr.bf16.mxu1 %v10687_v1  ;;  %5990 = vmatprep.mubr.msk.bf16.mxu1 %vm6927_vm2, %v10687_v1 }
 0x100   :  { %5957 = vmatpush3.bf16.msra.mxu0 %v6657_v40  ;;  %v7254_v54 = vpop.eup %6887 }
 0x101   :  { %5958 = vmatprep.subr.bf16.mxu0 %v10687_v1  ;;  %5977 = vmatpush3.bf16.msra.mxu1 %v6665_v41 }
 0x102   :  { %5978 = vmatprep.subr.bf16.mxu1 %v10687_v1 }
 0x104   :  { %5959 = vmatpush3.bf16.msra.mxu0 %v6658_v42  ;;  %v6682_v42 = vld [vmem:[%s10811_s7 + $0x10] sm:$0xff]  }
 0x105   :  { %5960 = vmatprep.subr.bf16.mxu0 %v10687_v1  ;;  %5979 = vmatpush3.bf16.msra.mxu1 %v6666_v43 }
 0x106   :  { %5980 = vmatprep.subr.bf16.mxu1 %v10687_v1 }
 0x108   :  { %5961 = vmatpush3.bf16.msra.mxu0 %v6659_v44  ;;  %v6684_v44 = vld [vmem:[%s10811_s7 + $0x20] sm:$0xff]  }
 0x109   :  { %5962 = vmatprep.subr.bf16.mxu0 %v10687_v1  ;;  %5981 = vmatpush3.bf16.msra.mxu1 %v6667_v45 }
 0x10a   :  { %5982 = vmatprep.subr.bf16.mxu1 %v10687_v1 }
 0x10c   :  { %5963 = vmatpush3.bf16.msra.mxu0 %v6660_v46  ;;  %v6686_v46 = vld [vmem:[%s10811_s7 + $0x30] sm:$0xff]  }
 0x10d   :  { %5964 = vmatprep.subr.bf16.mxu0 %v10687_v1  ;;  %5983 = vmatpush3.bf16.msra.mxu1 %v6668_v50 }
 0x10e   :  { %5984 = vmatprep.subr.bf16.mxu1 %v10687_v1 }
 0x110   :  { %5965 = vmatpush3.bf16.msra.mxu0 %v6661_v47  ;;  %v6687_v47 = vld [vmem:[%s10811_s7 + $0x38] sm:$0xff]  }
 0x111   :  { %5966 = vmatprep.subr.bf16.mxu0 %v10687_v1  ;;  %5985 = vmatpush3.bf16.msra.mxu1 %v6669_v51 }
 0x112   :  { %5986 = vmatprep.subr.bf16.mxu1 %v10687_v1 }
 0x114   :  { %5967 = vmatpush3.bf16.msra.mxu0 %v6662_v48  ;;  %v6704_v48 = vld [vmem:[%s10808_s6 + $0x40] sm:$0xff]  }
 0x115   :  { %5968 = vmatprep.subr.bf16.mxu0 %v10687_v1  ;;  %5987 = vmatpush3.bf16.msra.mxu1 %v6670_v52 }
 0x116   :  { %5988 = vmatprep.subr.bf16.mxu1 %v10687_v1 }
 0x118   :  { %5969 = vmatpush3.bf16.msra.mxu0 %v6663_v49  ;;  %v6705_v49 = vld [vmem:[%s10808_s6 + $0x48] sm:$0xff]  }
 0x119   :  { %5994 = vmatprep.subr.bf16.mxu0 %v10687_v1  ;;  %5989 = vmatpush3.bf16.msra.mxu1 %v6671_v53 }
 0x11a   :  { %6014 = vmatprep.subr.bf16.mxu1 %v10687_v1 }
 0x11b   :  { %5971 = vmatmul.mubr.bf16.vlgmr.msra.gmra.mrb[4].mxu0 %v209_v38  ;;  %v6681_v38 = vld [vmem:[%s10811_s7 + $0x8] sm:$0xff]  }
 0x11c   :  { %5995 = vmatpush3.bf16.msra.mxu0 %v6664_v39  ;;  %6010 = vmatprep.mubr.msk.bf16.mxu0 %vm6927_vm2, %v10687_v1 }
 0x11d   :  { %5996 = vmatprep.subr.bf16.mxu0 %v10687_v1 }
 0x120   :  { %5997 = vmatpush3.bf16.msra.mxu0 %v6665_v41 }
 0x121   :  { %5998 = vmatprep.subr.bf16.mxu0 %v10687_v1 }
 0x124   :  { %5999 = vmatpush3.bf16.msra.mxu0 %v6666_v43  ;;  %v6683_v43 = vld [vmem:[%s10811_s7 + $0x18] sm:$0xff]  }
 0x125   :  { %6000 = vmatprep.subr.bf16.mxu0 %v10687_v1 }
 0x128   :  { %6001 = vmatpush3.bf16.msra.mxu0 %v6667_v45  ;;  %v6685_v45 = vld [vmem:[%s10811_s7 + $0x28] sm:$0xff]  }
 0x129   :  { %6002 = vmatprep.subr.bf16.mxu0 %v10687_v1 }
 0x12c   :  { %6003 = vmatpush3.bf16.msra.mxu0 %v6668_v50  ;;  %v6706_v50 = vld [vmem:[%s10808_s6 + $0x50] sm:$0xff]  }
 0x12d   :  { %6004 = vmatprep.subr.bf16.mxu0 %v10687_v1 }
 0x130   :  { %6005 = vmatpush3.bf16.msra.mxu0 %v6669_v51  ;;  %v6707_v51 = vld [vmem:[%s10808_s6 + $0x58] sm:$0xff]  }
 0x131   :  { %6006 = vmatprep.subr.bf16.mxu0 %v10687_v1 }
 0x134   :  { %6007 = vmatpush3.bf16.msra.mxu0 %v6670_v52  ;;  %v6708_v52 = vld [vmem:[%s10808_s6 + $0x60] sm:$0xff]  }
 0x135   :  { %6008 = vmatprep.subr.bf16.mxu0 %v10687_v1 }
 0x138   :  { %6009 = vmatpush3.bf16.msra.mxu0 %v6671_v53 }
 0x139   :  { %6034 = vmatprep.subr.bf16.mxu0 %v10687_v1 }
 0x1ce   :  { %v308_v55 = vpop.f32.mrb[0].mxu0  ;;  %v414_v56 = vpop.f32.mrb[8].mxu1 }
 0x1cf   :  { %v309_v57 = vadd.f32 %v7254_v54, %v308_v55  ;;  %v415_v58 = vadd.f32 %v7254_v54, %v414_v56  ;;  %v5932_v59 = vpop.f32.mrb[1].mxu0  ;;  %v5952_v60 = vpop.f32.mrb[9].mxu1  ;;  %v6709_v55 = vld [vmem:[%s10808_s6 + $0x68] sm:$0xff]  }
 0x1d0   :  { %v311_v61 = vpop.f32.mrb[2].mxu0  ;;  %v417_v62 = vpop.f32.mrb[10].mxu1 }
 0x1d1   :  { %6889 = vtanh.f32 %v309_v57  ;;  %v5933_v63 = vpop.f32.mrb[3].mxu0  ;;  %v5953_v0 = vpop.f32.mrb[11].mxu1  ;;  %v6710_v57 = vld [vmem:[%s10808_s6 + $0x70] sm:$0xff]  }
 0x1d2   :  { %6891 = vtanh.f32 %v415_v58 }
 0x1db   :  { %v6890_v3 = vpop.eup %6889 }
 0x1dc   :  { %v6892_v5 = vpop.eup %6891  ;;  %v7261_v6 = vpack.c.bf16 %v6890_v3, %v6890_v3 }
 0x1dd   :  { %v7263_v7 = vpack.c.bf16 %v6892_v5, %v6892_v5 }
 0x1de   :  { %5991 = vmatmul.mubr.bf16.vlgmr.msra.gmra.mrb[12].mxu1 %v7261_v6 }
 0x1df   :  { %6011 = vmatmul.mubr.bf16.vlgmr.msra.gmra.mrb[8].mxu0 %v7263_v7  ;;  %6015 = vmatpush3.bf16.msra.mxu1 %v6672_v4 }
 0x1e0   :  { %6035 = vmatpush3.bf16.msra.mxu0 %v6672_v4  ;;  %6016 = vmatprep.subr.bf16.mxu1 %v10687_v1 }
 0x1e1   :  { %6036 = vmatprep.subr.bf16.mxu0 %v10687_v1  ;;  %6030 = vmatprep.mubr.msk.bf16.mxu1 %vm6927_vm2, %v10687_v1 }
 0x1e2   :  { %6050 = vmatprep.mubr.msk.bf16.mxu0 %vm6927_vm2, %v10687_v1 }
 0x1e3   :  { %6017 = vmatpush3.bf16.msra.mxu1 %v6673_v8 }
 0x1e4   :  { %6037 = vmatpush3.bf16.msra.mxu0 %v6673_v8  ;;  %6018 = vmatprep.subr.bf16.mxu1 %v10687_v1 }
 0x1e5   :  { %6038 = vmatprep.subr.bf16.mxu0 %v10687_v1 }
 0x1e7   :  { %6019 = vmatpush3.bf16.msra.mxu1 %v6674_v9 }
 0x1e8   :  { %6039 = vmatpush3.bf16.msra.mxu0 %v6674_v9  ;;  %6020 = vmatprep.subr.bf16.mxu1 %v10687_v1 }
 0x1e9   :  { %6040 = vmatprep.subr.bf16.mxu0 %v10687_v1 }
 0x1eb   :  { %6021 = vmatpush3.bf16.msra.mxu1 %v6675_v10 }
 0x1ec   :  { %6041 = vmatpush3.bf16.msra.mxu0 %v6675_v10  ;;  %6022 = vmatprep.subr.bf16.mxu1 %v10687_v1 }
 0x1ed   :  { %6042 = vmatprep.subr.bf16.mxu0 %v10687_v1 }
 0x1ee   :  { %v521_v12 = vpop.f32.mrb[4].mxu0 }
 0x1ef   :  { %v5972_v13 = vpop.f32.mrb[5].mxu0  ;;  %6023 = vmatpush3.bf16.msra.mxu1 %v6676_v11 }
 0x1f0   :  { %6043 = vmatpush3.bf16.msra.mxu0 %v6676_v11  ;;  %v524_v15 = vpop.f32.mrb[6].mxu0  ;;  %6024 = vmatprep.subr.bf16.mxu1 %v10687_v1 }
 0x1f1   :  { %v5973_v16 = vpop.f32.mrb[7].mxu0  ;;  %6044 = vmatprep.subr.bf16.mxu0 %v10687_v1 }
 0x1f2   :  { %v7391_v16 = vld [vmem:[%s10809_s11 + $0x48] sm:$0xff]  }
 0x1f3   :  { %6025 = vmatpush3.bf16.msra.mxu1 %v6677_v14 }
 0x1f4   :  { %6045 = vmatpush3.bf16.msra.mxu0 %v6677_v14  ;;  %6026 = vmatprep.subr.bf16.mxu1 %v10687_v1  ;;  %v7385_v14 = vld [vmem:[%s10809_s11 + $0x40] sm:$0xff]  }
 0x1f5   :  { %6046 = vmatprep.subr.bf16.mxu0 %v10687_v1 }
 0x1f7   :  { %6027 = vmatpush3.bf16.msra.mxu1 %v6678_v17 }
 0x1f8   :  { %6047 = vmatpush3.bf16.msra.mxu0 %v6678_v17  ;;  %6028 = vmatprep.subr.bf16.mxu1 %v10687_v1  ;;  %v6690_v17 = vld [vmem:[%s10809_s11 + $0x50] sm:$0xff]  }
 0x1f9   :  { %6048 = vmatprep.subr.bf16.mxu0 %v10687_v1 }
 0x1fb   :  { %6029 = vmatpush3.bf16.msra.mxu1 %v6679_v18 }
 0x1fc   :  { %6049 = vmatpush3.bf16.msra.mxu0 %v6679_v18  ;;  %6054 = vmatprep.subr.bf16.mxu1 %v10687_v1  ;;  %v6691_v18 = vld [vmem:[%s10809_s11 + $0x58] sm:$0xff]  }
 0x1fd   :  { %6074 = vmatprep.subr.bf16.mxu0 %v10687_v1 }
 0x1fe   :  { %6031 = vmatmul.mubr.bf16.vlgmr.msra.gmra.mrb[16].mxu1 %v7261_v6 }
 0x1ff   :  { %6051 = vmatmul.mubr.bf16.vlgmr.msra.gmra.mrb[12].mxu0 %v7263_v7  ;;  %6070 = vmatprep.mubr.msk.bf16.mxu1 %vm6927_vm2, %v10687_v1 }
 0x200   :  { %6090 = vmatprep.mubr.msk.bf16.mxu0 %vm6927_vm2, %v10687_v1  ;;  %6055 = vmatpush3.bf16.msra.mxu1 %v6680_v31  ;;  %v6711_v31 = vld [vmem:[%s10808_s6 + $0x78] sm:$0xff]  }
 0x201   :  { %6056 = vmatprep.subr.bf16.mxu1 %v10687_v1  ;;  %6075 = vmatpush3.bf16.msra.mxu0 %v6704_v48 }
 0x202   :  { %6076 = vmatprep.subr.bf16.mxu0 %v10687_v1 }
 0x204   :  { %6057 = vmatpush3.bf16.msra.mxu1 %v6681_v38 }
 0x205   :  { %6058 = vmatprep.subr.bf16.mxu1 %v10687_v1  ;;  %6077 = vmatpush3.bf16.msra.mxu0 %v6705_v49 }
 0x206   :  { %6078 = vmatprep.subr.bf16.mxu0 %v10687_v1 }
 0x208   :  { %6059 = vmatpush3.bf16.msra.mxu1 %v6682_v42 }
 0x209   :  { %6060 = vmatprep.subr.bf16.mxu1 %v10687_v1  ;;  %6079 = vmatpush3.bf16.msra.mxu0 %v6706_v50 }
 0x20a   :  { %6080 = vmatprep.subr.bf16.mxu0 %v10687_v1 }
 0x20c   :  { %6061 = vmatpush3.bf16.msra.mxu1 %v6683_v43 }
 0x20d   :  { %6062 = vmatprep.subr.bf16.mxu1 %v10687_v1  ;;  %6081 = vmatpush3.bf16.msra.mxu0 %v6707_v51 }
 0x20e   :  { %6082 = vmatprep.subr.bf16.mxu0 %v10687_v1 }
 0x210   :  { %6063 = vmatpush3.bf16.msra.mxu1 %v6684_v44 }
 0x211   :  { %6064 = vmatprep.subr.bf16.mxu1 %v10687_v1  ;;  %6083 = vmatpush3.bf16.msra.mxu0 %v6708_v52 }
 0x212   :  { %6084 = vmatprep.subr.bf16.mxu0 %v10687_v1 }
 0x214   :  { %6065 = vmatpush3.bf16.msra.mxu1 %v6685_v45 }
 0x215   :  { %6066 = vmatprep.subr.bf16.mxu1 %v10687_v1  ;;  %6085 = vmatpush3.bf16.msra.mxu0 %v6709_v55 }
 0x216   :  { %6086 = vmatprep.subr.bf16.mxu0 %v10687_v1 }
 0x218   :  { %6067 = vmatpush3.bf16.msra.mxu1 %v6686_v46 }
 0x219   :  { %6068 = vmatprep.subr.bf16.mxu1 %v10687_v1  ;;  %6087 = vmatpush3.bf16.msra.mxu0 %v6710_v57 }
 0x21a   :  { %6088 = vmatprep.subr.bf16.mxu0 %v10687_v1 }
 0x21c   :  { %6069 = vmatpush3.bf16.msra.mxu1 %v6687_v47 }
 0x21d   :  { %6094 = vmatprep.subr.bf16.mxu1 %v10687_v1  ;;  %6089 = vmatpush3.bf16.msra.mxu0 %v6711_v31 }
 0x21e   :  { %6114 = vmatprep.subr.bf16.mxu0 %v10687_v1 }
 0x2b1   :  { %v625_v19 = vpop.f32.mrb[12].mxu1 }
 0x2b2   :  { %v815_v20 = vmul.f32 %v625_v19, %v521_v12  ;;  %v665_v21 = vpop.f32.mrb[8].mxu0  ;;  %v5992_v22 = vpop.f32.mrb[13].mxu1  ;;  %v6692_v19 = vld [vmem:[%s10809_s11 + $0x60] sm:$0xff]  }
 0x2b3   :  { %v820_v23 = vmul.f32 %v665_v21, %v521_v12  ;;  %v6012_v24 = vpop.f32.mrb[9].mxu0  ;;  %v628_v25 = vpop.f32.mrb[14].mxu1  ;;  %v6694_v21 = vld [vmem:[%s10809_s11 + $0x70] sm:$0xff]   ;;  %v6695_v22 = vld [vmem:[%s10809_s11 + $0x78] sm:$0xff]  }
 0x2b4   :  { %v668_v26 = vpop.f32.mrb[10].mxu0  ;;  %v5993_v27 = vpop.f32.mrb[15].mxu1  ;;  %v816_v28 = vsel %vm99_vm1, %v815_v20, 0.0  ;;  %v6693_v20 = vld [vmem:[%s10809_s11 + $0x68] sm:$0xff]   ;;  %v6698_v25 = vld [vmem:[%s10810_s4 + $0x50] sm:$0xff]  }
 0x2b5   :  { %v6013_v29 = vpop.f32.mrb[11].mxu0  ;;  %817 = vadd.xlane.f32.xlu0 %v816_v28  ;;  %v821_v30 = vsel %vm99_vm1, %v820_v23, 0.0  ;;  %v6696_v23 = vld [vmem:[%s10810_s4 + $0x40] sm:$0xff]   ;;  %v6697_v24 = vld [vmem:[%s10810_s4 + $0x48] sm:$0xff]   ;;  %v6699_v26 = vld [vmem:[%s10810_s4 + $0x58] sm:$0xff]  }
 0x2b6   :  { %v6700_v27 = vld [vmem:[%s10810_s4 + $0x60] sm:$0xff]   ;;  %v6701_v28 = vld [vmem:[%s10810_s4 + $0x68] sm:$0xff]   ;;  %v6702_v29 = vld [vmem:[%s10810_s4 + $0x70] sm:$0xff]  }
 0x2b9   :  { %822 = vadd.xlane.f32.xlu0 %v821_v30  ;;  %v6703_v30 = vld [vmem:[%s10810_s4 + $0x78] sm:$0xff]  }
 0x2d1   :  { %v7319_v32 = vpop.f32.mrb[16].mxu1 }
 0x2d2   :  { %v7321_v33 = vpop.f32.mrb[12].mxu0  ;;  %v6032_v34 = vpop.f32.mrb[17].mxu1 }
 0x2d3   :  { %v6052_v36 = vpop.f32.mrb[13].mxu0  ;;  %v772_v37 = vpop.f32.mrb[18].mxu1 }
 0x2d4   :  { %v812_v39 = vpop.f32.mrb[14].mxu0  ;;  %v6033_v40 = vpop.f32.mrb[19].mxu1 }
 0x2d5   :  { %v6053_v41 = vpop.f32.mrb[15].mxu0 }
 0x342   :  { %v818_v53 = vpop.xlane.xlu0 %817 }
 0x343   :  { %v819_v58 = vmul.f32 0.088388346, %v818_v53 }
 0x346   :  { %v823_v56 = vpop.xlane.xlu0 %822 }
 0x347   :  { %v824_v59 = vmul.f32 0.088388346, %v823_v56 }
 0x349   :  { %v825_v60 = vmax.f32 %v819_v58, %v824_v59 }
 0x34b   :  { %v826_v61 = vsub.f32 %v819_v58, %v825_v60  ;;  %v829_v62 = vsub.f32 %v824_v59, %v825_v60  ;;  %v6712_v59 = vld [vmem:[%s10811_s7 + $0x40] sm:$0xff]   ;;  %v6713_v60 = vld [vmem:[%s10811_s7 + $0x48] sm:$0xff]  }
 0x34d   :  { %v827_v63 = vmul.f32 1.442695, %v826_v61  ;;  %v830_v0 = vmul.f32 1.442695, %v829_v62 }
 0x34f   :  { %6893 = vpow2.f32 %v827_v63  ;;  %v6714_v63 = vld [vmem:[%s10811_s7 + $0x50] sm:$0xff]  }
 0x350   :  { %6895 = vpow2.f32 %v830_v0 }
 0x359   :  { %v6894_v3 = vpop.eup %6893 }
 0x35a   :  { %v6896_v4 = vpop.eup %6895 }
 0x35b   :  { %v832_v5 = vadd.f32 %v6896_v4, %v6894_v3 }
 0x35d   :  { %6897 = vrcp.f32 %v832_v5  ;;  %v6716_v5 = vld [vmem:[%s10811_s7 + $0x60] sm:$0xff]  }
 0x367   :  { %v6898_v8 = vpop.eup %6897 }
 0x368   :  { %v834_v9 = vmul.f32 %v6898_v8, %v6894_v3  ;;  %v836_v10 = vmul.f32 %v6898_v8, %v6896_v4  ;;  %v6715_v4 = vld [vmem:[%s10811_s7 + $0x58] sm:$0xff]   ;;  %v6717_v8 = vld [vmem:[%s10811_s7 + $0x68] sm:$0xff]  }
 0x36a   :  { %v835_v11 = vmul.f32 %v834_v9, %v7319_v32  ;;  %v837_v12 = vmul.f32 %v836_v10, %v7321_v33  ;;  %v6718_v9 = vld [vmem:[%s10811_s7 + $0x70] sm:$0xff]   ;;  %v6719_v10 = vld [vmem:[%s10811_s7 + $0x78] sm:$0xff]  }
 0x36c   :  { %v838_v13 = vadd.f32 %v837_v12, %v835_v11  ;;  %v6736_v11 = vld [vmem:[%s10808_s6 + $0x80] sm:$0xff]   ;;  %v6737_v12 = vld [vmem:[%s10808_s6 + $0x88] sm:$0xff]  }
 0x36e   :  { %v839_v15 = vpack.c.bf16 %v838_v13, %v838_v13  ;;  %v6738_v13 = vld [vmem:[%s10808_s6 + $0x90] sm:$0xff]  }
 0x370   :  { %6071 = vmatmul.mubr.bf16.vlgmr.msra.gmra.mrb[20].mxu1 %v839_v15  ;;  %v6740_v15 = vld [vmem:[%s10808_s6 + $0xa0] sm:$0xff]  }
 0x371   :  { %6095 = vmatpush3.bf16.msra.mxu1 %v7385_v14  ;;  %6110 = vmatprep.mubr.msk.bf16.mxu1 %vm6927_vm2, %v10687_v1 }
 0x372   :  { %6096 = vmatprep.subr.bf16.mxu1 %v10687_v1 }
 0x375   :  { %6097 = vmatpush3.bf16.msra.mxu1 %v7391_v16 }
 0x376   :  { %6098 = vmatprep.subr.bf16.mxu1 %v10687_v1 }
 0x379   :  { %6099 = vmatpush3.bf16.msra.mxu1 %v6690_v17 }
 0x37a   :  { %6100 = vmatprep.subr.bf16.mxu1 %v10687_v1 }
 0x37d   :  { %6101 = vmatpush3.bf16.msra.mxu1 %v6691_v18 }
 0x37e   :  { %6102 = vmatprep.subr.bf16.mxu1 %v10687_v1 }
 0x381   :  { %6103 = vmatpush3.bf16.msra.mxu1 %v6692_v19 }
 0x382   :  { %6104 = vmatprep.subr.bf16.mxu1 %v10687_v1 }
 0x385   :  { %6105 = vmatpush3.bf16.msra.mxu1 %v6693_v20 }
 0x386   :  { %6106 = vmatprep.subr.bf16.mxu1 %v10687_v1 }
 0x389   :  { %6107 = vmatpush3.bf16.msra.mxu1 %v6694_v21 }
 0x38a   :  { %6108 = vmatprep.subr.bf16.mxu1 %v10687_v1 }
 0x38d   :  { %6109 = vmatpush3.bf16.msra.mxu1 %v6695_v22 }
 0x38e   :  { %6134 = vmatprep.subr.bf16.mxu1 %v10687_v1 }
 0x390   :  { %6111 = vmatmul.mubr.bf16.vlgmr.msra.gmra.mrb[24].mxu1 %v7261_v6 }
 0x391   :  { %6135 = vmatpush3.bf16.msra.mxu1 %v6696_v23  ;;  %6150 = vmatprep.mubr.msk.bf16.mxu1 %vm6927_vm2, %v10687_v1 }
 0x392   :  { %6136 = vmatprep.subr.bf16.mxu1 %v10687_v1 }
 0x395   :  { %6137 = vmatpush3.bf16.msra.mxu1 %v6697_v24 }
 0x396   :  { %6138 = vmatprep.subr.bf16.mxu1 %v10687_v1 }
 0x399   :  { %6139 = vmatpush3.bf16.msra.mxu1 %v6698_v25 }
 0x39a   :  { %6140 = vmatprep.subr.bf16.mxu1 %v10687_v1 }
 0x39d   :  { %6141 = vmatpush3.bf16.msra.mxu1 %v6699_v26 }
 0x39e   :  { %6142 = vmatprep.subr.bf16.mxu1 %v10687_v1 }
 0x3a1   :  { %6143 = vmatpush3.bf16.msra.mxu1 %v6700_v27 }
 0x3a2   :  { %6144 = vmatprep.subr.bf16.mxu1 %v10687_v1 }
 0x3a5   :  { %6145 = vmatpush3.bf16.msra.mxu1 %v6701_v28 }
 0x3a6   :  { %6146 = vmatprep.subr.bf16.mxu1 %v10687_v1 }
 0x3a9   :  { %6147 = vmatpush3.bf16.msra.mxu1 %v6702_v29 }
 0x3aa   :  { %6148 = vmatprep.subr.bf16.mxu1 %v10687_v1 }
 0x3ad   :  { %6149 = vmatpush3.bf16.msra.mxu1 %v6703_v30 }
 0x3ae   :  { %6174 = vmatprep.subr.bf16.mxu1 %v10687_v1 }
 0x3b0   :  { %6151 = vmatmul.mubr.bf16.vlgmr.msra.gmra.mrb[28].mxu1 %v7261_v6 }
 0x3b1   :  { %6190 = vmatprep.mubr.msk.bf16.mxu1 %vm6927_vm2, %v10687_v1  ;;  %6175 = vmatpush3.bf16.msra.mxu1 %v6712_v59 }
 0x3b2   :  { %6176 = vmatprep.subr.bf16.mxu1 %v10687_v1 }
 0x3b5   :  { %6177 = vmatpush3.bf16.msra.mxu1 %v6713_v60 }
 0x3b6   :  { %6178 = vmatprep.subr.bf16.mxu1 %v10687_v1 }
 0x3b9   :  { %6179 = vmatpush3.bf16.msra.mxu1 %v6714_v63 }
 0x3ba   :  { %6180 = vmatprep.subr.bf16.mxu1 %v10687_v1 }
 0x3bd   :  { %6181 = vmatpush3.bf16.msra.mxu1 %v6715_v4 }
 0x3be   :  { %6182 = vmatprep.subr.bf16.mxu1 %v10687_v1 }
 0x3c1   :  { %6183 = vmatpush3.bf16.msra.mxu1 %v6716_v5 }
 0x3c2   :  { %6184 = vmatprep.subr.bf16.mxu1 %v10687_v1 }
 0x3c5   :  { %6185 = vmatpush3.bf16.msra.mxu1 %v6717_v8 }
 0x3c6   :  { %6186 = vmatprep.subr.bf16.mxu1 %v10687_v1 }
 0x3c9   :  { %6187 = vmatpush3.bf16.msra.mxu1 %v6718_v9  ;;  %v6745_v9 = vld [vmem:[%s10812_s29 + $0x8] sm:$0xff]  }
 0x3ca   :  { %6188 = vmatprep.subr.bf16.mxu1 %v10687_v1 }
 0x3cd   :  { %6189 = vmatpush3.bf16.msra.mxu1 %v6719_v10  ;;  %v6746_v10 = vld [vmem:[%s10813_s5] sm:$0xff]  }
 0x3ce   :  { %6214 = vmatprep.subr.bf16.mxu1 %v10687_v1 }
 0x443   :  { %v938_v32 = vpop.f32.mrb[20].mxu1 }
 0x444   :  { %v7465_v33 = vadd.f32 %v7171_v35, %v938_v32  ;;  %v6072_v34 = vpop.f32.mrb[21].mxu1 }
 0x445   :  { %v941_v36 = vpop.f32.mrb[22].mxu1 }
 0x446   :  { %v945_v37 = vpack.c.bf16 %v7465_v33, %v7465_v33  ;;  %v6073_v38 = vpop.f32.mrb[23].mxu1 }
 0x447   :  { %v7566_v38 = vld [vmem:[%s10809_s11 + $0x80] sm:$0xff]  }
 0x448   :  { %6091 = vmatmul.mubr.bf16.vlgmr.msra.gmra.mrb[16].mxu0 %v945_v37 }
 0x449   :  { %6115 = vmatpush3.bf16.msra.mxu0 %v7385_v14  ;;  %6130 = vmatprep.mubr.msk.bf16.mxu0 %vm6927_vm2, %v10687_v1  ;;  %v6739_v14 = vld [vmem:[%s10808_s6 + $0x98] sm:$0xff]  }
 0x44a   :  { %6116 = vmatprep.subr.bf16.mxu0 %v10687_v1 }
 0x44d   :  { %6117 = vmatpush3.bf16.msra.mxu0 %v7391_v16 }
 0x44e   :  { %6118 = vmatprep.subr.bf16.mxu0 %v10687_v1 }
 0x451   :  { %6119 = vmatpush3.bf16.msra.mxu0 %v6690_v17  ;;  %v6741_v17 = vld [vmem:[%s10808_s6 + $0xa8] sm:$0xff]  }
 0x452   :  { %6120 = vmatprep.subr.bf16.mxu0 %v10687_v1 }
 0x455   :  { %6121 = vmatpush3.bf16.msra.mxu0 %v6691_v18 }
 0x456   :  { %6122 = vmatprep.subr.bf16.mxu0 %v10687_v1 }
 0x459   :  { %6123 = vmatpush3.bf16.msra.mxu0 %v6692_v19  ;;  %v6742_v19 = vld [vmem:[%s10808_s6 + $0xb0] sm:$0xff]  }
 0x45a   :  { %6124 = vmatprep.subr.bf16.mxu0 %v10687_v1 }
 0x45d   :  { %6125 = vmatpush3.bf16.msra.mxu0 %v6693_v20 }
 0x45e   :  { %6126 = vmatprep.subr.bf16.mxu0 %v10687_v1 }
 0x461   :  { %6127 = vmatpush3.bf16.msra.mxu0 %v6694_v21 }
 0x462   :  { %6128 = vmatprep.subr.bf16.mxu0 %v10687_v1 }
 0x463   :  { %v1150_v35 = vpop.f32.mrb[24].mxu1 }
 0x464   :  { %v6112_v39 = vpop.f32.mrb[25].mxu1 }
 0x465   :  { %v1153_v40 = vpop.f32.mrb[26].mxu1  ;;  %6129 = vmatpush3.bf16.msra.mxu0 %v6695_v22  ;;  %v7572_v39 = vld [vmem:[%s10809_s11 + $0x88] sm:$0xff]  }
 0x466   :  { %v6113_v41 = vpop.f32.mrb[27].mxu1  ;;  %6154 = vmatprep.subr.bf16.mxu0 %v10687_v1  ;;  %v6722_v40 = vld [vmem:[%s10809_s11 + $0x90] sm:$0xff]  }
 0x467   :  { %v6723_v41 = vld [vmem:[%s10809_s11 + $0x98] sm:$0xff]  }
 0x468   :  { %6131 = vmatmul.mubr.bf16.vlgmr.msra.gmra.mrb[20].mxu0 %v7263_v7 }
 0x469   :  { %6155 = vmatpush3.bf16.msra.mxu0 %v6696_v23  ;;  %6170 = vmatprep.mubr.msk.bf16.mxu0 %vm6927_vm2, %v10687_v1 }
 0x46a   :  { %6156 = vmatprep.subr.bf16.mxu0 %v10687_v1 }
 0x46d   :  { %6157 = vmatpush3.bf16.msra.mxu0 %v6697_v24 }
 0x46e   :  { %6158 = vmatprep.subr.bf16.mxu0 %v10687_v1 }
 0x471   :  { %6159 = vmatpush3.bf16.msra.mxu0 %v6698_v25 }
 0x472   :  { %6160 = vmatprep.subr.bf16.mxu0 %v10687_v1 }
 0x475   :  { %6161 = vmatpush3.bf16.msra.mxu0 %v6699_v26 }
 0x476   :  { %6162 = vmatprep.subr.bf16.mxu0 %v10687_v1 }
 0x479   :  { %6163 = vmatpush3.bf16.msra.mxu0 %v6700_v27 }
 0x47a   :  { %6164 = vmatprep.subr.bf16.mxu0 %v10687_v1 }
 0x47d   :  { %6165 = vmatpush3.bf16.msra.mxu0 %v6701_v28 }
 0x47e   :  { %6166 = vmatprep.subr.bf16.mxu0 %v10687_v1 }
 0x481   :  { %6167 = vmatpush3.bf16.msra.mxu0 %v6702_v29 }
 0x482   :  { %6168 = vmatprep.subr.bf16.mxu0 %v10687_v1 }
 0x483   :  { %v7491_v42 = vpop.f32.mrb[28].mxu1 }
 0x484   :  { %v6152_v43 = vpop.f32.mrb[29].mxu1 }
 0x485   :  { %v1298_v44 = vpop.f32.mrb[30].mxu1  ;;  %6169 = vmatpush3.bf16.msra.mxu0 %v6703_v30  ;;  %v6725_v43 = vld [vmem:[%s10809_s11 + $0xa8] sm:$0xff]  }
 0x486   :  { %v6153_v45 = vpop.f32.mrb[31].mxu1  ;;  %6194 = vmatprep.subr.bf16.mxu0 %v10687_v1  ;;  %v6726_v44 = vld [vmem:[%s10809_s11 + $0xb0] sm:$0xff]  }
 0x487   :  { %v6727_v45 = vld [vmem:[%s10809_s11 + $0xb8] sm:$0xff]  }
 0x488   :  { %6171 = vmatmul.mubr.bf16.vlgmr.msra.gmra.mrb[24].mxu0 %v7263_v7 }
 0x489   :  { %6210 = vmatprep.mubr.msk.bf16.mxu0 %vm6927_vm2, %v10687_v1  ;;  %6195 = vmatpush3.bf16.msra.mxu0 %v6736_v11  ;;  %v6747_v11 = vld [vmem:[%s10813_s5 + $0x8] sm:$0xff]  }
 0x48a   :  { %6196 = vmatprep.subr.bf16.mxu0 %v10687_v1 }
 0x48d   :  { %6197 = vmatpush3.bf16.msra.mxu0 %v6737_v12  ;;  %v6749_v12 = vld [vmem:[%s10813_s5 + $0x18] sm:$0xff]  }
 0x48e   :  { %6198 = vmatprep.subr.bf16.mxu0 %v10687_v1 }
 0x491   :  { %6199 = vmatpush3.bf16.msra.mxu0 %v6738_v13  ;;  %v6750_v13 = vld [vmem:[%s10813_s5 + $0x20] sm:$0xff]  }
 0x492   :  { %6200 = vmatprep.subr.bf16.mxu0 %v10687_v1 }
 0x495   :  { %6201 = vmatpush3.bf16.msra.mxu0 %v6739_v14  ;;  %v6751_v14 = vld [vmem:[%s10813_s5 + $0x28] sm:$0xff]  }
 0x496   :  { %6202 = vmatprep.subr.bf16.mxu0 %v10687_v1 }
 0x499   :  { %6203 = vmatpush3.bf16.msra.mxu0 %v6740_v15  ;;  %v6752_v15 = vld [vmem:[%s10813_s5 + $0x30] sm:$0xff]  }
 0x49a   :  { %6204 = vmatprep.subr.bf16.mxu0 %v10687_v1 }
 0x49d   :  { %6205 = vmatpush3.bf16.msra.mxu0 %v6741_v17  ;;  %v6754_v17 = vld [vmem:[%s10813_s5 + $0x40] sm:$0xff]  }
 0x49e   :  { %6206 = vmatprep.subr.bf16.mxu0 %v10687_v1 }
 0x4a1   :  { %6207 = vmatpush3.bf16.msra.mxu0 %v6742_v19  ;;  %v6756_v19 = vld [vmem:[%s10813_s5 + $0x50] sm:$0xff]  }
 0x4a2   :  { %6208 = vmatprep.subr.bf16.mxu0 %v10687_v1 }
 0x51b   :  { %v1045_v46 = vpop.f32.mrb[16].mxu0 }
 0x51c   :  { %v6092_v47 = vpop.f32.mrb[17].mxu0  ;;  %v1341_v48 = vmul.f32 %v1150_v35, %v1045_v46 }
 0x51d   :  { %v1048_v49 = vpop.f32.mrb[18].mxu0  ;;  %v6729_v47 = vld [vmem:[%s10810_s4 + $0x88] sm:$0xff]  }
 0x51e   :  { %v6093_v50 = vpop.f32.mrb[19].mxu0  ;;  %v1342_v51 = vsel %vm99_vm1, %v1341_v48, 0.0  ;;  %v6730_v48 = vld [vmem:[%s10810_s4 + $0x90] sm:$0xff]   ;;  %v6731_v49 = vld [vmem:[%s10810_s4 + $0x98] sm:$0xff]  }
 0x51f   :  { %1343 = vadd.xlane.f32.xlu1 %v1342_v51  ;;  %v6732_v50 = vld [vmem:[%s10810_s4 + $0xa0] sm:$0xff]   ;;  %v6733_v51 = vld [vmem:[%s10810_s4 + $0xa8] sm:$0xff]  }
 0x53b   :  { %v1190_v52 = vpop.f32.mrb[20].mxu0 }
 0x53c   :  { %v1346_v53 = vmul.f32 %v1190_v52, %v1045_v46  ;;  %v6132_v55 = vpop.f32.mrb[21].mxu0  ;;  %v6728_v46 = vld [vmem:[%s10810_s4 + $0x80] sm:$0xff]   ;;  %v6734_v52 = vld [vmem:[%s10810_s4 + $0xb0] sm:$0xff]  }
 0x53d   :  { %v1193_v56 = vpop.f32.mrb[22].mxu0  ;;  %v6743_v55 = vld [vmem:[%s10808_s6 + $0xb8] sm:$0xff]  }
 0x53e   :  { %v6133_v57 = vpop.f32.mrb[23].mxu0  ;;  %v1347_v58 = vsel %vm99_vm1, %v1346_v53, 0.0  ;;  %v6735_v53 = vld [vmem:[%s10810_s4 + $0xb8] sm:$0xff]   ;;  %6209 = vmatpush3.bf16.msra.mxu0 %v6743_v55  ;;  %v6784_v55 = vld [vmem:[%s10813_s5 + $0x130] sm:$0xff]  }
 0x53f   :  { %1348 = vadd.xlane.f32.xlu1 %v1347_v58  ;;  %6234 = vmatprep.subr.bf16.mxu0 %v10687_v1 }
 0x55b   :  { %v7506_v61 = vpop.f32.mrb[24].mxu0 }
 0x55c   :  { %v6172_v62 = vpop.f32.mrb[25].mxu0 }
 0x55d   :  { %v1338_v0 = vpop.f32.mrb[26].mxu0 }
 0x55e   :  { %v6173_v3 = vpop.f32.mrb[27].mxu0  ;;  %v6744_v0 = vld [vmem:[%s10812_s29] sm:$0xff]  }
 0x5ac   :  { %v1344_v16 = vpop.xlane.xlu1 %1343 }
 0x5ad   :  { %v1345_v20 = vmul.f32 0.088388346, %v1344_v16  ;;  %v6753_v16 = vld [vmem:[%s10813_s5 + $0x38] sm:$0xff]  }
 0x5cc   :  { %v1349_v18 = vpop.xlane.xlu1 %1348 }
 0x5cd   :  { %v1350_v21 = vmul.f32 0.088388346, %v1349_v18  ;;  %v6755_v18 = vld [vmem:[%s10813_s5 + $0x48] sm:$0xff]  }
 0x5cf   :  { %v1351_v22 = vmax.f32 %v1345_v20, %v1350_v21 }
 0x5d1   :  { %v1352_v23 = vsub.f32 %v1345_v20, %v1351_v22  ;;  %v1355_v24 = vsub.f32 %v1350_v21, %v1351_v22  ;;  %v6757_v20 = vld [vmem:[%s10813_s5 + $0x58] sm:$0xff]   ;;  %v6758_v21 = vld [vmem:[%s10813_s5 + $0x60] sm:$0xff]   ;;  %v6759_v22 = vld [vmem:[%s10813_s5 + $0x68] sm:$0xff]  }
 0x5d3   :  { %v1353_v25 = vmul.f32 1.442695, %v1352_v23  ;;  %v1356_v26 = vmul.f32 1.442695, %v1355_v24  ;;  %v6760_v23 = vld [vmem:[%s10813_s5 + $0x70] sm:$0xff]   ;;  %v6761_v24 = vld [vmem:[%s10813_s5 + $0x78] sm:$0xff]  }
 0x5d5   :  { %6899 = vpow2.f32 %v1353_v25  ;;  %v6762_v25 = vld [vmem:[%s10813_s5 + $0x80] sm:$0xff]  }
 0x5d6   :  { %6901 = vpow2.f32 %v1356_v26  ;;  %v6763_v26 = vld [vmem:[%s10813_s5 + $0x88] sm:$0xff]  }
 0x5df   :  { %v6900_v27 = vpop.eup %6899 }
 0x5e0   :  { %v6902_v28 = vpop.eup %6901 }
 0x5e1   :  { %v1358_v29 = vadd.f32 %v6902_v28, %v6900_v27 }
 0x5e3   :  { %6903 = vrcp.f32 %v1358_v29  ;;  %v6766_v29 = vld [vmem:[%s10813_s5 + $0xa0] sm:$0xff]  }
 0x5ed   :  { %v6904_v30 = vpop.eup %6903 }
 0x5ee   :  { %v1360_v31 = vmul.f32 %v6904_v30, %v6900_v27  ;;  %v1362_v32 = vmul.f32 %v6904_v30, %v6902_v28  ;;  %v6764_v27 = vld [vmem:[%s10813_s5 + $0x90] sm:$0xff]   ;;  %v6765_v28 = vld [vmem:[%s10813_s5 + $0x98] sm:$0xff]   ;;  %v6767_v30 = vld [vmem:[%s10813_s5 + $0xa8] sm:$0xff]  }
 0x5f0   :  { %v1361_v34 = vmul.f32 %v1360_v31, %v7491_v42  ;;  %v1363_v36 = vmul.f32 %v1362_v32, %v7506_v61  ;;  %v6724_v42 = vld [vmem:[%s10809_s11 + $0xa0] sm:$0xff]   ;;  %v6768_v31 = vld [vmem:[%s10813_s5 + $0xb0] sm:$0xff]   ;;  %v6769_v32 = vld [vmem:[%s10813_s5 + $0xb8] sm:$0xff]  }
 0x5f2   :  { %v1364_v37 = vadd.f32 %v1363_v36, %v1361_v34  ;;  %v6770_v34 = vld [vmem:[%s10813_s5 + $0xc0] sm:$0xff]   ;;  %v6771_v36 = vld [vmem:[%s10813_s5 + $0xc8] sm:$0xff]  }
 0x5f4   :  { %v1365_v35 = vpack.c.bf16 %v1364_v37, %v1364_v37  ;;  %v6772_v37 = vld [vmem:[%s10813_s5 + $0xd0] sm:$0xff]  }
 0x5f6   :  { %6191 = vmatmul.mubr.bf16.vlgmr.msra.gmra.mrb[32].mxu1 %v1365_v35  ;;  %v6774_v35 = vld [vmem:[%s10813_s5 + $0xe0] sm:$0xff]  }
 0x5f7   :  { %6215 = vmatpush3.bf16.msra.mxu1 %v7566_v38  ;;  %6230 = vmatprep.mubr.msk.bf16.mxu1 %vm6927_vm2, %v10687_v1 }
 0x5f8   :  { %6216 = vmatprep.subr.bf16.mxu1 %v10687_v1 }
 0x5fb   :  { %6217 = vmatpush3.bf16.msra.mxu1 %v7572_v39 }
 0x5fc   :  { %6218 = vmatprep.subr.bf16.mxu1 %v10687_v1 }
 0x5ff   :  { %6219 = vmatpush3.bf16.msra.mxu1 %v6722_v40 }
 0x600   :  { %6220 = vmatprep.subr.bf16.mxu1 %v10687_v1 }
 0x603   :  { %6221 = vmatpush3.bf16.msra.mxu1 %v6723_v41 }
 0x604   :  { %6222 = vmatprep.subr.bf16.mxu1 %v10687_v1 }
 0x607   :  { %6223 = vmatpush3.bf16.msra.mxu1 %v6724_v42 }
 0x608   :  { %6224 = vmatprep.subr.bf16.mxu1 %v10687_v1 }
 0x60b   :  { %6225 = vmatpush3.bf16.msra.mxu1 %v6725_v43 }
 0x60c   :  { %6226 = vmatprep.subr.bf16.mxu1 %v10687_v1 }
 0x60f   :  { %6227 = vmatpush3.bf16.msra.mxu1 %v6726_v44 }
 0x610   :  { %6228 = vmatprep.subr.bf16.mxu1 %v10687_v1 }
 0x613   :  { %6229 = vmatpush3.bf16.msra.mxu1 %v6727_v45 }
 0x614   :  { %6254 = vmatprep.subr.bf16.mxu1 %v10687_v1 }
 0x616   :  { %6231 = vmatmul.mubr.bf16.vlgmr.msra.gmra.mrb[36].mxu1 %v7261_v6 }
 0x617   :  { %6255 = vmatpush3.bf16.msra.mxu1 %v6728_v46  ;;  %6270 = vmatprep.mubr.msk.bf16.mxu1 %vm6927_vm2, %v10687_v1 }
 0x618   :  { %6256 = vmatprep.subr.bf16.mxu1 %v10687_v1 }
 0x61b   :  { %6257 = vmatpush3.bf16.msra.mxu1 %v6729_v47 }
 0x61c   :  { %6258 = vmatprep.subr.bf16.mxu1 %v10687_v1 }
 0x61f   :  { %6259 = vmatpush3.bf16.msra.mxu1 %v6730_v48 }
 0x620   :  { %6260 = vmatprep.subr.bf16.mxu1 %v10687_v1 }
 0x623   :  { %6261 = vmatpush3.bf16.msra.mxu1 %v6731_v49 }
 0x624   :  { %6262 = vmatprep.subr.bf16.mxu1 %v10687_v1 }
 0x627   :  { %6263 = vmatpush3.bf16.msra.mxu1 %v6732_v50 }
 0x628   :  { %6264 = vmatprep.subr.bf16.mxu1 %v10687_v1 }
 0x62b   :  { %6265 = vmatpush3.bf16.msra.mxu1 %v6733_v51 }
 0x62c   :  { %6266 = vmatprep.subr.bf16.mxu1 %v10687_v1 }
 0x62f   :  { %6267 = vmatpush3.bf16.msra.mxu1 %v6734_v52 }
 0x630   :  { %6268 = vmatprep.subr.bf16.mxu1 %v10687_v1 }
 0x633   :  { %6269 = vmatpush3.bf16.msra.mxu1 %v6735_v53 }
 0x634   :  { %6294 = vmatprep.subr.bf16.mxu1 %v10687_v1 }
 0x636   :  { %6271 = vmatmul.mubr.bf16.vlgmr.msra.gmra.mrb[40].mxu1 %v7261_v6 }
 0x637   :  { %6310 = vmatprep.mubr.msk.bf16.mxu1 %vm6927_vm2, %v10687_v1 }
 0x6c9   :  { %v1465_v56 = vpop.f32.mrb[32].mxu1 }
 0x6ca   :  { %v7646_v57 = vadd.f32 %v1465_v56, %v7465_v33  ;;  %v6192_v58 = vpop.f32.mrb[33].mxu1  ;;  %v6785_v56 = vld [vmem:[%s10813_s5 + $0x138] sm:$0xff]  }
 0x6cb   :  { %v1468_v59 = vpop.f32.mrb[34].mxu1  ;;  %v6786_v58 = vld [vmem:[%s10813_s5 + $0x140] sm:$0xff]  }
 0x6cc   :  { %v1472_v60 = vpack.c.bf16 %v7646_v57, %v7646_v57  ;;  %v6193_v6 = vpop.f32.mrb[35].mxu1  ;;  %v6787_v59 = vld [vmem:[%s10813_s5 + $0x148] sm:$0xff]  }
 0x6ce   :  { %6211 = vmatmul.mubr.bf16.vlgmr.msra.gmra.mrb[28].mxu0 %v1472_v60  ;;  %v6788_v60 = vld [vmem:[%s10813_s5 + $0x150] sm:$0xff]  }
 0x6cf   :  { %6235 = vmatpush3.bf16.msra.mxu0 %v7566_v38  ;;  %6250 = vmatprep.mubr.msk.bf16.mxu0 %vm6927_vm2, %v10687_v1  ;;  %v6773_v38 = vld [vmem:[%s10813_s5 + $0xd8] sm:$0xff]  }
 0x6d0   :  { %6236 = vmatprep.subr.bf16.mxu0 %v10687_v1 }
 0x6d3   :  { %6237 = vmatpush3.bf16.msra.mxu0 %v7572_v39  ;;  %v6775_v39 = vld [vmem:[%s10813_s5 + $0xe8] sm:$0xff]  }
 0x6d4   :  { %6238 = vmatprep.subr.bf16.mxu0 %v10687_v1 }
 0x6d7   :  { %6239 = vmatpush3.bf16.msra.mxu0 %v6722_v40  ;;  %v6776_v40 = vld [vmem:[%s10813_s5 + $0xf0] sm:$0xff]  }
 0x6d8   :  { %6240 = vmatprep.subr.bf16.mxu0 %v10687_v1 }
 0x6db   :  { %6241 = vmatpush3.bf16.msra.mxu0 %v6723_v41  ;;  %v6777_v41 = vld [vmem:[%s10813_s5 + $0xf8] sm:$0xff]  }
 0x6dc   :  { %6242 = vmatprep.subr.bf16.mxu0 %v10687_v1 }
 0x6df   :  { %6243 = vmatpush3.bf16.msra.mxu0 %v6724_v42  ;;  %v6778_v42 = vld [vmem:[%s10813_s5 + $0x100] sm:$0xff]  }
 0x6e0   :  { %6244 = vmatprep.subr.bf16.mxu0 %v10687_v1 }
 0x6e3   :  { %6245 = vmatpush3.bf16.msra.mxu0 %v6725_v43  ;;  %v6779_v43 = vld [vmem:[%s10813_s5 + $0x108] sm:$0xff]  }
 0x6e4   :  { %6246 = vmatprep.subr.bf16.mxu0 %v10687_v1 }
 0x6e7   :  { %6247 = vmatpush3.bf16.msra.mxu0 %v6726_v44  ;;  %v6780_v44 = vld [vmem:[%s10813_s5 + $0x110] sm:$0xff]  }
 0x6e8   :  { %6248 = vmatprep.subr.bf16.mxu0 %v10687_v1 }
 0x6e9   :  { %v7661_v33 = vpop.f32.mrb[36].mxu1 }
 0x6ea   :  { %v6232_v61 = vpop.f32.mrb[37].mxu1 }
 0x6eb   :  { %v1680_v62 = vpop.f32.mrb[38].mxu1  ;;  %6249 = vmatpush3.bf16.msra.mxu0 %v6727_v45 }
 0x6ec   :  { %v6233_v63 = vpop.f32.mrb[39].mxu1  ;;  %6274 = vmatprep.subr.bf16.mxu0 %v10687_v1 }
 0x6ee   :  { %6251 = vmatmul.mubr.bf16.vlgmr.msra.gmra.mrb[32].mxu0 %v7263_v7 }
 0x6ef   :  { %6275 = vmatpush3.bf16.msra.mxu0 %v6728_v46  ;;  %6290 = vmatprep.mubr.msk.bf16.mxu0 %vm6927_vm2, %v10687_v1 }
 0x6f0   :  { %6276 = vmatprep.subr.bf16.mxu0 %v10687_v1 }
 0x6f3   :  { %6277 = vmatpush3.bf16.msra.mxu0 %v6729_v47 }
 0x6f4   :  { %6278 = vmatprep.subr.bf16.mxu0 %v10687_v1 }
 0x6f7   :  { %6279 = vmatpush3.bf16.msra.mxu0 %v6730_v48 }
 0x6f8   :  { %6280 = vmatprep.subr.bf16.mxu0 %v10687_v1 }
 0x6fb   :  { %6281 = vmatpush3.bf16.msra.mxu0 %v6731_v49 }
 0x6fc   :  { %6282 = vmatprep.subr.bf16.mxu0 %v10687_v1 }
 0x6ff   :  { %6283 = vmatpush3.bf16.msra.mxu0 %v6732_v50 }
 0x700   :  { %6284 = vmatprep.subr.bf16.mxu0 %v10687_v1 }
 0x703   :  { %6285 = vmatpush3.bf16.msra.mxu0 %v6733_v51  ;;  %v6781_v51 = vld [vmem:[%s10813_s5 + $0x118] sm:$0xff]  }
 0x704   :  { %6286 = vmatprep.subr.bf16.mxu0 %v10687_v1 }
 0x707   :  { %6287 = vmatpush3.bf16.msra.mxu0 %v6734_v52  ;;  %v6782_v52 = vld [vmem:[%s10813_s5 + $0x120] sm:$0xff]  }
 0x708   :  { %6288 = vmatprep.subr.bf16.mxu0 %v10687_v1 }
 0x709   :  { %v7677_v3 = vpop.f32.mrb[40].mxu1 }
 0x70a   :  { %v6272_v4 = vpop.f32.mrb[41].mxu1 }
 0x70b   :  { %v1825_v5 = vpop.f32.mrb[42].mxu1  ;;  %6289 = vmatpush3.bf16.msra.mxu0 %v6735_v53  ;;  %v6783_v53 = vld [vmem:[%s10813_s5 + $0x128] sm:$0xff]   ;;  %v6789_v4 = vld [vmem:[%s10813_s5 + $0x158] sm:$0xff]  }
 0x70c   :  { %v6273_v8 = vpop.f32.mrb[43].mxu1  ;;  %6314 = vmatprep.subr.bf16.mxu0 %v6744_v0  ;;  %v6790_v5 = vld [vmem:[%s10813_s5 + $0x160] sm:$0xff]  }
 0x70d   :  { %v6791_v8 = vld [vmem:[%s10813_s5 + $0x168] sm:$0xff]  }
 0x70e   :  { %6291 = vmatmul.mubr.bf16.vlgmr.msra.gmra.mrb[36].mxu0 %v7263_v7  ;;  %v6748_v7 = vld [vmem:[%s10813_s5 + $0x10] sm:$0xff]  }
 0x70f   :  { %6315 = vmatpush3.bf16.msra.mxu0 %v6744_v0  ;;  %6318 = vmatprep.mubr.msk.bf16.mxu0 %vm164_vm4, %v6746_v10  ;;  %v6793_v10 = vld [vmem:[%s10811_s7 + $0x80] sm:$0xff]  }
 0x710   :  { %6316 = vmatprep.subr.bf16.mxu0 %v6745_v9  ;;  %6295 = vmatpush3.bf16.msra.mxu1 %v6793_v10 }
 0x711   :  { %6296 = vmatprep.subr.bf16.mxu1 %v10687_v1 }
 0x713   :  { %6317 = vmatpush3.bf16.msra.mxu0 %v6745_v9  ;;  %v6792_v9 = vld [vmem:[%s10813_s5 + $0x170] sm:$0xff]  }
 0x714   :  { %6612 = vmatprep.subr.bf16.mxu0 %v10687_v1 }
 0x716   :  { %6319 = vmatmul.mubr.msk.bf16.vlgmr.msra.gmra.mrb[40].mxu0 %vm164_vm4, %v6747_v11  ;;  %v6794_v11 = vld [vmem:[%s10813_s5 + $0x178] sm:$0xff]  }
 0x717   :  { %6322 = vmatprep.mubr.msk.bf16.mxu0 %vm164_vm4, %v6748_v7  ;;  %v6795_v7 = vld [vmem:[%s10811_s7 + $0x88] sm:$0xff]  }
 0x718   :  { %6297 = vmatpush3.bf16.msra.mxu1 %v6795_v7 }
 0x719   :  { %6298 = vmatprep.subr.bf16.mxu1 %v10687_v1 }
 0x71e   :  { %6323 = vmatmul.mubr.msk.bf16.gmra.mrb[44].mxu0 %vm164_vm4, %v6749_v12 }
 0x71f   :  { %6326 = vmatprep.mubr.msk.bf16.mxu0 %vm164_vm4, %v6750_v13  ;;  %v6796_v13 = vld [vmem:[%s10813_s5 + $0x180] sm:$0xff]  }
 0x726   :  { %6327 = vmatmul.mubr.msk.bf16.gmra.mrb[48].mxu0 %vm164_vm4, %v6751_v14 }
 0x727   :  { %6330 = vmatprep.mubr.msk.bf16.mxu0 %vm164_vm4, %v6752_v15  ;;  %v6797_v15 = vld [vmem:[%s10811_s7 + $0x90] sm:$0xff]  }
 0x728   :  { %6299 = vmatpush3.bf16.msra.mxu1 %v6797_v15 }
 0x729   :  { %6300 = vmatprep.subr.bf16.mxu1 %v10687_v1 }
 0x72e   :  { %6331 = vmatmul.mubr.msk.bf16.gmra.mrb[52].mxu0 %vm164_vm4, %v6753_v16  ;;  %v6798_v16 = vld [vmem:[%s10813_s5 + $0x188] sm:$0xff]  }
 0x72f   :  { %6334 = vmatprep.mubr.msk.bf16.mxu0 %vm164_vm4, %v6754_v17 }
 0x736   :  { %6335 = vmatmul.mubr.msk.bf16.gmra.mrb[56].mxu0 %vm164_vm4, %v6755_v18 }
 0x737   :  { %6338 = vmatprep.mubr.msk.bf16.mxu0 %vm164_vm4, %v6756_v19  ;;  %v6799_v19 = vld [vmem:[%s10811_s7 + $0x98] sm:$0xff]  }
 0x738   :  { %6301 = vmatpush3.bf16.msra.mxu1 %v6799_v19 }
 0x739   :  { %6302 = vmatprep.subr.bf16.mxu1 %v10687_v1 }
 0x73e   :  { %6339 = vmatmul.mubr.msk.bf16.gmra.mrb[60].mxu0 %vm164_vm4, %v6757_v20  ;;  %v6800_v20 = vld [vmem:[%s10813_s5 + $0x190] sm:$0xff]  }
 0x73f   :  { %6342 = vmatprep.mubr.msk.bf16.mxu0 %vm164_vm4, %v6758_v21  ;;  %v6801_v21 = vld [vmem:[%s10811_s7 + $0xa0] sm:$0xff]  }
 0x740   :  { %6303 = vmatpush3.bf16.msra.mxu1 %v6801_v21 }
 0x741   :  { %6304 = vmatprep.subr.bf16.mxu1 %v10687_v1 }
 0x746   :  { %6343 = vmatmul.mubr.msk.bf16.gmra.mrb[64].mxu0 %vm164_vm4, %v6759_v22  ;;  %v6802_v22 = vld [vmem:[%s10813_s5 + $0x198] sm:$0xff]  }
 0x747   :  { %6346 = vmatprep.mubr.msk.bf16.mxu0 %vm164_vm4, %v6760_v23  ;;  %v6804_v23 = vld [vmem:[%s10813_s5 + $0x1a0] sm:$0xff]  }
 0x74e   :  { %6347 = vmatmul.mubr.msk.bf16.gmra.mrb[68].mxu0 %vm164_vm4, %v6761_v24  ;;  %v6803_v24 = vld [vmem:[%s10811_s7 + $0xa8] sm:$0xff]  }
 0x74f   :  { %6350 = vmatprep.mubr.msk.bf16.mxu0 %vm164_vm4, %v6762_v25  ;;  %6305 = vmatpush3.bf16.msra.mxu1 %v6803_v24  ;;  %v6805_v25 = vld [vmem:[%s10811_s7 + $0xb0] sm:$0xff]  }
 0x750   :  { %6306 = vmatprep.subr.bf16.mxu1 %v10687_v1 }
 0x753   :  { %6307 = vmatpush3.bf16.msra.mxu1 %v6805_v25 }
 0x754   :  { %6308 = vmatprep.subr.bf16.mxu1 %v10687_v1 }
 0x756   :  { %6351 = vmatmul.mubr.msk.bf16.gmra.mrb[72].mxu0 %vm164_vm4, %v6763_v26  ;;  %v6806_v26 = vld [vmem:[%s10813_s5 + $0x1a8] sm:$0xff]  }
 0x757   :  { %6354 = vmatprep.mubr.msk.bf16.mxu0 %vm164_vm4, %v6764_v27  ;;  %v6808_v27 = vld [vmem:[%s10813_s5 + $0x1b0] sm:$0xff]  }
 0x75e   :  { %6355 = vmatmul.mubr.msk.bf16.gmra.mrb[76].mxu0 %vm164_vm4, %v6765_v28  ;;  %v6807_v28 = vld [vmem:[%s10811_s7 + $0xb8] sm:$0xff]  }
 0x75f   :  { %6358 = vmatprep.mubr.msk.bf16.mxu0 %vm164_vm4, %v6766_v29  ;;  %6309 = vmatpush3.bf16.msra.mxu1 %v6807_v28  ;;  %v6809_v29 = vld [vmem:[%s10813_s5 + $0x1b8] sm:$0xff]  }
 0x760   :  { %6446 = vmatprep.subr.bf16.mxu1 %v10687_v1 }
 0x766   :  { %6359 = vmatmul.mubr.msk.bf16.gmra.mrb[80].mxu0 %vm164_vm4, %v6767_v30  ;;  %v6812_v30 = vld [vmem:[%s10813_s5 + $0x1c0] sm:$0xff]  }
 0x767   :  { %6362 = vmatprep.mubr.msk.bf16.mxu0 %vm164_vm4, %v6768_v31  ;;  %v6813_v31 = vld [vmem:[%s10813_s5 + $0x1c8] sm:$0xff]  }
 0x76e   :  { %6363 = vmatmul.mubr.msk.bf16.gmra.mrb[84].mxu0 %vm164_vm4, %v6769_v32  ;;  %v6816_v32 = vld [vmem:[%s10813_s5 + $0x1d0] sm:$0xff]  }
 0x76f   :  { %6366 = vmatprep.mubr.msk.bf16.mxu0 %vm164_vm4, %v6770_v34  ;;  %v6817_v34 = vld [vmem:[%s10813_s5 + $0x1d8] sm:$0xff]  }
 0x776   :  { %6367 = vmatmul.mubr.msk.bf16.gmra.mrb[88].mxu0 %vm164_vm4, %v6771_v36  ;;  %v6820_v36 = vld [vmem:[%s10813_s5 + $0x1e0] sm:$0xff]  }
 0x777   :  { %6370 = vmatprep.mubr.msk.bf16.mxu0 %vm164_vm4, %v6772_v37  ;;  %v6821_v37 = vld [vmem:[%s10813_s5 + $0x1e8] sm:$0xff]  }
 0x77e   :  { %6371 = vmatmul.mubr.msk.bf16.gmra.mrb[92].mxu0 %vm164_vm4, %v6773_v38  ;;  %v6824_v38 = vld [vmem:[%s10813_s5 + $0x1f0] sm:$0xff]  }
 0x77f   :  { %6374 = vmatprep.mubr.msk.bf16.mxu0 %vm164_vm4, %v6774_v35  ;;  %v6825_v35 = vld [vmem:[%s10813_s5 + $0x1f8] sm:$0xff]  }
 0x786   :  { %6375 = vmatmul.mubr.msk.bf16.gmra.mrb[96].mxu0 %vm164_vm4, %v6775_v39 }
 0x787   :  { %6378 = vmatprep.mubr.msk.bf16.mxu0 %vm164_vm4, %v6776_v40 }
 0x78e   :  { %6379 = vmatmul.mubr.msk.bf16.gmra.mrb[100].mxu0 %vm164_vm4, %v6777_v41 }
 0x78f   :  { %6382 = vmatprep.mubr.msk.bf16.mxu0 %vm164_vm4, %v6778_v42 }
 0x796   :  { %6383 = vmatmul.mubr.msk.bf16.gmra.mrb[104].mxu0 %vm164_vm4, %v6779_v43 }
 0x797   :  { %6386 = vmatprep.mubr.msk.bf16.mxu0 %vm164_vm4, %v6780_v44 }
 0x79e   :  { %6387 = vmatmul.mubr.msk.bf16.gmra.mrb[108].mxu0 %vm164_vm4, %v6781_v51 }
 0x79f   :  { %6390 = vmatprep.mubr.msk.bf16.mxu0 %vm164_vm4, %v6782_v52 }
 0x7a1   :  { %v1572_v45 = vpop.f32.mrb[28].mxu0 }
 0x7a2   :  { %v1868_v46 = vmul.f32 %v7661_v33, %v1572_v45  ;;  %v6212_v47 = vpop.f32.mrb[29].mxu0 }
 0x7a3   :  { %v1575_v48 = vpop.f32.mrb[30].mxu0 }
 0x7a4   :  { %v6213_v49 = vpop.f32.mrb[31].mxu0  ;;  %v1869_v50 = vsel %vm99_vm1, %v1868_v46, 0.0 }
 0x7a5   :  { %1870 = vadd.xlane.f32.xlu0 %v1869_v50 }
 0x7a6   :  { %6391 = vmatmul.mubr.msk.bf16.gmra.mrb[112].mxu0 %vm164_vm4, %v6783_v53 }
 0x7a7   :  { %6394 = vmatprep.mubr.msk.bf16.mxu0 %vm164_vm4, %v6784_v55 }
 0x7ae   :  { %6395 = vmatmul.mubr.msk.bf16.gmra.mrb[116].mxu0 %vm164_vm4, %v6785_v56 }
 0x7af   :  { %6398 = vmatprep.mubr.msk.bf16.mxu0 %vm164_vm4, %v6786_v58 }
 0x7b6   :  { %6399 = vmatmul.mubr.msk.bf16.gmra.mrb[120].mxu0 %vm164_vm4, %v6787_v59 }
 0x7b7   :  { %6402 = vmatprep.mubr.msk.bf16.mxu0 %vm164_vm4, %v6788_v60 }
 0x7be   :  { %6403 = vmatmul.mubr.msk.bf16.gmra.mrb[124].mxu0 %vm164_vm4, %v6789_v4 }
 0x7bf   :  { %6406 = vmatprep.mubr.msk.bf16.mxu0 %vm164_vm4, %v6790_v5 }
 0x7c1   :  { %v1717_v6 = vpop.f32.mrb[32].mxu0 }
 0x7c2   :  { %v1873_v33 = vmul.f32 %v1717_v6, %v1572_v45  ;;  %v6252_v61 = vpop.f32.mrb[33].mxu0 }
 0x7c3   :  { %v1720_v62 = vpop.f32.mrb[34].mxu0 }
 0x7c4   :  { %v6253_v63 = vpop.f32.mrb[35].mxu0  ;;  %v1874_v0 = vsel %vm99_vm1, %v1873_v33, 0.0 }
 0x7c5   :  { %1875 = vadd.xlane.f32.xlu1 %v1874_v0 }
 0x7c6   :  { %6407 = vmatmul.mubr.msk.bf16.gmra.mrb[128].mxu0 %vm164_vm4, %v6791_v8 }
 0x7c7   :  { %6410 = vmatprep.mubr.msk.bf16.mxu0 %vm164_vm4, %v6792_v9 }
 0x7ce   :  { %6411 = vmatmul.mubr.msk.bf16.gmra.mrb[132].mxu0 %vm164_vm4, %v6794_v11 }
 0x7cf   :  { %6414 = vmatprep.mubr.msk.bf16.mxu0 %vm164_vm4, %v6796_v13 }
 0x7d6   :  { %6415 = vmatmul.mubr.msk.bf16.gmra.mrb[136].mxu0 %vm164_vm4, %v6798_v16 }
 0x7d7   :  { %6418 = vmatprep.mubr.msk.bf16.mxu0 %vm164_vm4, %v6800_v20 }
 0x7de   :  { %6419 = vmatmul.mubr.msk.bf16.gmra.mrb[140].mxu0 %vm164_vm4, %v6802_v22 }
 0x7df   :  { %6422 = vmatprep.mubr.msk.bf16.mxu0 %vm164_vm4, %v6804_v23 }
 0x7e1   :  { %v7886_v12 = vpop.f32.mrb[36].mxu0 }
 0x7e2   :  { %v6292_v14 = vpop.f32.mrb[37].mxu0 }
 0x7e3   :  { %v1865_v17 = vpop.f32.mrb[38].mxu0 }
 0x7e4   :  { %v6293_v18 = vpop.f32.mrb[39].mxu0 }
 0x7e6   :  { %6423 = vmatmul.mubr.msk.bf16.gmra.mrb[144].mxu0 %vm164_vm4, %v6806_v26 }
 0x7e7   :  { %6426 = vmatprep.mubr.msk.bf16.mxu0 %vm164_vm4, %v6808_v27 }
 0x7e9   :  { %v7979_v39 = vpop.f32.mrb[40].mxu0 }
 0x7ea   :  { %v7981_v40 = vpop.f32.mrb[41].mxu0 }
 0x7eb   :  { %v7983_v41 = vpop.f32.mrb[42].mxu0 }
 0x7ec   :  { %v7985_v42 = vpop.f32.mrb[43].mxu0 }
 0x7ee   :  { %6427 = vmatmul.mubr.msk.bf16.gmra.mrb[148].mxu0 %vm164_vm4, %v6809_v29 }
 0x7ef   :  { %6430 = vmatprep.mubr.msk.bf16.mxu0 %vm164_vm4, %v6812_v30 }
 0x7f1   :  { %v7987_v43 = vpop.f32.mrb[44].mxu0 }
 0x7f2   :  { %v7989_v44 = vpop.f32.mrb[45].mxu0 }
 0x7f3   :  { %v7991_v45 = vpop.f32.mrb[46].mxu0 }
 0x7f4   :  { %v7993_v46 = vpop.f32.mrb[47].mxu0 }
 0x7f6   :  { %6431 = vmatmul.mubr.msk.bf16.gmra.mrb[152].mxu0 %vm164_vm4, %v6813_v31 }
 0x7f7   :  { %6434 = vmatprep.mubr.msk.bf16.mxu0 %vm164_vm4, %v6816_v32 }
 0x7f9   :  { %v7995_v47 = vpop.f32.mrb[48].mxu0 }
 0x7fa   :  { %v7997_v48 = vpop.f32.mrb[49].mxu0 }
 0x7fb   :  { %v7999_v49 = vpop.f32.mrb[50].mxu0 }
 0x7fc   :  { %v8001_v50 = vpop.f32.mrb[51].mxu0 }
 0x7fe   :  { %6435 = vmatmul.mubr.msk.bf16.gmra.mrb[156].mxu0 %vm164_vm4, %v6817_v34 }
 0x7ff   :  { %6438 = vmatprep.mubr.msk.bf16.mxu0 %vm164_vm4, %v6820_v36 }
 0x801   :  { %v8003_v51 = vpop.f32.mrb[52].mxu0 }
 0x802   :  { %v8005_v52 = vpop.f32.mrb[53].mxu0 }
 0x803   :  { %v8007_v53 = vpop.f32.mrb[54].mxu0 }
 0x804   :  { %v8009_v55 = vpop.f32.mrb[55].mxu0 }
 0x806   :  { %6439 = vmatmul.mubr.msk.bf16.gmra.mrb[160].mxu0 %vm164_vm4, %v6821_v37 }
 0x807   :  { %6442 = vmatprep.mubr.msk.bf16.mxu0 %vm164_vm4, %v6824_v38 }
 0x809   :  { %v8011_v56 = vpop.f32.mrb[56].mxu0 }
 0x80a   :  { %v8013_v58 = vpop.f32.mrb[57].mxu0 }
 0x80b   :  { %v8015_v59 = vpop.f32.mrb[58].mxu0 }
 0x80c   :  { %v8017_v60 = vpop.f32.mrb[59].mxu0 }
 0x80e   :  { %6443 = vmatmul.mubr.msk.bf16.gmra.mrb[164].mxu0 %vm164_vm4, %v6825_v35 }
 0x80f   :  { %6628 = vmatprep.mubr.msk.bf16.mxu0 %vm6927_vm2, %v10687_v1 }
 0x811   :  { %v8019_v33 = vpop.f32.mrb[60].mxu0 }
 0x812   :  { %v8021_v61 = vpop.f32.mrb[61].mxu0 }
 0x813   :  { %v8023_v63 = vpop.f32.mrb[62].mxu0 }
 0x814   :  { %v8025_v5 = vpop.f32.mrb[63].mxu0 }
 0x819   :  { %v8027_v8 = vpop.f32.mrb[64].mxu0 }
 0x81a   :  { %v8029_v10 = vpop.f32.mrb[65].mxu0 }
 0x81b   :  { %v8031_v11 = vpop.f32.mrb[66].mxu0 }
 0x81c   :  { %v8033_v14 = vpop.f32.mrb[67].mxu0 }
 0x821   :  { %v8035_v15 = vpop.f32.mrb[68].mxu0 }
 0x822   :  { %v8037_v18 = vpop.f32.mrb[69].mxu0 }
 0x823   :  { %v8039_v19 = vpop.f32.mrb[70].mxu0 }
 0x824   :  { %v8041_v20 = vpop.f32.mrb[71].mxu0 }
 0x829   :  { %v8043_v21 = vpop.f32.mrb[72].mxu0 }
 0x82a   :  { %v8045_v22 = vpop.f32.mrb[73].mxu0 }
 0x82b   :  { %v8047_v23 = vpop.f32.mrb[74].mxu0 }
 0x82c   :  { %v8049_v24 = vpop.f32.mrb[75].mxu0 }
 0x831   :  { %v8051_v25 = vpop.f32.mrb[76].mxu0 }
 0x832   :  { %v1871_v6 = vpop.xlane.xlu0 %1870  ;;  %v8053_v26 = vpop.f32.mrb[77].mxu0 }
 0x833   :  { %v1872_v0 = vmul.f32 0.088388346, %v1871_v6  ;;  %v8055_v27 = vpop.f32.mrb[78].mxu0 }
 0x834   :  { %v8057_v28 = vpop.f32.mrb[79].mxu0 }
 0x839   :  { %v8059_v29 = vpop.f32.mrb[80].mxu0 }
 0x83a   :  { %v8061_v31 = vpop.f32.mrb[81].mxu0 }
 0x83b   :  { %v8063_v34 = vpop.f32.mrb[82].mxu0 }
 0x83c   :  { %v8065_v37 = vpop.f32.mrb[83].mxu0 }
 0x841   :  { %v8067_v38 = vpop.f32.mrb[84].mxu0 }
 0x842   :  { %v8069_v35 = vpop.f32.mrb[85].mxu0 }
 0x843   :  { %10814 = vst [vmem:[#allocation5_spill] sm:$0xff] %v8069_v35  ;;  %v8071_v6 = vpop.f32.mrb[86].mxu0 }
 0x844   :  { %10815 = vst [vmem:[#allocation6_spill] sm:$0xff] %v8071_v6 }
 0x852   :  { %v1876_v62 = vpop.xlane.xlu1 %1875 }
 0x853   :  { %v1877_v4 = vmul.f32 0.088388346, %v1876_v62  ;;  %v8073_v62 = vpop.f32.mrb[87].mxu0 }
 0x854   :  { %10816 = vst [vmem:[#allocation7_spill] sm:$0xff] %v8073_v62 }
 0x855   :  { %v1878_v9 = vmax.f32 %v1872_v0, %v1877_v4 }
 0x857   :  { %v1879_v7 = vsub.f32 %v1872_v0, %v1878_v9  ;;  %v1882_v13 = vsub.f32 %v1877_v4, %v1878_v9  ;;  %v8075_v0 = vpop.f32.mrb[88].mxu0 }
 0x858   :  { %10817 = vst [vmem:[#allocation8_spill] sm:$0xff] %v8075_v0  ;;  %v8077_v4 = vpop.f32.mrb[89].mxu0 }
 0x859   :  { %v1880_v16 = vmul.f32 1.442695, %v1879_v7  ;;  %v1883_v17 = vmul.f32 1.442695, %v1882_v13  ;;  %10818 = vst [vmem:[#allocation9_spill] sm:$0xff] %v8077_v4  ;;  %v8079_v9 = vpop.f32.mrb[90].mxu0 }
 0x85a   :  { %10819 = vst [vmem:[#allocation10_spill] sm:$0xff] %v8079_v9  ;;  %v8081_v7 = vpop.f32.mrb[91].mxu0 }
 0x85b   :  { %6905 = vpow2.f32 %v1880_v16  ;;  %10820 = vst [vmem:[#allocation11_spill] sm:$0xff] %v8081_v7  ;;  %v8083_v13 = vpop.f32.mrb[92].mxu0 }
 0x85c   :  { %6907 = vpow2.f32 %v1883_v17  ;;  %10821 = vst [vmem:[#allocation12_spill] sm:$0xff] %v8083_v13  ;;  %v8085_v16 = vpop.f32.mrb[93].mxu0 }
 0x85d   :  { %10822 = vst [vmem:[#allocation13_spill] sm:$0xff] %v8085_v16  ;;  %v8087_v17 = vpop.f32.mrb[94].mxu0 }
 0x85e   :  { %v8089_v2 = vpop.f32.mrb[95].mxu0 }
 0x85f   :  { %v8091_v62 = vpop.f32.mrb[96].mxu0 }
 0x860   :  { %10823 = vst [vmem:[#allocation14_spill] sm:$0xff] %v8091_v62  ;;  %v8093_v0 = vpop.f32.mrb[97].mxu0 }
 0x861   :  { %10824 = vst [vmem:[#allocation15_spill] sm:$0xff] %v8093_v0  ;;  %v8097_v7 = vpop.f32.mrb[98].mxu0 }
 0x862   :  { %v8099_v13 = vpop.f32.mrb[99].mxu0 }
 0x863   :  { %v8101_v35 = vpop.f32.mrb[100].mxu0 }
 0x864   :  { %10825 = vst [vmem:[#allocation16_spill] sm:$0xff] %v8101_v35 }
 0x865   :  { %v6906_v30 = vpop.eup %6905 }
 0x866   :  { %v6908_v32 = vpop.eup %6907 }
 0x867   :  { %v1885_v36 = vadd.f32 %v6908_v32, %v6906_v30 }
 0x869   :  { %6909 = vrcp.f32 %v1885_v36 }
 0x873   :  { %v6910_v36 = vpop.eup %6909 }
 0x874   :  { %v1887_v1 = vmul.f32 %v6910_v36, %v6906_v30  ;;  %v1889_v6 = vmul.f32 %v6910_v36, %v6908_v32  ;;  %v6810_v30 = vld [vmem:[%s10663_s14] sm:$0xff]   ;;  %v8106_v32 = vpop.f32.mrb[101].mxu0 }
 0x875   :  { %10826 = vst [vmem:[#allocation17_spill] sm:$0xff] %v8106_v32  ;;  %v8108_v62 = vpop.f32.mrb[102].mxu0 }
 0x876   :  { %v1888_v4 = vmul.f32 %v1887_v1, %v7677_v3  ;;  %v1890_v9 = vmul.f32 %v1889_v6, %v7886_v12  ;;  %10827 = vst [vmem:[#allocation18_spill] sm:$0xff] %v8108_v62  ;;  %v8110_v0 = vpop.f32.mrb[103].mxu0  ;;  %v6811_v3 = vld [vmem:[%s10663_s14 + $0x8] sm:$0xff]   ;;  %v10830_v12 = vmov 0.0  }
 0x877   :  { %10828 = vst [vmem:[#allocation19_spill] sm:$0xff] %v8110_v0  ;;  %v8112_v1 = vpop.f32.mrb[104].mxu0 }
 0x878   :  { %v1891_v16 = vadd.f32 %v1890_v9, %v1888_v4  ;;  %10829 = vst [vmem:[#allocation20_spill] sm:$0xff] %v8112_v1  ;;  %v8119_v6 = vpop.f32.mrb[105].mxu0 }
 0x879   :  { %10831 = vst [vmem:[#allocation21_spill] sm:$0xff] %v8119_v6  ;;  %v8122_v4 = vpop.f32.mrb[106].mxu0 }
 0x87a   :  { %v1892_v36 = vpack.c.bf16 %v1891_v16, %v1891_v16  ;;  %10832 = vst [vmem:[#allocation22_spill] sm:$0xff] %v8122_v4  ;;  %v8124_v9 = vpop.f32.mrb[107].mxu0 }
 0x87b   :  { %10833 = vst [vmem:[#allocation23_spill] sm:$0xff] %v8124_v9  ;;  %v8126_v16 = vpop.f32.mrb[108].mxu0  ;;  %v6815_v9 = vld [vmem:[%s10663_s14 + $0x18] sm:$0xff]  }
 0x87c   :  { %6311 = vmatmul.mubr.bf16.vlgmr.msra.gmra.mrb[44].mxu1 %v1892_v36  ;;  %10834 = vst [vmem:[#allocation24_spill] sm:$0xff] %v8126_v16  ;;  %v8131_v36 = vpop.f32.mrb[109].mxu0 }
 0x87d   :  { %6447 = vmatpush3.bf16.msra.mxu1 %v6810_v30  ;;  %6462 = vmatprep.mubr.msk.bf16.mxu1 %vm6927_vm2, %v10830_v12  ;;  %v6814_v30 = vld [vmem:[%s10663_s14 + $0x10] sm:$0xff]   ;;  %10835 = vst [vmem:[#allocation25_spill] sm:$0xff] %v8131_v36  ;;  %v8134_v1 = vpop.f32.mrb[110].mxu0 }
 0x87e   :  { %6448 = vmatprep.subr.bf16.mxu1 %v10830_v12  ;;  %10836 = vst [vmem:[#allocation26_spill] sm:$0xff] %v8134_v1  ;;  %v8136_v6 = vpop.f32.mrb[111].mxu0  ;;  %v6818_v1 = vld [vmem:[%s10663_s14 + $0x20] sm:$0xff]  }
 0x87f   :  { %10837 = vst [vmem:[#allocation27_spill] sm:$0xff] %v8136_v6 }
 0x881   :  { %6449 = vmatpush3.bf16.msra.mxu1 %v6811_v3  ;;  %v8142_v3 = vpop.f32.mrb[112].mxu0 }
 0x882   :  { %6450 = vmatprep.subr.bf16.mxu1 %v10830_v12  ;;  %10838 = vst [vmem:[#allocation28_spill] sm:$0xff] %v8142_v3  ;;  %v8144_v16 = vpop.f32.mrb[113].mxu0 }
 0x883   :  { %10839 = vst [vmem:[#allocation29_spill] sm:$0xff] %v8144_v16  ;;  %v8146_v4 = vpop.f32.mrb[114].mxu0 }
 0x884   :  { %10840 = vst [vmem:[#allocation30_spill] sm:$0xff] %v8146_v4  ;;  %v8151_v36 = vpop.f32.mrb[115].mxu0 }
 0x885   :  { %6451 = vmatpush3.bf16.msra.mxu1 %v6814_v30  ;;  %10841 = vst [vmem:[#allocation31_spill] sm:$0xff] %v8151_v36  ;;  %v6819_v30 = vld [vmem:[%s10663_s14 + $0x28] sm:$0xff]   ;;  %v8158_v3 = vpop.f32.mrb[116].mxu0  ;;  %v6822_v36 = vld [vmem:[%s10663_s14 + $0x30] sm:$0xff]  }
 0x886   :  { %6452 = vmatprep.subr.bf16.mxu1 %v10830_v12  ;;  %10842 = vst [vmem:[#allocation32_spill] sm:$0xff] %v8158_v3  ;;  %v8160_v16 = vpop.f32.mrb[117].mxu0 }
 0x887   :  { %10843 = vst [vmem:[#allocation33_spill] sm:$0xff] %v8160_v16 }
 0x889   :  { %6453 = vmatpush3.bf16.msra.mxu1 %v6815_v9  ;;  %v8162_v9 = vpop.f32.mrb[118].mxu0 }
 0x88a   :  { %6454 = vmatprep.subr.bf16.mxu1 %v10830_v12  ;;  %10844 = vst [vmem:[#allocation34_spill] sm:$0xff] %v8162_v9  ;;  %v8167_v4 = vpop.f32.mrb[119].mxu0 }
 0x88b   :  { %10845 = vst [vmem:[#allocation35_spill] sm:$0xff] %v8167_v4  ;;  %v8174_v3 = vpop.f32.mrb[120].mxu0  ;;  %v6826_v4 = vld [vmem:[%s10665_s16] sm:$0xff]  }
 0x88c   :  { %10846 = vst [vmem:[#allocation36_spill] sm:$0xff] %v8174_v3  ;;  %v8176_v16 = vpop.f32.mrb[121].mxu0  ;;  %v6829_v3 = vld [vmem:[%s10665_s16 + $0x18] sm:$0xff]  }
 0x88d   :  { %6455 = vmatpush3.bf16.msra.mxu1 %v6818_v1  ;;  %v6823_v1 = vld [vmem:[%s10663_s14 + $0x38] sm:$0xff]   ;;  %10847 = vst [vmem:[#allocation37_spill] sm:$0xff] %v8176_v16  ;;  %v6827_v16 = vld [vmem:[%s10665_s16 + $0x8] sm:$0xff]   ;;  %s10895_s14 = sld [smem:[#allocation114_spill]] }
 0x88e   :  { %6456 = vmatprep.subr.bf16.mxu1 %v10830_v12 }
 0x891   :  { %6457 = vmatpush3.bf16.msra.mxu1 %v6819_v30  ;;  %v8178_v30 = vpop.f32.mrb[122].mxu0 }
 0x892   :  { %6458 = vmatprep.subr.bf16.mxu1 %v10830_v12  ;;  %10848 = vst [vmem:[#allocation38_spill] sm:$0xff] %v8178_v30  ;;  %v8183_v9 = vpop.f32.mrb[123].mxu0 }
 0x893   :  { %10849 = vst [vmem:[#allocation39_spill] sm:$0xff] %v8183_v9 }
 0x895   :  { %6459 = vmatpush3.bf16.msra.mxu1 %v6822_v36  ;;  %v3207_v36 = vpack.c.bf16 %v7254_v54, %v7254_v54  ;;  %v6828_v54 = vld [vmem:[%s10665_s16 + $0x10] sm:$0xff]  }
 0x896   :  { %6460 = vmatprep.subr.bf16.mxu1 %v10830_v12 }
 0x899   :  { %6461 = vmatpush3.bf16.msra.mxu1 %v6823_v1  ;;  %v8194_v1 = vpop.f32.mrb[124].mxu0 }
 0x89a   :  { %6466 = vmatprep.subr.bf16.mxu1 %v10830_v12  ;;  %10850 = vst [vmem:[#allocation40_spill] sm:$0xff] %v8194_v1  ;;  %v8196_v30 = vpop.f32.mrb[125].mxu0 }
 0x89b   :  { %10851 = vst [vmem:[#allocation41_spill] sm:$0xff] %v8196_v30  ;;  %v8198_v9 = vpop.f32.mrb[126].mxu0 }
 0x89c   :  { %6463 = vmatmul.mubr.bf16.vlgmr.msra.gmra.mrb[48].mxu1 %v3207_v36  ;;  %10852 = vst [vmem:[#allocation42_spill] sm:$0xff] %v8198_v9 }
 0x89d   :  { %6467 = vmatpush3.bf16.msra.mxu1 %v6826_v4  ;;  %6482 = vmatprep.mubr.msk.bf16.mxu1 %vm6927_vm2, %v10830_v12  ;;  %v8203_v4 = vpop.f32.mrb[127].mxu0 }
 0x89e   :  { %6468 = vmatprep.subr.bf16.mxu1 %v10830_v12  ;;  %10853 = vst [vmem:[#allocation43_spill] sm:$0xff] %v8203_v4  ;;  %v8210_v1 = vpop.f32.mrb[128].mxu0  ;;  %v6831_v4 = vld [vmem:[%s10665_s16 + $0x28] sm:$0xff]  }
 0x89f   :  { %10854 = vst [vmem:[#allocation44_spill] sm:$0xff] %v8210_v1  ;;  %v8212_v30 = vpop.f32.mrb[129].mxu0 }
 0x8a0   :  { %10855 = vst [vmem:[#allocation45_spill] sm:$0xff] %v8212_v30  ;;  %v8217_v9 = vpop.f32.mrb[130].mxu0 }
 0x8a1   :  { %6469 = vmatpush3.bf16.msra.mxu1 %v6827_v16  ;;  %v6830_v16 = vld [vmem:[%s10665_s16 + $0x20] sm:$0xff]   ;;  %10856 = vst [vmem:[#allocation46_spill] sm:$0xff] %v8217_v9  ;;  %v6833_v9 = vld [vmem:[%s10665_s16 + $0x38] sm:$0xff]  }
 0x8a2   :  { %6470 = vmatprep.subr.bf16.mxu1 %v10830_v12 }
 0x8a5   :  { %6471 = vmatpush3.bf16.msra.mxu1 %v6828_v54  ;;  %v8220_v54 = vpop.f32.mrb[131].mxu0 }
 0x8a6   :  { %6472 = vmatprep.subr.bf16.mxu1 %v10830_v12  ;;  %10857 = vst [vmem:[#allocation47_spill] sm:$0xff] %v8220_v54 }
 0x8a9   :  { %6473 = vmatpush3.bf16.msra.mxu1 %v6829_v3  ;;  %v6832_v3 = vld [vmem:[%s10665_s16 + $0x30] sm:$0xff]  }
 0x8aa   :  { %6474 = vmatprep.subr.bf16.mxu1 %v10830_v12 }
 0x8ad   :  { %6475 = vmatpush3.bf16.msra.mxu1 %v6830_v16  ;;  %v6834_v16 = vld [vmem:[%s10671_s22] sm:$0xff]  }
 0x8ae   :  { %6476 = vmatprep.subr.bf16.mxu1 %v10830_v12 }
 0x8b1   :  { %6477 = vmatpush3.bf16.msra.mxu1 %v6831_v4  ;;  %v6835_v4 = vld [vmem:[%s10671_s22 + $0x8] sm:$0xff]  }
 0x8b2   :  { %6478 = vmatprep.subr.bf16.mxu1 %v10830_v12 }
 0x8b5   :  { %6479 = vmatpush3.bf16.msra.mxu1 %v6832_v3  ;;  %v6838_v3 = vld [vmem:[%s10671_s22 + $0x20] sm:$0xff]  }
 0x8b6   :  { %6480 = vmatprep.subr.bf16.mxu1 %v10830_v12 }
 0x8b9   :  { %6481 = vmatpush3.bf16.msra.mxu1 %v6833_v9  ;;  %v6836_v9 = vld [vmem:[%s10671_s22 + $0x10] sm:$0xff]  }
 0x8ba   :  { %6486 = vmatprep.subr.bf16.mxu1 %v10830_v12 }
 0x8bc   :  { %6483 = vmatmul.mubr.bf16.vlgmr.msra.gmra.mrb[52].mxu1 %v3207_v36  ;;  %v6837_v36 = vld [vmem:[%s10671_s22 + $0x18] sm:$0xff]  }
 0x8bd   :  { %6487 = vmatpush3.bf16.msra.mxu1 %v6834_v16  ;;  %6502 = vmatprep.mubr.msk.bf16.mxu1 %vm6927_vm2, %v10830_v12  ;;  %v6839_v16 = vld [vmem:[%s10671_s22 + $0x28] sm:$0xff]  }
 0x8be   :  { %6488 = vmatprep.subr.bf16.mxu1 %v10830_v12 }
 0x8c1   :  { %6489 = vmatpush3.bf16.msra.mxu1 %v6835_v4  ;;  %v8260_v4 = vpop.f32.mrb[132].mxu0 }
 0x8c2   :  { %6490 = vmatprep.subr.bf16.mxu1 %v10830_v12  ;;  %10858 = vst [vmem:[#allocation48_spill] sm:$0xff] %v8260_v4  ;;  %v6841_v4 = vld [vmem:[%s10671_s22 + $0x38] sm:$0xff]  }
 0x8c5   :  { %6491 = vmatpush3.bf16.msra.mxu1 %v6836_v9  ;;  %v6840_v9 = vld [vmem:[%s10671_s22 + $0x30] sm:$0xff]  }
 0x8c6   :  { %6492 = vmatprep.subr.bf16.mxu1 %v10830_v12 }
 0x8c9   :  { %6493 = vmatpush3.bf16.msra.mxu1 %v6837_v36  ;;  %v8265_v36 = vpop.f32.mrb[133].mxu0 }
 0x8ca   :  { %6494 = vmatprep.subr.bf16.mxu1 %v10830_v12  ;;  %10859 = vst [vmem:[#allocation49_spill] sm:$0xff] %v8265_v36  ;;  %v8268_v54 = vpop.f32.mrb[134].mxu0 }
 0x8cb   :  { %10860 = vst [vmem:[#allocation50_spill] sm:$0xff] %v8268_v54 }
 0x8cd   :  { %6495 = vmatpush3.bf16.msra.mxu1 %v6838_v3  ;;  %v8270_v3 = vpop.f32.mrb[135].mxu0 }
 0x8ce   :  { %6496 = vmatprep.subr.bf16.mxu1 %v10830_v12  ;;  %10861 = vst [vmem:[#allocation51_spill] sm:$0xff] %v8270_v3  ;;  %v8272_v30 = vpop.f32.mrb[136].mxu0 }
 0x8cf   :  { %10862 = vst [vmem:[#allocation52_spill] sm:$0xff] %v8272_v30 }
 0x8d1   :  { %6497 = vmatpush3.bf16.msra.mxu1 %v6839_v16  ;;  %v8277_v16 = vpop.f32.mrb[137].mxu0 }
 0x8d2   :  { %6498 = vmatprep.subr.bf16.mxu1 %v10830_v12  ;;  %10863 = vst [vmem:[#allocation53_spill] sm:$0xff] %v8277_v16  ;;  %v8280_v1 = vpop.f32.mrb[138].mxu0 }
 0x8d3   :  { %10864 = vst [vmem:[#allocation54_spill] sm:$0xff] %v8280_v1  ;;  %v8282_v36 = vpop.f32.mrb[139].mxu0 }
 0x8d4   :  { %10865 = vst [vmem:[#allocation55_spill] sm:$0xff] %v8282_v36  ;;  %v8284_v6 = vpop.f32.mrb[140].mxu0 }
 0x8d5   :  { %6499 = vmatpush3.bf16.msra.mxu1 %v6840_v9  ;;  %10866 = vst [vmem:[#allocation56_spill] sm:$0xff] %v8284_v6  ;;  %v8286_v54 = vpop.f32.mrb[141].mxu0 }
 0x8d6   :  { %6500 = vmatprep.subr.bf16.mxu1 %v10830_v12  ;;  %10867 = vst [vmem:[#allocation57_spill] sm:$0xff] %v8286_v54  ;;  %v8289_v9 = vpop.f32.mrb[142].mxu0 }
 0x8d7   :  { %10868 = vst [vmem:[#allocation58_spill] sm:$0xff] %v8289_v9  ;;  %v8291_v30 = vpop.f32.mrb[143].mxu0 }
 0x8d8   :  { %10869 = vst [vmem:[#allocation59_spill] sm:$0xff] %v8291_v30  ;;  %v8293_v3 = vpop.f32.mrb[144].mxu0 }
 0x8d9   :  { %6501 = vmatpush3.bf16.msra.mxu1 %v6841_v4  ;;  %10870 = vst [vmem:[#allocation60_spill] sm:$0xff] %v8293_v3  ;;  %v8295_v16 = vpop.f32.mrb[145].mxu0 }
 0x8da   :  { %6506 = vmatprep.subr.bf16.mxu1 %v10830_v12  ;;  %10871 = vst [vmem:[#allocation61_spill] sm:$0xff] %v8295_v16  ;;  %v8297_v0 = vpop.f32.mrb[146].mxu0 }
 0x8db   :  { %10872 = vst [vmem:[#allocation62_spill] sm:$0xff] %v8297_v0  ;;  %v8299_v1 = vpop.f32.mrb[147].mxu0 }
 0x8dc   :  { %10873 = vst [vmem:[#allocation63_spill] sm:$0xff] %v8299_v1  ;;  %v8301_v36 = vpop.f32.mrb[148].mxu0 }
 0x8dd   :  { %10874 = vst [vmem:[#allocation64_spill] sm:$0xff] %v8301_v36  ;;  %v8303_v6 = vpop.f32.mrb[149].mxu0 }
 0x8de   :  { %10875 = vst [vmem:[#allocation65_spill] sm:$0xff] %v8303_v6  ;;  %v8305_v4 = vpop.f32.mrb[150].mxu0 }
 0x8df   :  { %10876 = vst [vmem:[#allocation66_spill] sm:$0xff] %v8305_v4  ;;  %v8307_v54 = vpop.f32.mrb[151].mxu0 }
 0x8e0   :  { %10877 = vst [vmem:[#allocation67_spill] sm:$0xff] %v8307_v54  ;;  %v8309_v62 = vpop.f32.mrb[152].mxu0 }
 0x8e1   :  { %10878 = vst [vmem:[#allocation68_spill] sm:$0xff] %v8309_v62  ;;  %v8311_v9 = vpop.f32.mrb[153].mxu0 }
 0x8e2   :  { %10879 = vst [vmem:[#allocation69_spill] sm:$0xff] %v8311_v9  ;;  %v8313_v30 = vpop.f32.mrb[154].mxu0 }
 0x8e3   :  { %10880 = vst [vmem:[#allocation70_spill] sm:$0xff] %v8313_v30  ;;  %v8315_v3 = vpop.f32.mrb[155].mxu0 }
 0x8e4   :  { %10881 = vst [vmem:[#allocation71_spill] sm:$0xff] %v8315_v3  ;;  %v8317_v16 = vpop.f32.mrb[156].mxu0 }
 0x8e5   :  { %10882 = vst [vmem:[#allocation72_spill] sm:$0xff] %v8317_v16  ;;  %v8319_v0 = vpop.f32.mrb[157].mxu0 }
 0x8e6   :  { %10883 = vst [vmem:[#allocation73_spill] sm:$0xff] %v8319_v0  ;;  %v8321_v1 = vpop.f32.mrb[158].mxu0 }
 0x8e7   :  { %10884 = vst [vmem:[#allocation74_spill] sm:$0xff] %v8321_v1  ;;  %v8323_v36 = vpop.f32.mrb[159].mxu0  ;;  %v10894_v1 = vmov 65535  }
 0x8e8   :  { %10885 = vst [vmem:[#allocation75_spill] sm:$0xff] %v8323_v36  ;;  %v8325_v6 = vpop.f32.mrb[160].mxu0  ;;  %v4247_v36 = vsel %vm4245_vm5, 4294967295, %v10894_v1 }
 0x8e9   :  { %10886 = vst [vmem:[#allocation76_spill] sm:$0xff] %v8325_v6  ;;  %v8327_v4 = vpop.f32.mrb[161].mxu0  ;;  %v4248_v6 = vsel %vm4246_vm6, %v4247_v36, 0 }
 0x8ea   :  { %10887 = vst [vmem:[#allocation77_spill] sm:$0xff] %v8327_v4  ;;  %v8329_v54 = vpop.f32.mrb[162].mxu0  ;;  %v6842_v4 = vld [vmem:[%s10670_s21] sm:$0x1f]  }
 0x8eb   :  { %10888 = vst [vmem:[#allocation78_spill] sm:$0xff] %v8329_v54  ;;  %v8331_v62 = vpop.f32.mrb[163].mxu0 }
 0x8ec   :  { %10889 = vst [vmem:[#allocation79_spill] sm:$0xff] %v8331_v62  ;;  %v8333_v9 = vpop.f32.mrb[164].mxu0 }
 0x8ed   :  { %10890 = vst [vmem:[#allocation80_spill] sm:$0xff] %v8333_v9  ;;  %v8335_v30 = vpop.f32.mrb[165].mxu0  ;;  %v8348_v9 = vld [vmem:[%s10662_s13] ss:$0 sm:$0xff] }
 0x8ee   :  { %10891 = vst [vmem:[#allocation81_spill] sm:$0xff] %v8335_v30  ;;  %v8337_v3 = vpop.f32.mrb[166].mxu0  ;;  %v8353_v1 = vadd.f32 %v7979_v39, %v8348_v9  ;;  %v8357_v36 = vadd.f32 %v8348_v9, %v7981_v40  ;;  %v8361_v35 = vadd.f32 %v7983_v41, %v8348_v9  ;;  %v8373_v39 = vadd.f32 %v8348_v9, %v7989_v44  ;;  %v4127_v44 = vld [vmem:[%s10895_s14] sm:$0x3] }
 0x8ef   :  { %10892 = vst [vmem:[#allocation82_spill] sm:$0xff] %v8337_v3  ;;  %v8339_v16 = vpop.f32.mrb[167].mxu0  ;;  %v8377_v40 = vadd.f32 %v7991_v45, %v8348_v9  ;;  %v8381_v41 = vadd.f32 %v8348_v9, %v7993_v46  ;;  %v8398_v45 = vadd.f32 %v7999_v49, %v8348_v9  ;;  %v8402_v46 = vadd.f32 %v8348_v9, %v8001_v50 }
 0x8f0   :  { %10893 = vst [vmem:[#allocation83_spill] sm:$0xff] %v8339_v16  ;;  %v4250_v16 = vand.u32 %v6842_v4, %v4248_v6  ;;  %v8419_v49 = vadd.f32 %v8348_v9, %v8009_v55  ;;  %v8423_v50 = vadd.f32 %v8011_v56, %v8348_v9  ;;  %v8439_v55 = vadd.f32 %v8019_v33, %v8348_v9  ;;  %v10896_v6 = vld [vmem:[#allocation5_spill] sm:$0xff]  ;;  %v10904_v4 = vld [vmem:[#allocation10_spill] sm:$0xff] }
 0x8f1   :  { %v8443_v56 = vadd.f32 %v8348_v9, %v8021_v61  ;;  %v8459_v33 = vadd.f32 %v8348_v9, %v8029_v10  ;;  %v8463_v61 = vadd.f32 %v8031_v11, %v8348_v9  ;;  %v8479_v10 = vadd.f32 %v8039_v19, %v8348_v9 }
 0x8f2   :  { %v8483_v11 = vadd.f32 %v8348_v9, %v8041_v20  ;;  %v8499_v19 = vadd.f32 %v8348_v9, %v8049_v24  ;;  %v8503_v20 = vadd.f32 %v8051_v25, %v8348_v9  ;;  %v8521_v24 = vadd.f32 %v8059_v29, %v8348_v9 }
 0x8f3   :  { %v8525_v25 = vadd.f32 %v8348_v9, %v8061_v31  ;;  %v8541_v29 = vadd.f32 %v8348_v9, %v10896_v6 }
 0x94f   :  { %v1992_v54 = vpop.f32.mrb[44].mxu1 }
 0x950   :  { %v1998_v30 = vadd.f32 %v1992_v54, %v7646_v57  ;;  %v6312_v3 = vpop.f32.mrb[45].mxu1  ;;  %v8365_v57 = vadd.f32 %v8348_v9, %v7985_v42  ;;  %v8385_v42 = vadd.f32 %v7995_v47, %v8348_v9  ;;  %v8406_v47 = vadd.f32 %v8003_v51, %v8348_v9  ;;  %v10899_v54 = vld [vmem:[#allocation7_spill] sm:$0xff] }
 0x951   :  { %v1995_v62 = vpop.f32.mrb[46].mxu1  ;;  %v8427_v51 = vadd.f32 %v8348_v9, %v8013_v58  ;;  %v8447_v58 = vadd.f32 %v8023_v63, %v8348_v9  ;;  %v8467_v63 = vadd.f32 %v8348_v9, %v8033_v14  ;;  %v8487_v14 = vadd.f32 %v8043_v21, %v8348_v9  ;;  %v10900_v3 = vld [vmem:[#allocation8_spill] sm:$0xff] }
 0x952   :  { %v4131_v0 = vpack.c.bf16 %v1998_v30, %v1998_v30  ;;  %v6313_v32 = vpop.f32.mrb[47].mxu1  ;;  %v8369_v62 = vadd.f32 %v7987_v43, %v8348_v9  ;;  %v8389_v43 = vadd.f32 %v8348_v9, %v7997_v48  ;;  %v8410_v48 = vadd.f32 %v8348_v9, %v8005_v52  ;;  %v10897_v30 = vld [vmem:[#allocation6_spill] sm:$0xff] }
 0x953   :  { %v8431_v52 = vadd.f32 %v8015_v59, %v8348_v9  ;;  %v4128_v32 = vpack.c.bf16 %v4127_v44, %v4127_v44  ;;  %v8451_v59 = vadd.f32 %v8348_v9, %v8025_v5  ;;  %v8471_v5 = vadd.f32 %v8035_v15, %v8348_v9 }
 0x954   :  { %6503 = vmatmul.mubr.bf16.vlgmr.msra.gmra.mrb[56].mxu1 %v4131_v0  ;;  %v8415_v0 = vadd.f32 %v8007_v53, %v8348_v9  ;;  %v8435_v53 = vadd.f32 %v8348_v9, %v8017_v60  ;;  %v8455_v60 = vadd.f32 %v8027_v8, %v8348_v9  ;;  %v8475_v8 = vadd.f32 %v8348_v9, %v8037_v18 }
 0x955   :  { %6507 = vmatpush3.bf16.msra.mxu1 %v4250_v16  ;;  %6508 = vmatprep.mubr.msk.bf16.mxu1 %vm6927_vm2, %v10830_v12  ;;  %v8491_v15 = vadd.f32 %v8348_v9, %v8045_v22  ;;  %v8495_v18 = vadd.f32 %v8047_v23, %v8348_v9  ;;  %v8507_v21 = vadd.f32 %v8348_v9, %v8053_v26  ;;  %v10902_v16 = vld [vmem:[#allocation9_spill] sm:$0xff] }
 0x956   :  { %6512 = vmatprep.subr.bf16.mxu1 %v10830_v12  ;;  %v8511_v22 = vadd.f32 %v8055_v27, %v8348_v9  ;;  %v8515_v23 = vadd.f32 %v8348_v9, %v8057_v28  ;;  %v8529_v26 = vadd.f32 %v8063_v34, %v8348_v9  ;;  %v8533_v27 = vadd.f32 %v8348_v9, %v8065_v37 }
 0x957   :  { %v8537_v28 = vadd.f32 %v8067_v38, %v8348_v9  ;;  %v8545_v31 = vadd.f32 %v10897_v30, %v8348_v9  ;;  %v8549_v34 = vadd.f32 %v8348_v9, %v10899_v54  ;;  %v8553_v37 = vadd.f32 %v10900_v3, %v8348_v9  ;;  %v10908_v30 = vld [vmem:[#allocation12_spill] sm:$0xff] }
 0x958   :  { %v8557_v38 = vadd.f32 %v8348_v9, %v10902_v16  ;;  %v8561_v44 = vadd.f32 %v10904_v4, %v8348_v9  ;;  %v8569_v54 = vadd.f32 %v10908_v30, %v8348_v9  ;;  %v8577_v16 = vadd.f32 %v8087_v17, %v8348_v9 }
 0x959   :  { %10898 = vst [vmem:[#allocation5_spill] sm:$0xff] %v8545_v31  ;;  %10901 = vst [vmem:[#allocation6_spill] sm:$0xff] %v8553_v37  ;;  %v10910_v31 = vld [vmem:[#allocation13_spill] sm:$0xff]  ;;  %v8581_v4 = vadd.f32 %v8348_v9, %v8089_v2  ;;  %v10916_v37 = vld [vmem:[#allocation15_spill] sm:$0xff]  ;;  %v8597_v17 = vadd.f32 %v8348_v9, %v8099_v13 }
 0x95a   :  { %10903 = vst [vmem:[#allocation7_spill] sm:$0xff] %v8557_v38  ;;  %10905 = vst [vmem:[#allocation8_spill] sm:$0xff] %v8561_v44  ;;  %v8573_v3 = vadd.f32 %v8348_v9, %v10910_v31  ;;  %v10914_v44 = vld [vmem:[#allocation14_spill] sm:$0xff]  ;;  %v8589_v30 = vadd.f32 %v8348_v9, %v10916_v37  ;;  %v8593_v31 = vadd.f32 %v8097_v7, %v8348_v9  ;;  %v11027_v38 = vld [vmem:[#allocation69_spill] sm:$0xff] }
 0x95b   :  { %10909 = vst [vmem:[#allocation10_spill] sm:$0xff] %v8569_v54  ;;  %10912 = vst [vmem:[#allocation12_spill] sm:$0xff] %v8577_v16  ;;  %v10920_v16 = vld [vmem:[#allocation16_spill] sm:$0xff]  ;;  %v10922_v54 = vld [vmem:[#allocation17_spill] sm:$0xff] }
 0x95c   :  { %6509 = vmatmul.mubr.msk.bf16.vlgmr.msra.gmra.mrb[60].mxu1 %vm4241_vm7, %v4128_v32  ;;  %v10906_v32 = vld [vmem:[#allocation11_spill] sm:$0xff]  ;;  %10913 = vst [vmem:[#allocation13_spill] sm:$0xff] %v8581_v4  ;;  %10917 = vst [vmem:[#allocation15_spill] sm:$0xff] %v8589_v30  ;;  %v8601_v2 = vadd.f32 %v10920_v16, %v8348_v9 }
 0x95d   :  { %6516 = vmatprep.mubr.msk.bf16.mxu1 %vm6927_vm2, %v10830_v12  ;;  %v8565_v6 = vadd.f32 %v8348_v9, %v10906_v32  ;;  %10911 = vst [vmem:[#allocation11_spill] sm:$0xff] %v8573_v3  ;;  %v8585_v32 = vadd.f32 %v10914_v44, %v8348_v9  ;;  %10918 = vst [vmem:[#allocation84_spill] sm:$0xff] %v8593_v31  ;;  %v8605_v44 = vadd.f32 %v8348_v9, %v10922_v54  ;;  %v10926_v30 = vld [vmem:[#allocation19_spill] sm:$0xff]  ;;  %v10928_v31 = vld [vmem:[#allocation20_spill] sm:$0xff] }
 0x95e   :  { %10919 = vst [vmem:[#allocation85_spill] sm:$0xff] %v8597_v17  ;;  %10921 = vst [vmem:[#allocation16_spill] sm:$0xff] %v8601_v2  ;;  %v8613_v7 = vadd.f32 %v8348_v9, %v10926_v30  ;;  %v8617_v13 = vadd.f32 %v10928_v31, %v8348_v9  ;;  %v10930_v17 = vld [vmem:[#allocation21_spill] sm:$0xff]  ;;  %v10932_v2 = vld [vmem:[#allocation22_spill] sm:$0xff] }
 0x95f   :  { %10907 = vst [vmem:[#allocation9_spill] sm:$0xff] %v8565_v6  ;;  %10915 = vst [vmem:[#allocation14_spill] sm:$0xff] %v8585_v32  ;;  %v10924_v32 = vld [vmem:[#allocation18_spill] sm:$0xff]  ;;  %v8621_v16 = vadd.f32 %v8348_v9, %v10930_v17  ;;  %v8625_v54 = vadd.f32 %v10932_v2, %v8348_v9  ;;  %v10966_v4 = vld [vmem:[#allocation39_spill] sm:$0xff] }
 0x960   :  { %10923 = vst [vmem:[#allocation17_spill] sm:$0xff] %v8605_v44  ;;  %v8609_v37 = vadd.f32 %v10924_v32, %v8348_v9  ;;  %10927 = vst [vmem:[#allocation19_spill] sm:$0xff] %v8613_v7  ;;  %v10934_v44 = vld [vmem:[#allocation23_spill] sm:$0xff]  ;;  %v10938_v7 = vld [vmem:[#allocation25_spill] sm:$0xff] }
 0x961   :  { %10929 = vst [vmem:[#allocation20_spill] sm:$0xff] %v8617_v13  ;;  %10931 = vst [vmem:[#allocation21_spill] sm:$0xff] %v8621_v16  ;;  %v8629_v32 = vadd.f32 %v8348_v9, %v10934_v44  ;;  %v8637_v31 = vadd.f32 %v8348_v9, %v10938_v7  ;;  %v10940_v13 = vld [vmem:[#allocation26_spill] sm:$0xff]  ;;  %v10942_v16 = vld [vmem:[#allocation27_spill] sm:$0xff] }
 0x962   :  { %10925 = vst [vmem:[#allocation18_spill] sm:$0xff] %v8609_v37  ;;  %10933 = vst [vmem:[#allocation22_spill] sm:$0xff] %v8625_v54  ;;  %v10936_v37 = vld [vmem:[#allocation24_spill] sm:$0xff]  ;;  %v8641_v17 = vadd.f32 %v10940_v13, %v8348_v9  ;;  %v8645_v2 = vadd.f32 %v8348_v9, %v10942_v16  ;;  %v11015_v3 = vld [vmem:[#allocation63_spill] sm:$0xff] }
 0x963   :  { %10935 = vst [vmem:[#allocation23_spill] sm:$0xff] %v8629_v32  ;;  %v8633_v30 = vadd.f32 %v10936_v37, %v8348_v9  ;;  %10939 = vst [vmem:[#allocation25_spill] sm:$0xff] %v8637_v31  ;;  %v10944_v54 = vld [vmem:[#allocation28_spill] sm:$0xff]  ;;  %v10946_v32 = vld [vmem:[#allocation29_spill] sm:$0xff] }
 0x964   :  { %10941 = vst [vmem:[#allocation26_spill] sm:$0xff] %v8641_v17  ;;  %10943 = vst [vmem:[#allocation27_spill] sm:$0xff] %v8645_v2  ;;  %v8649_v44 = vadd.f32 %v10944_v54, %v8348_v9  ;;  %v8653_v37 = vadd.f32 %v8348_v9, %v10946_v32  ;;  %v10950_v31 = vld [vmem:[#allocation31_spill] sm:$0xff]  ;;  %v10952_v17 = vld [vmem:[#allocation32_spill] sm:$0xff] }
 0x965   :  { %10937 = vst [vmem:[#allocation24_spill] sm:$0xff] %v8633_v30  ;;  %v10948_v30 = vld [vmem:[#allocation30_spill] sm:$0xff]  ;;  %v8661_v13 = vadd.f32 %v8348_v9, %v10950_v31  ;;  %v8665_v16 = vadd.f32 %v10952_v17, %v8348_v9  ;;  %v10954_v2 = vld [vmem:[#allocation33_spill] sm:$0xff]  ;;  %v11023_v6 = vld [vmem:[#allocation67_spill] sm:$0xff] }
 0x966   :  { %10945 = vst [vmem:[#allocation28_spill] sm:$0xff] %v8649_v44  ;;  %10947 = vst [vmem:[#allocation29_spill] sm:$0xff] %v8653_v37  ;;  %v8657_v7 = vadd.f32 %v10948_v30, %v8348_v9  ;;  %v8669_v54 = vadd.f32 %v8348_v9, %v10954_v2  ;;  %v10956_v44 = vld [vmem:[#allocation34_spill] sm:$0xff]  ;;  %v10958_v37 = vld [vmem:[#allocation35_spill] sm:$0xff] }
 0x967   :  { %10951 = vst [vmem:[#allocation31_spill] sm:$0xff] %v8661_v13  ;;  %10953 = vst [vmem:[#allocation32_spill] sm:$0xff] %v8665_v16  ;;  %v8673_v32 = vadd.f32 %v10956_v44, %v8348_v9  ;;  %v8677_v30 = vadd.f32 %v8348_v9, %v10958_v37  ;;  %v10962_v13 = vld [vmem:[#allocation37_spill] sm:$0xff]  ;;  %v10964_v16 = vld [vmem:[#allocation38_spill] sm:$0xff]  ;;  %v8693_v44 = vadd.f32 %v8348_v9, %v10966_v4 }
 0x968   :  { %10949 = vst [vmem:[#allocation30_spill] sm:$0xff] %v8657_v7  ;;  %10955 = vst [vmem:[#allocation33_spill] sm:$0xff] %v8669_v54  ;;  %v10960_v7 = vld [vmem:[#allocation36_spill] sm:$0xff]  ;;  %v8685_v17 = vadd.f32 %v8348_v9, %v10962_v13  ;;  %v8689_v2 = vadd.f32 %v10964_v16, %v8348_v9  ;;  %v3430_v54 = vlaneseq  ;;  %v10972_v13 = vld [vmem:[#allocation42_spill] sm:$0xff] }
 0x969   :  { %10957 = vst [vmem:[#allocation34_spill] sm:$0xff] %v8673_v32  ;;  %10959 = vst [vmem:[#allocation35_spill] sm:$0xff] %v8677_v30  ;;  %v8681_v31 = vadd.f32 %v10960_v7, %v8348_v9  ;;  %v10968_v37 = vld [vmem:[#allocation40_spill] sm:$0xff]  ;;  %v10970_v30 = vld [vmem:[#allocation41_spill] sm:$0xff] }
 0x96a   :  { %10963 = vst [vmem:[#allocation37_spill] sm:$0xff] %v8685_v17  ;;  %10965 = vst [vmem:[#allocation38_spill] sm:$0xff] %v8689_v2  ;;  %v8697_v32 = vadd.f32 %v10968_v37, %v8348_v9  ;;  %v8701_v7 = vadd.f32 %v8348_v9, %v10970_v30  ;;  %v10974_v17 = vld [vmem:[#allocation43_spill] sm:$0xff]  ;;  %v10976_v2 = vld [vmem:[#allocation44_spill] sm:$0xff] }
 0x96b   :  { %10961 = vst [vmem:[#allocation36_spill] sm:$0xff] %v8681_v31  ;;  %10967 = vst [vmem:[#allocation39_spill] sm:$0xff] %v8693_v44  ;;  %v8705_v31 = vadd.f32 %v10972_v13, %v8348_v9  ;;  %v8709_v16 = vadd.f32 %v8348_v9, %v10974_v17  ;;  %v8713_v4 = vadd.f32 %v10976_v2, %v8348_v9  ;;  %v10978_v44 = vld [vmem:[#allocation45_spill] sm:$0xff] }
 0x96c   :  { %10969 = vst [vmem:[#allocation40_spill] sm:$0xff] %v8697_v32  ;;  %10971 = vst [vmem:[#allocation41_spill] sm:$0xff] %v8701_v7  ;;  %v8717_v37 = vadd.f32 %v8348_v9, %v10978_v44  ;;  %v10980_v32 = vld [vmem:[#allocation46_spill] sm:$0xff]  ;;  %v10982_v7 = vld [vmem:[#allocation47_spill] sm:$0xff] }
 0x96d   :  { %10973 = vst [vmem:[#allocation42_spill] sm:$0xff] %v8705_v31  ;;  %10975 = vst [vmem:[#allocation43_spill] sm:$0xff] %v8709_v16  ;;  %v8721_v30 = vadd.f32 %v10980_v32, %v8348_v9  ;;  %v8725_v13 = vadd.f32 %v8348_v9, %v10982_v7  ;;  %v10984_v31 = vld [vmem:[#allocation48_spill] sm:$0xff]  ;;  %v10986_v16 = vld [vmem:[#allocation49_spill] sm:$0xff] }
 0x96e   :  { %10977 = vst [vmem:[#allocation44_spill] sm:$0xff] %v8713_v4  ;;  %10979 = vst [vmem:[#allocation45_spill] sm:$0xff] %v8717_v37  ;;  %v8729_v17 = vadd.f32 %v10984_v31, %v8348_v9  ;;  %v8733_v2 = vadd.f32 %v8348_v9, %v10986_v16  ;;  %v10988_v4 = vld [vmem:[#allocation50_spill] sm:$0xff]  ;;  %v10990_v37 = vld [vmem:[#allocation51_spill] sm:$0xff] }
 0x96f   :  { %10981 = vst [vmem:[#allocation46_spill] sm:$0xff] %v8721_v30  ;;  %10983 = vst [vmem:[#allocation47_spill] sm:$0xff] %v8725_v13  ;;  %v8737_v44 = vadd.f32 %v10988_v4, %v8348_v9  ;;  %v8741_v32 = vadd.f32 %v8348_v9, %v10990_v37  ;;  %v10992_v30 = vld [vmem:[#allocation52_spill] sm:$0xff]  ;;  %v10994_v13 = vld [vmem:[#allocation53_spill] sm:$0xff] }
 0x970   :  { %10985 = vst [vmem:[#allocation48_spill] sm:$0xff] %v8729_v17  ;;  %10987 = vst [vmem:[#allocation49_spill] sm:$0xff] %v8733_v2  ;;  %v8745_v7 = vadd.f32 %v10992_v30, %v8348_v9  ;;  %v8749_v31 = vadd.f32 %v8348_v9, %v10994_v13  ;;  %v8751_v17 = vshrl.u32 %v3430_v54, 7  ;;  %v10997_v16 = vld [vmem:[#allocation54_spill] sm:$0xff]  ;;  %v10999_v4 = vld [vmem:[#allocation55_spill] sm:$0xff] }
 0x971   :  { %10989 = vst [vmem:[#allocation50_spill] sm:$0xff] %v8737_v44  ;;  %10991 = vst [vmem:[#allocation51_spill] sm:$0xff] %v8741_v32  ;;  %v8755_v2 = vadd.f32 %v10997_v16, %v8348_v9  ;;  %v8759_v44 = vadd.f32 %v8348_v9, %v10999_v4  ;;  %v11001_v37 = vld [vmem:[#allocation56_spill] sm:$0xff]  ;;  %v11003_v30 = vld [vmem:[#allocation57_spill] sm:$0xff] }
 0x972   :  { %10993 = vst [vmem:[#allocation52_spill] sm:$0xff] %v8745_v7  ;;  %10995 = vst [vmem:[#allocation53_spill] sm:$0xff] %v8749_v31  ;;  %v8763_v32 = vadd.f32 %v11001_v37, %v8348_v9  ;;  %v8767_v7 = vadd.f32 %v8348_v9, %v11003_v30  ;;  %v5444_v54 = vld [vmem:[%s10664_s15] ss:$0 sm:$0xff]  ;;  %v11005_v13 = vld [vmem:[#allocation58_spill] sm:$0xff] }
 0x973   :  { %10996 = vst [vmem:[#allocation86_spill] sm:$0xff] %v8751_v17  ;;  %10998 = vst [vmem:[#allocation54_spill] sm:$0xff] %v8755_v2  ;;  %v8774_v16 = vadd.f32 %v11005_v13, %v8348_v9  ;;  %v11007_v2 = vld [vmem:[#allocation59_spill] sm:$0xff]  ;;  %v8794_v13 = vadd.f32 %v8348_v9, %v11015_v3 }
 0x974   :  { %11000 = vst [vmem:[#allocation55_spill] sm:$0xff] %v8759_v44  ;;  %11002 = vst [vmem:[#allocation56_spill] sm:$0xff] %v8763_v32  ;;  %v8778_v4 = vadd.f32 %v8348_v9, %v11007_v2  ;;  %v11009_v44 = vld [vmem:[#allocation60_spill] sm:$0xff]  ;;  %v11011_v32 = vld [vmem:[#allocation61_spill] sm:$0xff] }
 0x975   :  { %11004 = vst [vmem:[#allocation57_spill] sm:$0xff] %v8767_v7  ;;  %11006 = vst [vmem:[#allocation58_spill] sm:$0xff] %v8774_v16  ;;  %v8782_v37 = vadd.f32 %v11009_v44, %v8348_v9  ;;  %v8786_v30 = vadd.f32 %v8348_v9, %v11011_v32  ;;  %v11013_v7 = vld [vmem:[#allocation62_spill] sm:$0xff]  ;;  %v11017_v16 = vld [vmem:[#allocation64_spill] sm:$0xff] }
 0x976   :  { %11008 = vst [vmem:[#allocation59_spill] sm:$0xff] %v8778_v4  ;;  %v8790_v31 = vadd.f32 %v11013_v7, %v8348_v9  ;;  %11016 = vst [vmem:[#allocation63_spill] sm:$0xff] %v8794_v13  ;;  %v8798_v2 = vadd.f32 %v11017_v16, %v8348_v9  ;;  %v11019_v4 = vld [vmem:[#allocation65_spill] sm:$0xff]  ;;  %v11021_v32 = vld [vmem:[#allocation66_spill] sm:$0xff]  ;;  %v8810_v7 = vadd.f32 %v8348_v9, %v11023_v6 }
 0x977   :  { %11010 = vst [vmem:[#allocation60_spill] sm:$0xff] %v8782_v37  ;;  %11012 = vst [vmem:[#allocation61_spill] sm:$0xff] %v8786_v30  ;;  %v8802_v44 = vadd.f32 %v8348_v9, %v11019_v4  ;;  %v3313_v37 = vpop.f32.mrb[48].mxu1  ;;  %v8806_v30 = vadd.f32 %v11021_v32, %v8348_v9  ;;  %v11025_v16 = vld [vmem:[#allocation68_spill] sm:$0xff]  ;;  %v8819_v4 = vadd.f32 %v8348_v9, %v11027_v38 }
 0x978   :  { %11014 = vst [vmem:[#allocation62_spill] sm:$0xff] %v8790_v31  ;;  %11018 = vst [vmem:[#allocation64_spill] sm:$0xff] %v8798_v2  ;;  %v3314_v31 = vadd.f32 %v5444_v54, %v3313_v37  ;;  %v6464_v13 = vpop.f32.mrb[49].mxu1  ;;  %v8815_v2 = vadd.f32 %v11025_v16, %v8348_v9  ;;  %v11032_v37 = vld [vmem:[#allocation72_spill] sm:$0xff]  ;;  %v11034_v16 = vld [vmem:[#allocation73_spill] sm:$0xff] }
 0x979   :  { %11020 = vst [vmem:[#allocation65_spill] sm:$0xff] %v8802_v44  ;;  %11022 = vst [vmem:[#allocation66_spill] sm:$0xff] %v8806_v30  ;;  %v11028_v44 = vld [vmem:[#allocation70_spill] sm:$0xff]  ;;  %v3316_v6 = vpop.f32.mrb[50].mxu1  ;;  %v8832_v13 = vadd.f32 %v11032_v37, %v8348_v9  ;;  %v8836_v3 = vadd.f32 %v8348_v9, %v11034_v16  ;;  %v11037_v30 = vld [vmem:[#allocation75_spill] sm:$0xff] }
 0x97a   :  { %11024 = vst [vmem:[#allocation67_spill] sm:$0xff] %v8810_v7  ;;  %11026 = vst [vmem:[#allocation68_spill] sm:$0xff] %v8815_v2  ;;  %v8823_v32 = vadd.f32 %v11028_v44, %v8348_v9  ;;  %v11030_v7 = vld [vmem:[#allocation71_spill] sm:$0xff]  ;;  %v3432_v38 = vadd.f32 1.0, %v3314_v31  ;;  %v6465_v2 = vpop.f32.mrb[51].mxu1  ;;  %v11035_v44 = vld [vmem:[#allocation74_spill] sm:$0xff]  ;;  %v8844_v6 = vadd.f32 %v8348_v9, %v11037_v30 }
 0x97b   :  { %v8828_v54 = vadd.f32 %v8348_v9, %v11030_v7  ;;  %11033 = vst [vmem:[#allocation71_spill] sm:$0xff] %v8832_v13  ;;  %v11039_v7 = vld [vmem:[#allocation76_spill] sm:$0xff]  ;;  %v11041_v37 = vld [vmem:[#allocation77_spill] sm:$0xff]  ;;  %v11043_v16 = vld [vmem:[#allocation78_spill] sm:$0xff] }
 0x97c   :  { %11029 = vst [vmem:[#allocation69_spill] sm:$0xff] %v8823_v32  ;;  %v8840_v32 = vadd.f32 %v11035_v44, %v8348_v9  ;;  %11038 = vst [vmem:[#allocation73_spill] sm:$0xff] %v8844_v6  ;;  %v8852_v13 = vadd.f32 %v8348_v9, %v11041_v37  ;;  %v8856_v31 = vadd.f32 %v11043_v16, %v8348_v9  ;;  %v11045_v2 = vld [vmem:[#allocation79_spill] sm:$0xff]  ;;  %v11048_v6 = vld [vmem:[#allocation80_spill] sm:$0xff] }
 0x97d   :  { %11031 = vst [vmem:[#allocation70_spill] sm:$0xff] %v8828_v54  ;;  %v8848_v54 = vadd.f32 %v11039_v7, %v8348_v9  ;;  %v8860_v44 = vadd.f32 %v8348_v9, %v11045_v2  ;;  %v8868_v7 = vadd.f32 %v11048_v6, %v8348_v9 }
 0x97e   :  { %11036 = vst [vmem:[#allocation72_spill] sm:$0xff] %v8840_v32  ;;  %11042 = vst [vmem:[#allocation75_spill] sm:$0xff] %v8852_v13  ;;  %v11047_v32 = vsub.s32 0, %v8751_v17  ;;  %v11050_v13 = vld [vmem:[#allocation81_spill] sm:$0xff] }
 0x97f   :  { %11040 = vst [vmem:[#allocation74_spill] sm:$0xff] %v8848_v54  ;;  %11044 = vst [vmem:[#allocation76_spill] sm:$0xff] %v8856_v31  ;;  %v11049_v54 = vsub.s32 1, %v8751_v17  ;;  %v8876_v16 = vadd.f32 %v8348_v9, %v11050_v13  ;;  %v11051_v31 = vld [vmem:[#allocation82_spill] sm:$0xff] }
 0x980   :  { %11046 = vst [vmem:[#allocation77_spill] sm:$0xff] %v8860_v44  ;;  %v8864_v30 = vrot.slane %v3432_v38, %v11047_v32  ;;  %v8880_v2 = vadd.f32 %v11051_v31, %v8348_v9  ;;  %v11052_v44 = vld [vmem:[#allocation83_spill] sm:$0xff] }
 0x981   :  { %v8872_v37 = vrot.slane %v3432_v38, %v11049_v54  ;;  %v8884_v32 = vadd.f32 %v8348_v9, %v11052_v44  ;;  %v11058_v44 = vld [vmem:[#allocation5_spill] sm:$0xff] }
 0x982   :  { %v8888_v6 = vmul.f32 %v8864_v30, %v8357_v36  ;;  %v8892_v54 = vmul.f32 %v8864_v30, %v8365_v57  ;;  %v8896_v13 = vmul.f32 %v8864_v30, %v8353_v1  ;;  %v8900_v38 = vmul.f32 %v8864_v30, %v8361_v35 }
 0x983   :  { %v8904_v9 = vmul.f32 %v8864_v30, %v8373_v39  ;;  %v8908_v36 = vmul.f32 %v8864_v30, %v8381_v41  ;;  %v8912_v57 = vmul.f32 %v8864_v30, %v8369_v62  ;;  %v8916_v1 = vmul.f32 %v8864_v30, %v8377_v40 }
 0x984   :  { %v8920_v35 = vmul.f32 %v8864_v30, %v8389_v43  ;;  %v8924_v39 = vmul.f32 %v8864_v30, %v8402_v46  ;;  %v8928_v41 = vmul.f32 %v8864_v30, %v8385_v42  ;;  %v8932_v62 = vmul.f32 %v8864_v30, %v8398_v45 }
 0x985   :  { %v8936_v40 = vmul.f32 %v8864_v30, %v8410_v48  ;;  %v8940_v43 = vmul.f32 %v8864_v30, %v8419_v49  ;;  %v8944_v46 = vmul.f32 %v8864_v30, %v8406_v47  ;;  %v8948_v42 = vmul.f32 %v8864_v30, %v8415_v0 }
 0x986   :  { %v8952_v45 = vmul.f32 %v8864_v30, %v8427_v51  ;;  %v8956_v48 = vmul.f32 %v8864_v30, %v8435_v53  ;;  %v8960_v49 = vmul.f32 %v8864_v30, %v8423_v50  ;;  %v8964_v47 = vmul.f32 %v8864_v30, %v8431_v52 }
 0x987   :  { %v8968_v0 = vmul.f32 %v8864_v30, %v8443_v56  ;;  %v8972_v51 = vmul.f32 %v8864_v30, %v8451_v59  ;;  %v8976_v53 = vmul.f32 %v8864_v30, %v8439_v55  ;;  %v8980_v50 = vmul.f32 %v8864_v30, %v8447_v58  ;;  %v6843_v58 = vld [vmem:[%s10667_s18] sm:$0xff]  }
 0x988   :  { %v8984_v52 = vmul.f32 %v8864_v30, %v8459_v33  ;;  %v8988_v56 = vmul.f32 %v8864_v30, %v8467_v63  ;;  %v8992_v59 = vmul.f32 %v8864_v30, %v8455_v60  ;;  %v8996_v55 = vmul.f32 %v8864_v30, %v8463_v61  ;;  %6513 = vmatpush3.bf16.msra.mxu1 %v6843_v58  ;;  %v11060_v58 = vld [vmem:[#allocation7_spill] sm:$0xff] }
 0x989   :  { %v9003_v33 = vmul.f32 %v8864_v30, %v8475_v8  ;;  %v9007_v63 = vmul.f32 %v8864_v30, %v8483_v11  ;;  %v9011_v60 = vmul.f32 %v8864_v30, %v8471_v5  ;;  %v9015_v61 = vmul.f32 %v8864_v30, %v8479_v10  ;;  %6514 = vmatprep.subr.bf16.mxu1 %v10830_v12 }
 0x98a   :  { %v9019_v31 = vmul.f32 %v8864_v30, %v8491_v15  ;;  %v9023_v8 = vmul.f32 %v8864_v30, %v8499_v19  ;;  %v9027_v11 = vmul.f32 %v8864_v30, %v8487_v14  ;;  %v9031_v5 = vmul.f32 %v8864_v30, %v8495_v18 }
 0x98b   :  { %v9035_v10 = vmul.f32 %v8864_v30, %v8507_v21  ;;  %v9039_v15 = vmul.f32 %v8864_v30, %v8515_v23  ;;  %v9043_v19 = vmul.f32 %v8864_v30, %v8503_v20  ;;  %v9047_v14 = vmul.f32 %v8864_v30, %v8511_v22  ;;  %v6844_v22 = vld [vmem:[%s10667_s18 + $0x8] sm:$0xff]  }
 0x98c   :  { %v9052_v18 = vmul.f32 %v8864_v30, %v8525_v25  ;;  %v9056_v21 = vmul.f32 %v8864_v30, %v8533_v27  ;;  %v9060_v23 = vmul.f32 %v8864_v30, %v8521_v24  ;;  %v9064_v20 = vmul.f32 %v8864_v30, %v8529_v26  ;;  %6515 = vmatpush3.bf16.msra.mxu1 %v6844_v22 }
 0x98d   :  { %v9071_v25 = vmul.f32 %v8864_v30, %v8541_v29  ;;  %v9075_v27 = vmul.f32 %v8864_v30, %v8549_v34  ;;  %v9079_v24 = vmul.f32 %v8864_v30, %v8537_v28  ;;  %v9083_v26 = vmul.f32 %v8864_v30, %v11058_v44  ;;  %6520 = vmatprep.subr.bf16.mxu1 %v10830_v12  ;;  %v11085_v12 = vld [vmem:[#allocation19_spill] sm:$0xff] }
 0x98e   :  { %11053 = vst [vmem:[#allocation78_spill] sm:$0xff] %v9060_v23  ;;  %11054 = vst [vmem:[#allocation79_spill] sm:$0xff] %v9064_v20  ;;  %v9087_v20 = vmul.f32 %v8864_v30, %v11060_v58  ;;  %v11062_v23 = vld [vmem:[#allocation9_spill] sm:$0xff] }
 0x98f   :  { %11055 = vst [vmem:[#allocation80_spill] sm:$0xff] %v9071_v25  ;;  %11056 = vst [vmem:[#allocation81_spill] sm:$0xff] %v9075_v27  ;;  %v9091_v29 = vmul.f32 %v8864_v30, %v11062_v23  ;;  %v11064_v25 = vld [vmem:[#allocation6_spill] sm:$0xff]  ;;  %v11065_v27 = vld [vmem:[#allocation8_spill] sm:$0xff] }
 0x990   :  { %11057 = vst [vmem:[#allocation82_spill] sm:$0xff] %v9079_v24  ;;  %11059 = vst [vmem:[#allocation83_spill] sm:$0xff] %v9083_v26  ;;  %v9095_v34 = vmul.f32 %v8864_v30, %v11064_v25  ;;  %v9099_v28 = vmul.f32 %v8864_v30, %v11065_v27  ;;  %v11067_v24 = vld [vmem:[#allocation11_spill] sm:$0xff]  ;;  %v11069_v26 = vld [vmem:[#allocation13_spill] sm:$0xff] }
 0x991   :  { %11061 = vst [vmem:[#allocation5_spill] sm:$0xff] %v9087_v20  ;;  %11063 = vst [vmem:[#allocation7_spill] sm:$0xff] %v9091_v29  ;;  %v9103_v44 = vmul.f32 %v8864_v30, %v11067_v24  ;;  %v9107_v58 = vmul.f32 %v8864_v30, %v11069_v26  ;;  %v11071_v20 = vld [vmem:[#allocation10_spill] sm:$0xff]  ;;  %v11073_v29 = vld [vmem:[#allocation12_spill] sm:$0xff] }
 0x992   :  { %11066 = vst [vmem:[#allocation9_spill] sm:$0xff] %v9099_v28  ;;  %v9111_v23 = vmul.f32 %v8864_v30, %v11071_v20  ;;  %v9115_v25 = vmul.f32 %v8864_v30, %v11073_v29  ;;  %v11075_v27 = vld [vmem:[#allocation15_spill] sm:$0xff]  ;;  %v11077_v24 = vld [vmem:[#allocation85_spill] sm:$0xff]  ;;  %v11079_v26 = vld [vmem:[#allocation14_spill] sm:$0xff] }
 0x993   :  { %11068 = vst [vmem:[#allocation6_spill] sm:$0xff] %v9103_v44  ;;  %11070 = vst [vmem:[#allocation8_spill] sm:$0xff] %v9107_v58  ;;  %v9120_v22 = vmul.f32 %v8864_v30, %v11075_v27  ;;  %v9124_v44 = vmul.f32 %v8864_v30, %v11077_v24  ;;  %v9128_v58 = vmul.f32 %v8864_v30, %v11079_v26  ;;  %v11081_v20 = vld [vmem:[#allocation84_spill] sm:$0xff]  ;;  %v11083_v29 = vld [vmem:[#allocation17_spill] sm:$0xff] }
 0x994   :  { %11072 = vst [vmem:[#allocation11_spill] sm:$0xff] %v9111_v23  ;;  %11074 = vst [vmem:[#allocation13_spill] sm:$0xff] %v9115_v25  ;;  %v9132_v23 = vmul.f32 %v8864_v30, %v11081_v20  ;;  %v9136_v25 = vmul.f32 %v8864_v30, %v11083_v29  ;;  %v9140_v27 = vmul.f32 %v8864_v30, %v11085_v12  ;;  %v11180_v28 = vld [vmem:[#allocation67_spill] sm:$0xff] }
 0x995   :  { %11076 = vst [vmem:[#allocation10_spill] sm:$0xff] %v9120_v22  ;;  %11078 = vst [vmem:[#allocation12_spill] sm:$0xff] %v9124_v44  ;;  %v11087_v22 = vld [vmem:[#allocation16_spill] sm:$0xff]  ;;  %v11089_v44 = vld [vmem:[#allocation18_spill] sm:$0xff] }
 0x996   :  { %11080 = vst [vmem:[#allocation15_spill] sm:$0xff] %v9128_v58  ;;  %11082 = vst [vmem:[#allocation85_spill] sm:$0xff] %v9132_v23  ;;  %v9144_v24 = vmul.f32 %v8864_v30, %v11087_v22  ;;  %v9148_v26 = vmul.f32 %v8864_v30, %v11089_v44  ;;  %v11091_v58 = vld [vmem:[#allocation21_spill] sm:$0xff]  ;;  %v11093_v23 = vld [vmem:[#allocation23_spill] sm:$0xff] }
 0x997   :  { %11084 = vst [vmem:[#allocation14_spill] sm:$0xff] %v9136_v25  ;;  %11086 = vst [vmem:[#allocation84_spill] sm:$0xff] %v9140_v27  ;;  %v9152_v20 = vmul.f32 %v8872_v37, %v11091_v58  ;;  %v9156_v29 = vmul.f32 %v8872_v37, %v11093_v23  ;;  %v11095_v25 = vld [vmem:[#allocation20_spill] sm:$0xff]  ;;  %v11097_v27 = vld [vmem:[#allocation22_spill] sm:$0xff] }
 0x998   :  { %11088 = vst [vmem:[#allocation17_spill] sm:$0xff] %v9144_v24  ;;  %11090 = vst [vmem:[#allocation19_spill] sm:$0xff] %v9148_v26  ;;  %v9160_v12 = vmul.f32 %v8872_v37, %v11095_v25  ;;  %v9164_v22 = vmul.f32 %v8872_v37, %v11097_v27  ;;  %v11099_v24 = vld [vmem:[#allocation25_spill] sm:$0xff]  ;;  %v11101_v44 = vld [vmem:[#allocation27_spill] sm:$0xff] }
 0x999   :  { %11092 = vst [vmem:[#allocation16_spill] sm:$0xff] %v9152_v20  ;;  %11094 = vst [vmem:[#allocation18_spill] sm:$0xff] %v9156_v29  ;;  %v9168_v30 = vmul.f32 %v8872_v37, %v11099_v24  ;;  %v9172_v58 = vmul.f32 %v8872_v37, %v11101_v44  ;;  %v11103_v20 = vld [vmem:[#allocation24_spill] sm:$0xff]  ;;  %v11105_v29 = vld [vmem:[#allocation26_spill] sm:$0xff] }
 0x99a   :  { %11096 = vst [vmem:[#allocation21_spill] sm:$0xff] %v9160_v12  ;;  %11098 = vst [vmem:[#allocation23_spill] sm:$0xff] %v9164_v22  ;;  %v9176_v23 = vmul.f32 %v8872_v37, %v11103_v20  ;;  %v9180_v25 = vmul.f32 %v8872_v37, %v11105_v29  ;;  %v11107_v12 = vld [vmem:[#allocation29_spill] sm:$0xff]  ;;  %v11109_v22 = vld [vmem:[#allocation31_spill] sm:$0xff] }
 0x99b   :  { %11100 = vst [vmem:[#allocation20_spill] sm:$0xff] %v9168_v30  ;;  %11102 = vst [vmem:[#allocation22_spill] sm:$0xff] %v9172_v58  ;;  %v9184_v27 = vmul.f32 %v8872_v37, %v11107_v12  ;;  %v9188_v24 = vmul.f32 %v8872_v37, %v11109_v22  ;;  %v11111_v30 = vld [vmem:[#allocation28_spill] sm:$0xff]  ;;  %v11113_v58 = vld [vmem:[#allocation30_spill] sm:$0xff] }
 0x99c   :  { %11104 = vst [vmem:[#allocation25_spill] sm:$0xff] %v9176_v23  ;;  %11106 = vst [vmem:[#allocation27_spill] sm:$0xff] %v9180_v25  ;;  %v9192_v44 = vmul.f32 %v8872_v37, %v11111_v30  ;;  %v9196_v20 = vmul.f32 %v8872_v37, %v11113_v58  ;;  %v11115_v23 = vld [vmem:[#allocation33_spill] sm:$0xff]  ;;  %v11117_v25 = vld [vmem:[#allocation35_spill] sm:$0xff] }
 0x99d   :  { %11108 = vst [vmem:[#allocation24_spill] sm:$0xff] %v9184_v27  ;;  %11110 = vst [vmem:[#allocation26_spill] sm:$0xff] %v9188_v24  ;;  %v9200_v29 = vmul.f32 %v8872_v37, %v11115_v23  ;;  %v9204_v12 = vmul.f32 %v8872_v37, %v11117_v25  ;;  %v11119_v27 = vld [vmem:[#allocation32_spill] sm:$0xff]  ;;  %v11121_v24 = vld [vmem:[#allocation34_spill] sm:$0xff] }
 0x99e   :  { %11112 = vst [vmem:[#allocation29_spill] sm:$0xff] %v9192_v44  ;;  %11114 = vst [vmem:[#allocation31_spill] sm:$0xff] %v9196_v20  ;;  %v9208_v22 = vmul.f32 %v8872_v37, %v11119_v27  ;;  %v9212_v30 = vmul.f32 %v8872_v37, %v11121_v24  ;;  %v11123_v44 = vld [vmem:[#allocation37_spill] sm:$0xff]  ;;  %v11125_v20 = vld [vmem:[#allocation39_spill] sm:$0xff] }
 0x99f   :  { %11116 = vst [vmem:[#allocation28_spill] sm:$0xff] %v9200_v29  ;;  %11118 = vst [vmem:[#allocation30_spill] sm:$0xff] %v9204_v12  ;;  %v9216_v58 = vmul.f32 %v8872_v37, %v11123_v44  ;;  %v9220_v23 = vmul.f32 %v8872_v37, %v11125_v20  ;;  %v11127_v29 = vld [vmem:[#allocation36_spill] sm:$0xff]  ;;  %v11129_v12 = vld [vmem:[#allocation38_spill] sm:$0xff] }
 0x9a0   :  { %11120 = vst [vmem:[#allocation33_spill] sm:$0xff] %v9208_v22  ;;  %11122 = vst [vmem:[#allocation35_spill] sm:$0xff] %v9212_v30  ;;  %v9224_v25 = vmul.f32 %v8872_v37, %v11127_v29  ;;  %v9228_v27 = vmul.f32 %v8872_v37, %v11129_v12  ;;  %v11131_v22 = vld [vmem:[#allocation41_spill] sm:$0xff]  ;;  %v11133_v30 = vld [vmem:[#allocation43_spill] sm:$0xff] }
 0x9a1   :  { %11124 = vst [vmem:[#allocation32_spill] sm:$0xff] %v9216_v58  ;;  %11126 = vst [vmem:[#allocation34_spill] sm:$0xff] %v9220_v23  ;;  %v9232_v24 = vmul.f32 %v8872_v37, %v11131_v22  ;;  %v9236_v44 = vmul.f32 %v8872_v37, %v11133_v30  ;;  %v11135_v58 = vld [vmem:[#allocation40_spill] sm:$0xff]  ;;  %v11137_v23 = vld [vmem:[#allocation42_spill] sm:$0xff] }
 0x9a2   :  { %11128 = vst [vmem:[#allocation37_spill] sm:$0xff] %v9224_v25  ;;  %11130 = vst [vmem:[#allocation39_spill] sm:$0xff] %v9228_v27  ;;  %v9240_v20 = vmul.f32 %v8872_v37, %v11135_v58  ;;  %v9244_v29 = vmul.f32 %v8872_v37, %v11137_v23  ;;  %v11139_v25 = vld [vmem:[#allocation45_spill] sm:$0xff]  ;;  %v11141_v27 = vld [vmem:[#allocation47_spill] sm:$0xff] }
 0x9a3   :  { %11132 = vst [vmem:[#allocation36_spill] sm:$0xff] %v9232_v24  ;;  %11134 = vst [vmem:[#allocation38_spill] sm:$0xff] %v9236_v44  ;;  %v9248_v12 = vmul.f32 %v8872_v37, %v11139_v25  ;;  %v9252_v22 = vmul.f32 %v8872_v37, %v11141_v27  ;;  %v11143_v24 = vld [vmem:[#allocation44_spill] sm:$0xff]  ;;  %v11145_v44 = vld [vmem:[#allocation46_spill] sm:$0xff] }
 0x9a4   :  { %11136 = vst [vmem:[#allocation41_spill] sm:$0xff] %v9240_v20  ;;  %11138 = vst [vmem:[#allocation43_spill] sm:$0xff] %v9244_v29  ;;  %v9256_v30 = vmul.f32 %v8872_v37, %v11143_v24  ;;  %v9260_v58 = vmul.f32 %v8872_v37, %v11145_v44  ;;  %v11147_v20 = vld [vmem:[#allocation49_spill] sm:$0xff]  ;;  %v11149_v29 = vld [vmem:[#allocation51_spill] sm:$0xff] }
 0x9a5   :  { %11140 = vst [vmem:[#allocation40_spill] sm:$0xff] %v9248_v12  ;;  %11142 = vst [vmem:[#allocation42_spill] sm:$0xff] %v9252_v22  ;;  %v9264_v23 = vmul.f32 %v8872_v37, %v11147_v20  ;;  %v9268_v25 = vmul.f32 %v8872_v37, %v11149_v29  ;;  %v11151_v12 = vld [vmem:[#allocation48_spill] sm:$0xff]  ;;  %v11153_v22 = vld [vmem:[#allocation50_spill] sm:$0xff] }
 0x9a6   :  { %11144 = vst [vmem:[#allocation45_spill] sm:$0xff] %v9256_v30  ;;  %11146 = vst [vmem:[#allocation47_spill] sm:$0xff] %v9260_v58  ;;  %v9272_v27 = vmul.f32 %v8872_v37, %v11151_v12  ;;  %v9276_v24 = vmul.f32 %v8872_v37, %v11153_v22  ;;  %v11155_v30 = vld [vmem:[#allocation53_spill] sm:$0xff]  ;;  %v11157_v58 = vld [vmem:[#allocation55_spill] sm:$0xff] }
 0x9a7   :  { %11148 = vst [vmem:[#allocation44_spill] sm:$0xff] %v9264_v23  ;;  %11150 = vst [vmem:[#allocation46_spill] sm:$0xff] %v9268_v25  ;;  %v9280_v44 = vmul.f32 %v8872_v37, %v11155_v30  ;;  %v9284_v20 = vmul.f32 %v8872_v37, %v11157_v58  ;;  %v11159_v23 = vld [vmem:[#allocation52_spill] sm:$0xff]  ;;  %v11161_v25 = vld [vmem:[#allocation54_spill] sm:$0xff] }
 0x9a8   :  { %11152 = vst [vmem:[#allocation49_spill] sm:$0xff] %v9272_v27  ;;  %11154 = vst [vmem:[#allocation51_spill] sm:$0xff] %v9276_v24  ;;  %v9288_v29 = vmul.f32 %v8872_v37, %v11159_v23  ;;  %v9292_v12 = vmul.f32 %v8872_v37, %v11161_v25  ;;  %v11163_v27 = vld [vmem:[#allocation57_spill] sm:$0xff]  ;;  %v11165_v24 = vld [vmem:[#allocation59_spill] sm:$0xff] }
 0x9a9   :  { %11156 = vst [vmem:[#allocation48_spill] sm:$0xff] %v9280_v44  ;;  %11158 = vst [vmem:[#allocation50_spill] sm:$0xff] %v9284_v20  ;;  %v9296_v22 = vmul.f32 %v8872_v37, %v11163_v27  ;;  %v9300_v30 = vmul.f32 %v8872_v37, %v11165_v24  ;;  %v11167_v44 = vld [vmem:[#allocation56_spill] sm:$0xff]  ;;  %v11169_v20 = vld [vmem:[#allocation58_spill] sm:$0xff] }
 0x9aa   :  { %11160 = vst [vmem:[#allocation53_spill] sm:$0xff] %v9288_v29  ;;  %11162 = vst [vmem:[#allocation55_spill] sm:$0xff] %v9292_v12  ;;  %v9304_v58 = vmul.f32 %v8872_v37, %v11167_v44  ;;  %v9308_v23 = vmul.f32 %v8872_v37, %v11169_v20  ;;  %v3424_v29 = vpop.f32.mrb[52].mxu1  ;;  %v11171_v26 = vld [vmem:[#allocation61_spill] sm:$0xff]  ;;  %v11173_v12 = vld [vmem:[#allocation63_spill] sm:$0xff] }
 0x9ab   :  { %11164 = vst [vmem:[#allocation52_spill] sm:$0xff] %v9296_v22  ;;  %11166 = vst [vmem:[#allocation54_spill] sm:$0xff] %v9300_v30  ;;  %v9312_v25 = vmul.f32 %v8872_v37, %v11171_v26  ;;  %v9316_v27 = vmul.f32 %v8872_v37, %v11173_v12  ;;  %v11175_v22 = vld [vmem:[#allocation60_spill] sm:$0xff]  ;;  %v11177_v30 = vld [vmem:[#allocation62_spill] sm:$0xff]  ;;  %v9332_v26 = vmul.f32 %v8872_v37, %v11180_v28 }
 0x9ac   :  { %11168 = vst [vmem:[#allocation57_spill] sm:$0xff] %v9304_v58  ;;  %11170 = vst [vmem:[#allocation59_spill] sm:$0xff] %v9308_v23  ;;  %v9320_v24 = vmul.f32 %v8872_v37, %v11175_v22  ;;  %v9324_v44 = vmul.f32 %v8872_v37, %v11177_v30  ;;  %v6484_v58 = vpop.f32.mrb[53].mxu1  ;;  %v11178_v20 = vld [vmem:[#allocation65_spill] sm:$0xff]  ;;  %v9344_v30 = vmul.f32 %v8872_v37, %v8819_v4 }
 0x9ad   :  { %11172 = vst [vmem:[#allocation56_spill] sm:$0xff] %v9312_v25  ;;  %11174 = vst [vmem:[#allocation58_spill] sm:$0xff] %v9316_v27  ;;  %v9328_v23 = vmul.f32 %v8872_v37, %v11178_v20  ;;  %v11182_v25 = vld [vmem:[#allocation64_spill] sm:$0xff]  ;;  %v11184_v27 = vld [vmem:[#allocation66_spill] sm:$0xff] }
 0x9ae   :  { %11176 = vst [vmem:[#allocation61_spill] sm:$0xff] %v9320_v24  ;;  %11181 = vst [vmem:[#allocation60_spill] sm:$0xff] %v9332_v26  ;;  %v9336_v12 = vmul.f32 %v8872_v37, %v11182_v25  ;;  %v9340_v22 = vmul.f32 %v8872_v37, %v11184_v27  ;;  %v3427_v24 = vpop.f32.mrb[54].mxu1  ;;  %v11186_v58 = vld [vmem:[#allocation70_spill] sm:$0xff]  ;;  %v11189_v26 = vld [vmem:[#allocation69_spill] sm:$0xff]  ;;  %v9360_v27 = vmul.f32 %v8872_v37, %v8836_v3 }
 0x9af   :  { %11179 = vst [vmem:[#allocation63_spill] sm:$0xff] %v9328_v23  ;;  %11185 = vst [vmem:[#allocation65_spill] sm:$0xff] %v9344_v30  ;;  %v9348_v20 = vmul.f32 %v8872_v37, %v11186_v58  ;;  %v11188_v23 = vld [vmem:[#allocation68_spill] sm:$0xff]  ;;  %v9356_v25 = vmul.f32 %v8872_v37, %v11189_v26  ;;  %v11191_v24 = vld [vmem:[#allocation73_spill] sm:$0xff] }
 0x9b0   :  { %11183 = vst [vmem:[#allocation62_spill] sm:$0xff] %v9336_v12  ;;  %v9352_v28 = vmul.f32 %v8872_v37, %v11188_v23  ;;  %v6485_v12 = vpop.f32.mrb[55].mxu1  ;;  %11190 = vst [vmem:[#allocation64_spill] sm:$0xff] %v9360_v27  ;;  %v9364_v4 = vmul.f32 %v8872_v37, %v11191_v24  ;;  %v11193_v30 = vld [vmem:[#allocation71_spill] sm:$0xff]  ;;  %v5453_v26 = vld [vmem:[%s10666_s17] ss:$0 sm:$0xff] }
 0x9b1   :  { %11187 = vst [vmem:[#allocation67_spill] sm:$0xff] %v9348_v20  ;;  %v9368_v58 = vmul.f32 %v8872_v37, %v11193_v30  ;;  %v11195_v20 = vld [vmem:[#allocation72_spill] sm:$0xff]  ;;  %v11197_v12 = vld [vmem:[#allocation75_spill] sm:$0xff]  ;;  %v11198_v27 = vld [vmem:[#allocation77_spill] sm:$0xff] }
 0x9b2   :  { %11192 = vst [vmem:[#allocation66_spill] sm:$0xff] %v9364_v4  ;;  %v9372_v23 = vmul.f32 %v8872_v37, %v11195_v20  ;;  %v9379_v3 = vmul.f32 %v8872_v37, %v11197_v12  ;;  %v9383_v24 = vmul.f32 %v8872_v37, %v11198_v27  ;;  %v11199_v4 = vld [vmem:[#allocation74_spill] sm:$0xff]  ;;  %v9399_v12 = vmul.f32 %v8872_v37, %v8876_v16 }
 0x9b3   :  { %11194 = vst [vmem:[#allocation70_spill] sm:$0xff] %v9368_v58  ;;  %v9387_v30 = vmul.f32 %v8872_v37, %v11199_v4  ;;  %v11201_v58 = vld [vmem:[#allocation76_spill] sm:$0xff]  ;;  %v9403_v27 = vmul.f32 %v8872_v37, %v8880_v2  ;;  %v9407_v4 = vmul.f32 %v8872_v37, %v8884_v32 }
 0x9b4   :  { %11196 = vst [vmem:[#allocation68_spill] sm:$0xff] %v9372_v23  ;;  %v9391_v20 = vmul.f32 %v8872_v37, %v11201_v58  ;;  %v9395_v23 = vmul.f32 %v8872_v37, %v8868_v7  ;;  %v11204_v58 = vsub.s32 0, %v8751_v17  ;;  %v11205_v7 = vsub.s32 1, %v8751_v17  ;;  %v11236_v17 = vld [vmem:[#allocation82_spill] sm:$0xff] }
 0x9b5   :  { %11200 = vst [vmem:[#allocation69_spill] sm:$0xff] %v9387_v30  ;;  %v3425_v30 = vadd.f32 %v5453_v26, %v3424_v29  ;;  %v11228_v26 = vld [vmem:[#allocation78_spill] sm:$0xff] }
 0x9b6   :  { %11202 = vst [vmem:[#allocation73_spill] sm:$0xff] %v9391_v20  ;;  %11203 = vst [vmem:[#allocation71_spill] sm:$0xff] %v9395_v23 }
 0x9b7   :  { %v9411_v20 = vrot.slane %v3425_v30, %v11204_v58  ;;  %v9415_v23 = vrot.slane %v3425_v30, %v11205_v7  ;;  %v11230_v30 = vld [vmem:[#allocation79_spill] sm:$0xff]  ;;  %v11232_v58 = vld [vmem:[#allocation80_spill] sm:$0xff]  ;;  %v11234_v7 = vld [vmem:[#allocation81_spill] sm:$0xff] }
 0x9b9   :  { %v9419_v16 = vadd.f32 %v9411_v20, %v8888_v6  ;;  %v9423_v2 = vadd.f32 %v9411_v20, %v8892_v54  ;;  %v9427_v37 = vadd.f32 %v9411_v20, %v8896_v13  ;;  %v9431_v32 = vadd.f32 %v9411_v20, %v8900_v38 }
 0x9ba   :  { %v9435_v29 = vadd.f32 %v9411_v20, %v8904_v9  ;;  %v9439_v6 = vadd.f32 %v9411_v20, %v8908_v36  ;;  %v9443_v54 = vadd.f32 %v9411_v20, %v8912_v57  ;;  %v9447_v13 = vadd.f32 %v9411_v20, %v8916_v1 }
 0x9bb   :  { %v9451_v38 = vadd.f32 %v9411_v20, %v8920_v35  ;;  %v9455_v9 = vadd.f32 %v9411_v20, %v8924_v39  ;;  %v9459_v36 = vadd.f32 %v9411_v20, %v8928_v41  ;;  %v9463_v57 = vadd.f32 %v9411_v20, %v8932_v62 }
 0x9bc   :  { %v9467_v1 = vadd.f32 %v9411_v20, %v8936_v40  ;;  %v9471_v35 = vadd.f32 %v9411_v20, %v8940_v43  ;;  %v9475_v39 = vadd.f32 %v9411_v20, %v8944_v46  ;;  %v9479_v41 = vadd.f32 %v9411_v20, %v8948_v42 }
 0x9bd   :  { %11206 = vst [vmem:[#allocation72_spill] sm:$0xff] %v9463_v57  ;;  %v9483_v62 = vadd.f32 %v9411_v20, %v8952_v45  ;;  %v9487_v40 = vadd.f32 %v9411_v20, %v8956_v48  ;;  %v9491_v43 = vadd.f32 %v9411_v20, %v8960_v49  ;;  %v9495_v46 = vadd.f32 %v9411_v20, %v8964_v47 }
 0x9be   :  { %11207 = vst [vmem:[#allocation75_spill] sm:$0xff] %v9467_v1  ;;  %11208 = vst [vmem:[#allocation77_spill] sm:$0xff] %v9471_v35  ;;  %v9499_v42 = vadd.f32 %v9411_v20, %v8968_v0  ;;  %v9503_v45 = vadd.f32 %v9411_v20, %v8972_v51  ;;  %v9507_v48 = vadd.f32 %v9411_v20, %v8976_v53 }
 0x9bf   :  { %11209 = vst [vmem:[#allocation74_spill] sm:$0xff] %v9475_v39  ;;  %11210 = vst [vmem:[#allocation76_spill] sm:$0xff] %v9479_v41  ;;  %v9511_v49 = vadd.f32 %v9411_v20, %v8980_v50  ;;  %v9515_v47 = vadd.f32 %v9411_v20, %v8984_v52  ;;  %v9519_v0 = vadd.f32 %v9411_v20, %v8988_v56 }
 0x9c0   :  { %11211 = vst [vmem:[#allocation87_spill] sm:$0xff] %v9483_v62  ;;  %11212 = vst [vmem:[#allocation88_spill] sm:$0xff] %v9487_v40  ;;  %v9523_v51 = vadd.f32 %v9411_v20, %v8992_v59  ;;  %v9527_v53 = vadd.f32 %v9411_v20, %v8996_v55  ;;  %v9531_v50 = vadd.f32 %v9411_v20, %v9003_v33 }
 0x9c1   :  { %11213 = vst [vmem:[#allocation89_spill] sm:$0xff] %v9491_v43  ;;  %11214 = vst [vmem:[#allocation90_spill] sm:$0xff] %v9495_v46  ;;  %v9535_v52 = vadd.f32 %v9411_v20, %v9007_v63  ;;  %v9539_v56 = vadd.f32 %v9411_v20, %v9011_v60  ;;  %v9543_v59 = vadd.f32 %v9411_v20, %v9015_v61 }
 0x9c2   :  { %11215 = vst [vmem:[#allocation91_spill] sm:$0xff] %v9499_v42  ;;  %11216 = vst [vmem:[#allocation92_spill] sm:$0xff] %v9503_v45  ;;  %v9547_v55 = vadd.f32 %v9019_v31, %v9411_v20  ;;  %v9551_v33 = vadd.f32 %v9023_v8, %v9411_v20  ;;  %v9555_v63 = vadd.f32 %v9027_v11, %v9411_v20 }
 0x9c3   :  { %11217 = vst [vmem:[#allocation93_spill] sm:$0xff] %v9507_v48  ;;  %11218 = vst [vmem:[#allocation94_spill] sm:$0xff] %v9511_v49  ;;  %v9559_v60 = vadd.f32 %v9031_v5, %v9411_v20  ;;  %v9563_v61 = vadd.f32 %v9035_v10, %v9411_v20  ;;  %v9567_v31 = vadd.f32 %v9039_v15, %v9411_v20 }
 0x9c4   :  { %11219 = vst [vmem:[#allocation95_spill] sm:$0xff] %v9515_v47  ;;  %11220 = vst [vmem:[#allocation96_spill] sm:$0xff] %v9519_v0  ;;  %v9571_v8 = vadd.f32 %v9043_v19, %v9411_v20  ;;  %v9575_v11 = vadd.f32 %v9047_v14, %v9411_v20  ;;  %v9579_v5 = vadd.f32 %v9052_v18, %v9411_v20 }
 0x9c5   :  { %11221 = vst [vmem:[#allocation97_spill] sm:$0xff] %v9523_v51  ;;  %11222 = vst [vmem:[#allocation98_spill] sm:$0xff] %v9527_v53  ;;  %v9583_v10 = vadd.f32 %v9056_v21, %v9411_v20  ;;  %v9587_v15 = vadd.f32 %v11228_v26, %v9411_v20  ;;  %v9591_v19 = vadd.f32 %v11230_v30, %v9411_v20 }
 0x9c6   :  { %11223 = vst [vmem:[#allocation99_spill] sm:$0xff] %v9531_v50  ;;  %11224 = vst [vmem:[#allocation100_spill] sm:$0xff] %v9535_v52  ;;  %v9595_v14 = vadd.f32 %v11232_v58, %v9411_v20  ;;  %v9599_v18 = vadd.f32 %v11234_v7, %v9411_v20  ;;  %v9603_v21 = vadd.f32 %v11236_v17, %v9411_v20 }
 0x9c7   :  { %11225 = vst [vmem:[#allocation101_spill] sm:$0xff] %v9539_v56  ;;  %11226 = vst [vmem:[#allocation102_spill] sm:$0xff] %v9543_v59  ;;  %v9619_v7 = vadd.f32 %v9095_v34, %v9411_v20 }
 0x9c8   :  { %11227 = vst [vmem:[#allocation103_spill] sm:$0xff] %v9583_v10  ;;  %11229 = vst [vmem:[#allocation78_spill] sm:$0xff] %v9587_v15  ;;  %v11238_v10 = vld [vmem:[#allocation83_spill] sm:$0xff]  ;;  %v11240_v15 = vld [vmem:[#allocation5_spill] sm:$0xff] }
 0x9c9   :  { %11231 = vst [vmem:[#allocation79_spill] sm:$0xff] %v9591_v19  ;;  %11233 = vst [vmem:[#allocation80_spill] sm:$0xff] %v9595_v14  ;;  %v9607_v26 = vadd.f32 %v11238_v10, %v9411_v20  ;;  %v9611_v30 = vadd.f32 %v11240_v15, %v9411_v20  ;;  %v11242_v19 = vld [vmem:[#allocation7_spill] sm:$0xff] }
 0x9ca   :  { %11235 = vst [vmem:[#allocation81_spill] sm:$0xff] %v9599_v18  ;;  %11237 = vst [vmem:[#allocation82_spill] sm:$0xff] %v9603_v21  ;;  %v9615_v58 = vadd.f32 %v11242_v19, %v9411_v20  ;;  %v11245_v18 = vld [vmem:[#allocation9_spill] sm:$0xff]  ;;  %v11247_v21 = vld [vmem:[#allocation6_spill] sm:$0xff] }
 0x9cb   :  { %11239 = vst [vmem:[#allocation83_spill] sm:$0xff] %v9607_v26  ;;  %11241 = vst [vmem:[#allocation5_spill] sm:$0xff] %v9611_v30  ;;  %v9623_v17 = vadd.f32 %v11245_v18, %v9411_v20  ;;  %v9627_v10 = vadd.f32 %v11247_v21, %v9411_v20  ;;  %v11249_v26 = vld [vmem:[#allocation8_spill] sm:$0xff]  ;;  %v11251_v30 = vld [vmem:[#allocation11_spill] sm:$0xff] }
 0x9cc   :  { %11243 = vst [vmem:[#allocation7_spill] sm:$0xff] %v9615_v58  ;;  %11244 = vst [vmem:[#allocation104_spill] sm:$0xff] %v9619_v7  ;;  %v9631_v15 = vadd.f32 %v11249_v26, %v9411_v20  ;;  %v9635_v19 = vadd.f32 %v11251_v30, %v9411_v20  ;;  %v11253_v58 = vld [vmem:[#allocation13_spill] sm:$0xff]  ;;  %v11255_v7 = vld [vmem:[#allocation10_spill] sm:$0xff] }
 0x9cd   :  { %11246 = vst [vmem:[#allocation9_spill] sm:$0xff] %v9623_v17  ;;  %11248 = vst [vmem:[#allocation6_spill] sm:$0xff] %v9627_v10  ;;  %v9639_v34 = vadd.f32 %v11253_v58, %v9411_v20  ;;  %v9643_v18 = vadd.f32 %v11255_v7, %v9411_v20  ;;  %v11257_v17 = vld [vmem:[#allocation12_spill] sm:$0xff]  ;;  %v11259_v10 = vld [vmem:[#allocation15_spill] sm:$0xff] }
 0x9ce   :  { %11250 = vst [vmem:[#allocation8_spill] sm:$0xff] %v9631_v15  ;;  %11252 = vst [vmem:[#allocation11_spill] sm:$0xff] %v9635_v19  ;;  %v9647_v21 = vadd.f32 %v11257_v17, %v9411_v20  ;;  %v9651_v26 = vadd.f32 %v11259_v10, %v9411_v20  ;;  %v11261_v15 = vld [vmem:[#allocation85_spill] sm:$0xff]  ;;  %v11263_v19 = vld [vmem:[#allocation14_spill] sm:$0xff] }
 0x9cf   :  { %11254 = vst [vmem:[#allocation13_spill] sm:$0xff] %v9639_v34  ;;  %11256 = vst [vmem:[#allocation10_spill] sm:$0xff] %v9643_v18  ;;  %v9655_v30 = vadd.f32 %v11261_v15, %v9411_v20  ;;  %v9659_v58 = vadd.f32 %v11263_v19, %v9411_v20  ;;  %v11265_v34 = vld [vmem:[#allocation84_spill] sm:$0xff]  ;;  %v11267_v18 = vld [vmem:[#allocation17_spill] sm:$0xff] }
 0x9d0   :  { %11258 = vst [vmem:[#allocation12_spill] sm:$0xff] %v9647_v21  ;;  %11260 = vst [vmem:[#allocation15_spill] sm:$0xff] %v9651_v26  ;;  %v9663_v7 = vadd.f32 %v11265_v34, %v9411_v20  ;;  %v9667_v17 = vadd.f32 %v11267_v18, %v9411_v20  ;;  %v11269_v21 = vld [vmem:[#allocation19_spill] sm:$0xff]  ;;  %v11271_v26 = vld [vmem:[#allocation16_spill] sm:$0xff] }
 0x9d1   :  { %11262 = vst [vmem:[#allocation85_spill] sm:$0xff] %v9655_v30  ;;  %11264 = vst [vmem:[#allocation14_spill] sm:$0xff] %v9659_v58  ;;  %v9671_v10 = vadd.f32 %v11269_v21, %v9411_v20  ;;  %v9675_v15 = vadd.f32 %v9415_v23, %v11271_v26  ;;  %v11273_v30 = vld [vmem:[#allocation18_spill] sm:$0xff]  ;;  %v11275_v58 = vld [vmem:[#allocation21_spill] sm:$0xff] }
 0x9d2   :  { %11266 = vst [vmem:[#allocation84_spill] sm:$0xff] %v9663_v7  ;;  %11268 = vst [vmem:[#allocation17_spill] sm:$0xff] %v9667_v17  ;;  %v9679_v19 = vadd.f32 %v9415_v23, %v11273_v30  ;;  %v9683_v34 = vadd.f32 %v9415_v23, %v11275_v58  ;;  %v11277_v7 = vld [vmem:[#allocation23_spill] sm:$0xff]  ;;  %v11279_v17 = vld [vmem:[#allocation20_spill] sm:$0xff] }
 0x9d3   :  { %11270 = vst [vmem:[#allocation19_spill] sm:$0xff] %v9671_v10  ;;  %11272 = vst [vmem:[#allocation16_spill] sm:$0xff] %v9675_v15  ;;  %v9687_v18 = vadd.f32 %v9415_v23, %v11277_v7  ;;  %v9691_v20 = vadd.f32 %v9415_v23, %v11279_v17  ;;  %v11281_v21 = vld [vmem:[#allocation22_spill] sm:$0xff]  ;;  %v11283_v15 = vld [vmem:[#allocation25_spill] sm:$0xff] }
 0x9d4   :  { %11274 = vst [vmem:[#allocation18_spill] sm:$0xff] %v9679_v19  ;;  %11276 = vst [vmem:[#allocation21_spill] sm:$0xff] %v9683_v34  ;;  %v9695_v26 = vadd.f32 %v9415_v23, %v11281_v21  ;;  %v9699_v30 = vadd.f32 %v9415_v23, %v11283_v15  ;;  %v11285_v19 = vld [vmem:[#allocation27_spill] sm:$0xff]  ;;  %v11287_v34 = vld [vmem:[#allocation24_spill] sm:$0xff] }
 0x9d5   :  { %11278 = vst [vmem:[#allocation23_spill] sm:$0xff] %v9687_v18  ;;  %11280 = vst [vmem:[#allocation20_spill] sm:$0xff] %v9691_v20  ;;  %v9703_v58 = vadd.f32 %v9415_v23, %v11285_v19  ;;  %v9707_v7 = vadd.f32 %v9415_v23, %v11287_v34  ;;  %v11289_v18 = vld [vmem:[#allocation26_spill] sm:$0xff]  ;;  %v11291_v20 = vld [vmem:[#allocation29_spill] sm:$0xff] }
 0x9d6   :  { %11282 = vst [vmem:[#allocation22_spill] sm:$0xff] %v9695_v26  ;;  %11284 = vst [vmem:[#allocation25_spill] sm:$0xff] %v9699_v30  ;;  %v9711_v17 = vadd.f32 %v9415_v23, %v11289_v18  ;;  %v9715_v21 = vadd.f32 %v9415_v23, %v11291_v20  ;;  %v11293_v26 = vld [vmem:[#allocation31_spill] sm:$0xff]  ;;  %v11295_v30 = vld [vmem:[#allocation28_spill] sm:$0xff] }
 0x9d7   :  { %11286 = vst [vmem:[#allocation27_spill] sm:$0xff] %v9703_v58  ;;  %11288 = vst [vmem:[#allocation24_spill] sm:$0xff] %v9707_v7  ;;  %v9719_v15 = vadd.f32 %v9415_v23, %v11293_v26  ;;  %v9723_v19 = vadd.f32 %v9415_v23, %v11295_v30  ;;  %v11297_v58 = vld [vmem:[#allocation30_spill] sm:$0xff]  ;;  %v11299_v7 = vld [vmem:[#allocation33_spill] sm:$0xff] }
 0x9d8   :  { %11290 = vst [vmem:[#allocation26_spill] sm:$0xff] %v9711_v17  ;;  %11292 = vst [vmem:[#allocation29_spill] sm:$0xff] %v9715_v21  ;;  %v9727_v34 = vadd.f32 %v9415_v23, %v11297_v58  ;;  %v9731_v18 = vadd.f32 %v9415_v23, %v11299_v7  ;;  %v11301_v17 = vld [vmem:[#allocation35_spill] sm:$0xff]  ;;  %v11303_v21 = vld [vmem:[#allocation32_spill] sm:$0xff] }
 0x9d9   :  { %11294 = vst [vmem:[#allocation31_spill] sm:$0xff] %v9719_v15  ;;  %11296 = vst [vmem:[#allocation28_spill] sm:$0xff] %v9723_v19  ;;  %v9735_v20 = vadd.f32 %v9415_v23, %v11301_v17  ;;  %v9739_v26 = vadd.f32 %v9415_v23, %v11303_v21  ;;  %v11305_v15 = vld [vmem:[#allocation34_spill] sm:$0xff]  ;;  %v11307_v19 = vld [vmem:[#allocation37_spill] sm:$0xff] }
 0x9da   :  { %11298 = vst [vmem:[#allocation30_spill] sm:$0xff] %v9727_v34  ;;  %11300 = vst [vmem:[#allocation33_spill] sm:$0xff] %v9731_v18  ;;  %v9743_v30 = vadd.f32 %v9415_v23, %v11305_v15  ;;  %v9747_v58 = vadd.f32 %v9415_v23, %v11307_v19  ;;  %v11309_v34 = vld [vmem:[#allocation39_spill] sm:$0xff]  ;;  %v11311_v18 = vld [vmem:[#allocation36_spill] sm:$0xff] }
 0x9db   :  { %11302 = vst [vmem:[#allocation35_spill] sm:$0xff] %v9735_v20  ;;  %11304 = vst [vmem:[#allocation32_spill] sm:$0xff] %v9739_v26  ;;  %v9751_v7 = vadd.f32 %v9415_v23, %v11309_v34  ;;  %v9755_v17 = vadd.f32 %v9415_v23, %v11311_v18  ;;  %v11313_v20 = vld [vmem:[#allocation38_spill] sm:$0xff]  ;;  %v11315_v26 = vld [vmem:[#allocation41_spill] sm:$0xff] }
 0x9dc   :  { %11306 = vst [vmem:[#allocation34_spill] sm:$0xff] %v9743_v30  ;;  %11308 = vst [vmem:[#allocation37_spill] sm:$0xff] %v9747_v58  ;;  %v9759_v21 = vadd.f32 %v9415_v23, %v11313_v20  ;;  %v9763_v15 = vadd.f32 %v9415_v23, %v11315_v26  ;;  %v11317_v30 = vld [vmem:[#allocation43_spill] sm:$0xff]  ;;  %v11319_v58 = vld [vmem:[#allocation40_spill] sm:$0xff] }
 0x9dd   :  { %11310 = vst [vmem:[#allocation39_spill] sm:$0xff] %v9751_v7  ;;  %11312 = vst [vmem:[#allocation36_spill] sm:$0xff] %v9755_v17  ;;  %v9767_v19 = vadd.f32 %v9415_v23, %v11317_v30  ;;  %v9771_v34 = vadd.f32 %v9415_v23, %v11319_v58  ;;  %v11321_v7 = vld [vmem:[#allocation42_spill] sm:$0xff]  ;;  %v11323_v17 = vld [vmem:[#allocation45_spill] sm:$0xff] }
 0x9de   :  { %11314 = vst [vmem:[#allocation38_spill] sm:$0xff] %v9759_v21  ;;  %11316 = vst [vmem:[#allocation41_spill] sm:$0xff] %v9763_v15  ;;  %v9775_v18 = vadd.f32 %v9415_v23, %v11321_v7  ;;  %v9779_v20 = vadd.f32 %v9415_v23, %v11323_v17  ;;  %v11325_v21 = vld [vmem:[#allocation47_spill] sm:$0xff]  ;;  %v11327_v15 = vld [vmem:[#allocation44_spill] sm:$0xff] }
 0x9df   :  { %11318 = vst [vmem:[#allocation43_spill] sm:$0xff] %v9767_v19  ;;  %11320 = vst [vmem:[#allocation40_spill] sm:$0xff] %v9771_v34  ;;  %v9783_v26 = vadd.f32 %v9415_v23, %v11325_v21  ;;  %v9787_v30 = vadd.f32 %v9415_v23, %v11327_v15  ;;  %v11329_v19 = vld [vmem:[#allocation46_spill] sm:$0xff]  ;;  %v11331_v34 = vld [vmem:[#allocation49_spill] sm:$0xff] }
 0x9e0   :  { %11322 = vst [vmem:[#allocation42_spill] sm:$0xff] %v9775_v18  ;;  %11324 = vst [vmem:[#allocation45_spill] sm:$0xff] %v9779_v20  ;;  %v9791_v58 = vadd.f32 %v9415_v23, %v11329_v19  ;;  %v9795_v7 = vadd.f32 %v9415_v23, %v11331_v34  ;;  %v11333_v18 = vld [vmem:[#allocation51_spill] sm:$0xff]  ;;  %v11335_v20 = vld [vmem:[#allocation48_spill] sm:$0xff] }
 0x9e1   :  { %11326 = vst [vmem:[#allocation47_spill] sm:$0xff] %v9783_v26  ;;  %11328 = vst [vmem:[#allocation44_spill] sm:$0xff] %v9787_v30  ;;  %v9799_v17 = vadd.f32 %v9415_v23, %v11333_v18  ;;  %v9803_v21 = vadd.f32 %v11335_v20, %v9415_v23  ;;  %v11337_v26 = vld [vmem:[#allocation50_spill] sm:$0xff]  ;;  %v11339_v30 = vld [vmem:[#allocation53_spill] sm:$0xff] }
 0x9e2   :  { %11330 = vst [vmem:[#allocation46_spill] sm:$0xff] %v9791_v58  ;;  %11332 = vst [vmem:[#allocation49_spill] sm:$0xff] %v9795_v7  ;;  %v9807_v15 = vadd.f32 %v11337_v26, %v9415_v23  ;;  %v9811_v19 = vadd.f32 %v11339_v30, %v9415_v23  ;;  %v11341_v58 = vld [vmem:[#allocation55_spill] sm:$0xff]  ;;  %v11343_v7 = vld [vmem:[#allocation52_spill] sm:$0xff] }
 0x9e3   :  { %11334 = vst [vmem:[#allocation51_spill] sm:$0xff] %v9799_v17  ;;  %11336 = vst [vmem:[#allocation48_spill] sm:$0xff] %v9803_v21  ;;  %v9815_v34 = vadd.f32 %v11341_v58, %v9415_v23  ;;  %v9819_v18 = vadd.f32 %v11343_v7, %v9415_v23  ;;  %v11345_v17 = vld [vmem:[#allocation54_spill] sm:$0xff]  ;;  %v11346_v21 = vld [vmem:[#allocation57_spill] sm:$0xff] }
 0x9e4   :  { %11338 = vst [vmem:[#allocation50_spill] sm:$0xff] %v9807_v15  ;;  %11340 = vst [vmem:[#allocation53_spill] sm:$0xff] %v9811_v19  ;;  %v9823_v20 = vadd.f32 %v11345_v17, %v9415_v23  ;;  %v9827_v26 = vadd.f32 %v11346_v21, %v9415_v23  ;;  %v11348_v15 = vld [vmem:[#allocation59_spill] sm:$0xff]  ;;  %v11350_v19 = vld [vmem:[#allocation56_spill] sm:$0xff]  ;;  %v9847_v21 = vadd.f32 %v9324_v44, %v9415_v23 }
 0x9e5   :  { %11342 = vst [vmem:[#allocation55_spill] sm:$0xff] %v9815_v34  ;;  %11344 = vst [vmem:[#allocation52_spill] sm:$0xff] %v9819_v18  ;;  %v9831_v30 = vadd.f32 %v11348_v15, %v9415_v23  ;;  %v9835_v58 = vadd.f32 %v11350_v19, %v9415_v23  ;;  %v11352_v34 = vld [vmem:[#allocation58_spill] sm:$0xff]  ;;  %v11354_v18 = vld [vmem:[#allocation61_spill] sm:$0xff] }
 0x9e6   :  { %11347 = vst [vmem:[#allocation54_spill] sm:$0xff] %v9827_v26  ;;  %v9839_v7 = vadd.f32 %v11352_v34, %v9415_v23  ;;  %v9843_v17 = vadd.f32 %v11354_v18, %v9415_v23  ;;  %11356 = vst [vmem:[#allocation61_spill] sm:$0xff] %v9847_v21  ;;  %v11357_v26 = vld [vmem:[#allocation63_spill] sm:$0xff]  ;;  %v9863_v18 = vadd.f32 %v9340_v22, %v9415_v23  ;;  %v11408_v45 = vld [vmem:[#allocation16_spill] sm:$0xff] }
 0x9e7   :  { %11349 = vst [vmem:[#allocation57_spill] sm:$0xff] %v9831_v30  ;;  %11351 = vst [vmem:[#allocation59_spill] sm:$0xff] %v9835_v58  ;;  %v9851_v15 = vadd.f32 %v11357_v26, %v9415_v23  ;;  %v11358_v30 = vld [vmem:[#allocation60_spill] sm:$0xff]  ;;  %v11360_v58 = vld [vmem:[#allocation62_spill] sm:$0xff] }
 0x9e8   :  { %11353 = vst [vmem:[#allocation56_spill] sm:$0xff] %v9839_v7  ;;  %11355 = vst [vmem:[#allocation58_spill] sm:$0xff] %v9843_v17  ;;  %v9855_v19 = vadd.f32 %v11358_v30, %v9415_v23  ;;  %v9859_v34 = vadd.f32 %v11360_v58, %v9415_v23  ;;  %v11363_v17 = vld [vmem:[#allocation65_spill] sm:$0xff]  ;;  %v11365_v21 = vld [vmem:[#allocation67_spill] sm:$0xff]  ;;  %v9875_v30 = vadd.f32 %v9352_v28, %v9415_v23 }
 0x9e9   :  { %11362 = vst [vmem:[#allocation62_spill] sm:$0xff] %v9863_v18  ;;  %v9867_v44 = vadd.f32 %v11363_v17, %v9415_v23  ;;  %v9871_v26 = vadd.f32 %v11365_v21, %v9415_v23  ;;  %v9879_v58 = vadd.f32 %v9356_v25, %v9415_v23  ;;  %v11371_v18 = vld [vmem:[#allocation66_spill] sm:$0xff]  ;;  %v9899_v25 = vadd.f32 %v9379_v3, %v9415_v23  ;;  %v11410_v46 = vld [vmem:[#allocation21_spill] sm:$0xff]  ;;  %v11411_v43 = vld [vmem:[#allocation23_spill] sm:$0xff] }
 0x9ea   :  { %11359 = vst [vmem:[#allocation63_spill] sm:$0xff] %v9855_v19  ;;  %11361 = vst [vmem:[#allocation60_spill] sm:$0xff] %v9859_v34  ;;  %v11369_v34 = vld [vmem:[#allocation64_spill] sm:$0xff]  ;;  %v9887_v17 = vadd.f32 %v11371_v18, %v9415_v23  ;;  %v9919_v3 = vadd.f32 %v9407_v4, %v9415_v23  ;;  %v11409_v42 = vld [vmem:[#allocation18_spill] sm:$0xff] }
 0x9eb   :  { %11364 = vst [vmem:[#allocation65_spill] sm:$0xff] %v9867_v44  ;;  %11366 = vst [vmem:[#allocation67_spill] sm:$0xff] %v9871_v26  ;;  %v9883_v22 = vadd.f32 %v11369_v34, %v9415_v23  ;;  %v11373_v44 = vld [vmem:[#allocation70_spill] sm:$0xff]  ;;  %v11375_v26 = vld [vmem:[#allocation68_spill] sm:$0xff]  ;;  %v9903_v34 = vadd.f32 %v9383_v24, %v9415_v23  ;;  %v3853_v4 = vmax.f32 %v11409_v42, 0.0  ;;  %v11459_v42 = vmax.f32 %v9547_v55, 0.0 }
 0x9ec   :  { %11367 = vst [vmem:[#allocation105_spill] sm:$0xff] %v9875_v30  ;;  %11368 = vst [vmem:[#allocation106_spill] sm:$0xff] %v9879_v58  ;;  %v9891_v21 = vadd.f32 %v11373_v44, %v9415_v23  ;;  %v9895_v28 = vadd.f32 %v11375_v26, %v9415_v23  ;;  %v9915_v26 = vadd.f32 %v9399_v12, %v9415_v23  ;;  %v11412_v40 = vld [vmem:[#allocation20_spill] sm:$0xff]  ;;  %v11413_v53 = vld [vmem:[#allocation22_spill] sm:$0xff]  ;;  %v11458_v12 = vmax.f32 %v9423_v2, 0.0 }
 0x9ed   :  { %11370 = vst [vmem:[#allocation64_spill] sm:$0xff] %v9883_v22  ;;  %11372 = vst [vmem:[#allocation66_spill] sm:$0xff] %v9887_v17  ;;  %v11378_v22 = vld [vmem:[#allocation69_spill] sm:$0xff]  ;;  %v11415_v0 = vld [vmem:[#allocation27_spill] sm:$0xff] }
 0x9ee   :  { %11374 = vst [vmem:[#allocation70_spill] sm:$0xff] %v9891_v21  ;;  %11376 = vst [vmem:[#allocation68_spill] sm:$0xff] %v9895_v28  ;;  %v9907_v18 = vadd.f32 %v11378_v22, %v9415_v23  ;;  %v11380_v17 = vld [vmem:[#allocation73_spill] sm:$0xff]  ;;  %v9927_v22 = vadd.f32 %v9403_v27, %v9415_v23  ;;  %v11416_v47 = vld [vmem:[#allocation24_spill] sm:$0xff] }
 0x9ef   :  { %11377 = vst [vmem:[#allocation107_spill] sm:$0xff] %v9899_v25  ;;  %v9911_v44 = vadd.f32 %v11380_v17, %v9415_v23  ;;  %11382 = vst [vmem:[#allocation108_spill] sm:$0xff] %v9915_v26  ;;  %v11384_v25 = vld [vmem:[#allocation71_spill] sm:$0xff]  ;;  %v3852_v26 = vmax.f32 %v11408_v45, 0.0  ;;  %v11414_v51 = vld [vmem:[#allocation25_spill] sm:$0xff]  ;;  %v11457_v17 = vmax.f32 %v9419_v16, 0.0 }
 0x9f0   :  { %11379 = vst [vmem:[#allocation69_spill] sm:$0xff] %v9907_v18  ;;  %11383 = vst [vmem:[#allocation109_spill] sm:$0xff] %v9919_v3  ;;  %v9923_v24 = vadd.f32 %v11384_v25, %v9415_v23  ;;  %v11387_v18 = vld [vmem:[#allocation103_spill] sm:$0xff]  ;;  %v11440_v10 = vld [vmem:[#allocation48_spill] sm:$0xff]  ;;  %v3538_v45 = vsel %vm164_vm4, %v11458_v12, 0.0  ;;  %v11467_v12 = vmax.f32 %v9431_v32, 0.0 }
 0x9f1   :  { %11381 = vst [vmem:[#allocation73_spill] sm:$0xff] %v9911_v44  ;;  %11386 = vst [vmem:[#allocation110_spill] sm:$0xff] %v9927_v22  ;;  %v4023_v3 = vmax.f32 %v11440_v10, 0.0  ;;  %v11441_v48 = vld [vmem:[#allocation50_spill] sm:$0xff]  ;;  %v11442_v62 = vld [vmem:[#allocation53_spill] sm:$0xff]  ;;  %v3537_v44 = vsel %vm164_vm4, %v11457_v17, 0.0 }
 0x9f2   :  { %11385 = vst [vmem:[#allocation71_spill] sm:$0xff] %v9923_v24  ;;  %v4024_v25 = vmax.f32 %v11441_v48, 0.0  ;;  %v4025_v24 = vmax.f32 %v11442_v62, 0.0  ;;  %v11443_v50 = vld [vmem:[#allocation55_spill] sm:$0xff]  ;;  %v11444_v41 = vld [vmem:[#allocation52_spill] sm:$0xff]  ;;  %v11445_v39 = vld [vmem:[#allocation54_spill] sm:$0xff]  ;;  %v3539_v58 = vadd.f32 %v3538_v45, %v3537_v44 }
 0x9f3   :  { %v4026_v23 = vmax.f32 %v11443_v50, 0.0  ;;  %v4027_v27 = vmax.f32 %v11444_v41, 0.0  ;;  %v11446_v14 = vld [vmem:[#allocation57_spill] sm:$0xff]  ;;  %v11447_v35 = vld [vmem:[#allocation59_spill] sm:$0xff]  ;;  %v11450_v52 = vld [vmem:[#allocation60_spill] sm:$0xff]  ;;  %v3708_v10 = vsel %vm164_vm4, %v11459_v42, 0.0 }
 0x9f4   :  { %v11449_v56 = vld [vmem:[#allocation61_spill] sm:$0xff]  ;;  %v11451_v59 = vld [vmem:[#allocation62_spill] sm:$0xff]  ;;  %v11453_v49 = vld [vmem:[#allocation67_spill] sm:$0xff]  ;;  %v11460_v48 = vmax.f32 %v9551_v33, 0.0  ;;  %v3884_v50 = vsel %vm164_vm4, %v3852_v26, 0.0  ;;  %v3885_v41 = vsel %vm164_vm4, %v3853_v4, 0.0 }
 0x9f5   :  { %v11452_v57 = vld [vmem:[#allocation65_spill] sm:$0xff]  ;;  %v4055_v16 = vsel %vm164_vm4, %v4023_v3, 0.0  ;;  %v4056_v17 = vsel %vm164_vm4, %v4024_v25, 0.0  ;;  %v11466_v4 = vmax.f32 %v9427_v37, 0.0  ;;  %v3886_v30 = vadd.f32 %v3885_v41, %v3884_v50 }
 0x9f6   :  { %v3709_v62 = vsel %vm164_vm4, %v11460_v48, 0.0  ;;  %v11463_v21 = vld [vmem:[#allocation108_spill] sm:$0xff]  ;;  %v4057_v2 = vadd.f32 %v4056_v17, %v4055_v16  ;;  %v3542_v55 = vsel %vm164_vm4, %v11467_v12, 0.0  ;;  %v11468_v42 = vmax.f32 %v9555_v63, 0.0 }
 0x9f7   :  { %v11461_v19 = vld [vmem:[#allocation69_spill] sm:$0xff]  ;;  %v3540_v3 = vsel %vm164_vm4, %v11466_v4, 0.0  ;;  %v3710_v25 = vadd.f32 %v3709_v62, %v3708_v10  ;;  %v11469_v48 = vmax.f32 %v11410_v46, 0.0  ;;  %v4058_v37 = vsel %vm164_vm4, %v4025_v24, 0.0 }
 0x9f8   :  { %v11462_v28 = vld [vmem:[#allocation73_spill] sm:$0xff]  ;;  %v3711_v33 = vsel %vm164_vm4, %v11468_v42, 0.0  ;;  %v3541_v22 = vadd.f32 %v3540_v3, %v3539_v58  ;;  %v4059_v45 = vadd.f32 %v4058_v37, %v4057_v2  ;;  %v11470_v10 = vmax.f32 %v9435_v29, 0.0 }
 0x9f9   :  { %v11464_v1 = vld [vmem:[#allocation109_spill] sm:$0xff]  ;;  %v11465_v7 = vld [vmem:[#allocation71_spill] sm:$0xff]  ;;  %v3887_v26 = vsel %vm164_vm4, %v11469_v48, 0.0  ;;  %v3712_v4 = vadd.f32 %v3711_v33, %v3710_v25  ;;  %v11471_v62 = vmax.f32 %v9559_v60, 0.0  ;;  %v11472_v50 = vmax.f32 %v11411_v43, 0.0 }
 0x9fa   :  { %v3888_v44 = vadd.f32 %v3887_v26, %v3886_v30  ;;  %v3544_v32 = vsel %vm164_vm4, %v11470_v10, 0.0  ;;  %v4060_v41 = vsel %vm164_vm4, %v4026_v23, 0.0  ;;  %v3543_v16 = vadd.f32 %v3542_v55, %v3541_v22 }
 0x9fb   :  { %v3713_v63 = vsel %vm164_vm4, %v11471_v62, 0.0  ;;  %v3889_v46 = vsel %vm164_vm4, %v11472_v50, 0.0  ;;  %v4061_v17 = vadd.f32 %v4060_v41, %v4059_v45  ;;  %v11473_v30 = vmax.f32 %v9439_v6, 0.0 }
 0x9fc   :  { %v3714_v24 = vadd.f32 %v3713_v63, %v3712_v4  ;;  %v3890_v58 = vadd.f32 %v3889_v46, %v3888_v44  ;;  %v11474_v2 = vmax.f32 %v9563_v61, 0.0  ;;  %v11475_v12 = vmax.f32 %v11412_v40, 0.0 }
 0x9fd   :  { %v3546_v29 = vsel %vm164_vm4, %v11473_v30, 0.0  ;;  %v4062_v42 = vsel %vm164_vm4, %v4027_v27, 0.0  ;;  %v3545_v33 = vadd.f32 %v3544_v32, %v3543_v16  ;;  %v11476_v48 = vmax.f32 %v9443_v54, 0.0 }
 0x9fe   :  { %v3715_v60 = vsel %vm164_vm4, %v11474_v2, 0.0  ;;  %v3891_v43 = vsel %vm164_vm4, %v11475_v12, 0.0  ;;  %v4063_v55 = vadd.f32 %v4062_v42, %v4061_v17  ;;  %v11477_v26 = vmax.f32 %v9567_v31, 0.0 }
 0x9ff   :  { %v3716_v23 = vadd.f32 %v3715_v60, %v3714_v24  ;;  %v3892_v22 = vadd.f32 %v3891_v43, %v3890_v58  ;;  %v3548_v6 = vsel %vm164_vm4, %v11476_v48, 0.0  ;;  %v11478_v3 = vmax.f32 %v11413_v53, 0.0 }
 0xa00   :  { %v3717_v61 = vsel %vm164_vm4, %v11477_v26, 0.0  ;;  %v11479_v25 = vmax.f32 %v9823_v20, 0.0  ;;  %v3547_v37 = vadd.f32 %v3546_v29, %v3545_v33  ;;  %v11480_v54 = vmax.f32 %v9447_v13, 0.0 }
 0xa01   :  { %v3893_v40 = vsel %vm164_vm4, %v11478_v3, 0.0  ;;  %v3718_v4 = vadd.f32 %v3717_v61, %v3716_v23  ;;  %v11481_v31 = vmax.f32 %v9571_v8, 0.0  ;;  %v11482_v53 = vmax.f32 %v11414_v51, 0.0  ;;  %v11494_v3 = vld [vmem:[#allocation26_spill] sm:$0xff] }
 0xa02   :  { %v4064_v27 = vsel %vm164_vm4, %v11479_v25, 0.0  ;;  %v3894_v44 = vadd.f32 %v3893_v40, %v3892_v22  ;;  %v3550_v10 = vsel %vm164_vm4, %v11480_v54, 0.0  ;;  %v11483_v20 = vmax.f32 %v11445_v39, 0.0  ;;  %v11496_v25 = vld [vmem:[#allocation56_spill] sm:$0xff] }
 0xa03   :  { %v4065_v45 = vadd.f32 %v4064_v27, %v4063_v55  ;;  %v3719_v32 = vsel %vm164_vm4, %v11481_v31, 0.0  ;;  %v3895_v62 = vsel %vm164_vm4, %v11482_v53, 0.0  ;;  %v3549_v50 = vadd.f32 %v3548_v6, %v3547_v37  ;;  %v11498_v54 = vld [vmem:[#allocation72_spill] sm:$0xff]  ;;  %v11500_v31 = vld [vmem:[#allocation78_spill] sm:$0xff]  ;;  %v11502_v53 = vld [vmem:[#allocation29_spill] sm:$0xff] }
 0xa04   :  { %v4066_v63 = vsel %vm164_vm4, %v11483_v20, 0.0  ;;  %v3720_v46 = vadd.f32 %v3719_v32, %v3718_v4  ;;  %v3896_v41 = vadd.f32 %v3895_v62, %v3894_v44  ;;  %v11484_v13 = vmax.f32 %v9451_v38, 0.0 }
 0xa05   :  { %v4067_v16 = vadd.f32 %v4066_v63, %v4065_v45  ;;  %v11485_v8 = vmax.f32 %v9575_v11, 0.0  ;;  %v11486_v51 = vmax.f32 %v11415_v0, 0.0  ;;  %v11487_v39 = vmax.f32 %v11446_v14, 0.0  ;;  %v11504_v63 = vld [vmem:[#allocation58_spill] sm:$0xff] }
 0xa06   :  { %v3552_v24 = vsel %vm164_vm4, %v11484_v13, 0.0  ;;  %v3551_v29 = vadd.f32 %v3550_v10, %v3549_v50  ;;  %v11488_v38 = vmax.f32 %v9455_v9, 0.0  ;;  %v11489_v11 = vmax.f32 %v9579_v5, 0.0 }
 0xa07   :  { %v3721_v58 = vsel %vm164_vm4, %v11485_v8, 0.0  ;;  %v3897_v17 = vsel %vm164_vm4, %v11486_v51, 0.0  ;;  %v4068_v30 = vsel %vm164_vm4, %v11487_v39, 0.0  ;;  %v11490_v0 = vmax.f32 %v11416_v47, 0.0  ;;  %v11506_v8 = vld [vmem:[#allocation75_spill] sm:$0xff] }
 0xa08   :  { %v3898_v2 = vadd.f32 %v3897_v17, %v3896_v41  ;;  %v3722_v60 = vadd.f32 %v3721_v58, %v3720_v46  ;;  %v4069_v12 = vadd.f32 %v4068_v30, %v4067_v16  ;;  %v3554_v43 = vsel %vm164_vm4, %v11488_v38, 0.0  ;;  %v11508_v17 = vld [vmem:[#allocation79_spill] sm:$0xff] }
 0xa09   :  { %v3723_v42 = vsel %vm164_vm4, %v11489_v11, 0.0  ;;  %v3899_v33 = vsel %vm164_vm4, %v11490_v0, 0.0  ;;  %v11491_v14 = vmax.f32 %v11447_v35, 0.0  ;;  %v3553_v22 = vadd.f32 %v3552_v24, %v3551_v29  ;;  %v11510_v29 = vld [vmem:[#allocation31_spill] sm:$0xff] }
 0xa0a   :  { %v3900_v55 = vadd.f32 %v3899_v33, %v3898_v2  ;;  %v3724_v48 = vadd.f32 %v3723_v42, %v3722_v60  ;;  %v11492_v9 = vmax.f32 %v9459_v36, 0.0  ;;  %v11493_v5 = vmax.f32 %v11387_v18, 0.0  ;;  %v11513_v33 = vld [vmem:[#allocation77_spill] sm:$0xff] }
 0xa0b   :  { %v4070_v23 = vsel %vm164_vm4, %v11491_v14, 0.0  ;;  %v11495_v47 = vmax.f32 %v11494_v3, 0.0  ;;  %v11497_v35 = vmax.f32 %v11496_v25, 0.0  ;;  %v3555_v37 = vadd.f32 %v3554_v43, %v3553_v22  ;;  %v11515_v22 = vld [vmem:[#allocation80_spill] sm:$0xff]  ;;  %v11520_v25 = vld [vmem:[#allocation74_spill] sm:$0xff] }
 0xa0c   :  { %v4071_v6 = vadd.f32 %v4070_v23, %v4069_v12  ;;  %v3556_v26 = vsel %vm164_vm4, %v11492_v9, 0.0  ;;  %v3725_v61 = vsel %vm164_vm4, %v11493_v5, 0.0  ;;  %v11499_v36 = vmax.f32 %v11498_v54, 0.0 }
 0xa0d   :  { %v3901_v40 = vsel %vm164_vm4, %v11495_v47, 0.0  ;;  %v4072_v27 = vsel %vm164_vm4, %v11497_v35, 0.0  ;;  %v3726_v44 = vadd.f32 %v3725_v61, %v3724_v48  ;;  %v11501_v18 = vmax.f32 %v11500_v31, 0.0 }
 0xa0e   :  { %v3902_v4 = vadd.f32 %v3901_v40, %v3900_v55  ;;  %v4073_v45 = vadd.f32 %v4072_v27, %v4071_v6  ;;  %v3558_v10 = vsel %vm164_vm4, %v11499_v36, 0.0  ;;  %v11503_v62 = vmax.f32 %v11502_v53, 0.0  ;;  %v11517_v6 = vld [vmem:[#allocation28_spill] sm:$0xff] }
 0xa0f   :  { %v3727_v32 = vsel %vm164_vm4, %v11501_v18, 0.0  ;;  %v11505_v50 = vmax.f32 %v11504_v63, 0.0  ;;  %v3557_v41 = vadd.f32 %v3556_v26, %v3555_v37  ;;  %v11507_v58 = vmax.f32 %v11506_v8, 0.0  ;;  %v11522_v37 = vld [vmem:[#allocation81_spill] sm:$0xff] }
 0xa10   :  { %v3903_v20 = vsel %vm164_vm4, %v11503_v62, 0.0  ;;  %v3728_v13 = vadd.f32 %v3727_v32, %v3726_v44  ;;  %v11509_v39 = vmax.f32 %v11508_v17, 0.0  ;;  %v11511_v2 = vmax.f32 %v11510_v29, 0.0 }
 0xa11   :  { %v4074_v46 = vsel %vm164_vm4, %v11505_v50, 0.0  ;;  %v3904_v16 = vadd.f32 %v3903_v20, %v3902_v4  ;;  %v3560_v51 = vsel %vm164_vm4, %v11507_v58, 0.0  ;;  %v11512_v12 = vmax.f32 %v11449_v56, 0.0  ;;  %v11528_v20 = vld [vmem:[#allocation76_spill] sm:$0xff] }
 0xa12   :  { %v4075_v24 = vadd.f32 %v4074_v46, %v4073_v45  ;;  %v3729_v30 = vsel %vm164_vm4, %v11509_v39, 0.0  ;;  %v3905_v60 = vsel %vm164_vm4, %v11511_v2, 0.0  ;;  %v3559_v43 = vadd.f32 %v3558_v10, %v3557_v41  ;;  %v11524_v45 = vld [vmem:[#allocation30_spill] sm:$0xff]  ;;  %v11526_v10 = vld [vmem:[#allocation63_spill] sm:$0xff] }
 0xa13   :  { %v4076_v38 = vsel %vm164_vm4, %v11512_v12, 0.0  ;;  %v3906_v11 = vadd.f32 %v3905_v60, %v3904_v16  ;;  %v3730_v42 = vadd.f32 %v3729_v30, %v3728_v13  ;;  %v11514_v14 = vmax.f32 %v11513_v33, 0.0  ;;  %v11530_v46 = vld [vmem:[#allocation82_spill] sm:$0xff]  ;;  %v11532_v13 = vld [vmem:[#allocation33_spill] sm:$0xff]  ;;  %v11535_v2 = vld [vmem:[#allocation87_spill] sm:$0xff] }
 0xa14   :  { %v4077_v0 = vadd.f32 %v4076_v38, %v4075_v24  ;;  %v11516_v55 = vmax.f32 %v11515_v22, 0.0  ;;  %v11518_v9 = vmax.f32 %v11517_v6, 0.0  ;;  %v11519_v56 = vmax.f32 %v9851_v15, 0.0  ;;  %v11537_v38 = vld [vmem:[#allocation83_spill] sm:$0xff]  ;;  %v11542_v6 = vld [vmem:[#allocation88_spill] sm:$0xff] }
 0xa15   :  { %v3562_v23 = vsel %vm164_vm4, %v11514_v14, 0.0  ;;  %v3561_v61 = vadd.f32 %v3560_v51, %v3559_v43  ;;  %v11521_v35 = vmax.f32 %v11520_v25, 0.0  ;;  %v11523_v4 = vmax.f32 %v11522_v37, 0.0 }
 0xa16   :  { %v3731_v48 = vsel %vm164_vm4, %v11516_v55, 0.0  ;;  %v3907_v26 = vsel %vm164_vm4, %v11518_v9, 0.0  ;;  %v4078_v5 = vsel %vm164_vm4, %v11519_v56, 0.0  ;;  %v11525_v54 = vmax.f32 %v11524_v45, 0.0  ;;  %v11544_v56 = vld [vmem:[#allocation5_spill] sm:$0xff] }
 0xa17   :  { %v3908_v3 = vadd.f32 %v3907_v26, %v3906_v11  ;;  %v3732_v47 = vadd.f32 %v3731_v48, %v3730_v42  ;;  %v4079_v40 = vadd.f32 %v4078_v5, %v4077_v0  ;;  %v3564_v27 = vsel %vm164_vm4, %v11521_v35, 0.0  ;;  %v11539_v42 = vld [vmem:[#allocation35_spill] sm:$0xff] }
 0xa18   :  { %v3733_v44 = vsel %vm164_vm4, %v11523_v4, 0.0  ;;  %v3909_v36 = vsel %vm164_vm4, %v11525_v54, 0.0  ;;  %v11527_v15 = vmax.f32 %v11526_v10, 0.0  ;;  %v3563_v18 = vadd.f32 %v3562_v23, %v3561_v61 }
 0xa19   :  { %v3910_v32 = vadd.f32 %v3909_v36, %v3908_v3  ;;  %v3734_v53 = vadd.f32 %v3733_v44, %v3732_v47  ;;  %v11529_v63 = vmax.f32 %v11528_v20, 0.0  ;;  %v11531_v41 = vmax.f32 %v11530_v46, 0.0  ;;  %v11546_v3 = vld [vmem:[#allocation32_spill] sm:$0xff]  ;;  %v11549_v44 = vld [vmem:[#allocation89_spill] sm:$0xff]  ;;  %v11551_v36 = vld [vmem:[#allocation7_spill] sm:$0xff] }
 0xa1a   :  { %v4080_v31 = vsel %vm164_vm4, %v11527_v15, 0.0  ;;  %v11533_v24 = vmax.f32 %v11532_v13, 0.0  ;;  %v11534_v58 = vmax.f32 %v11450_v52, 0.0  ;;  %v3565_v17 = vadd.f32 %v3564_v27, %v3563_v18  ;;  %v11556_v46 = vld [vmem:[#allocation90_spill] sm:$0xff]  ;;  %v11558_v13 = vld [vmem:[#allocation104_spill] sm:$0xff] }
 0xa1b   :  { %v4081_v62 = vadd.f32 %v4080_v31, %v4079_v40  ;;  %v3566_v50 = vsel %vm164_vm4, %v11529_v63, 0.0  ;;  %v3735_v16 = vsel %vm164_vm4, %v11531_v41, 0.0  ;;  %v11536_v60 = vmax.f32 %v11535_v2, 0.0  ;;  %v11553_v31 = vld [vmem:[#allocation34_spill] sm:$0xff] }
 0xa1c   :  { %v3911_v8 = vsel %vm164_vm4, %v11533_v24, 0.0  ;;  %v4082_v51 = vsel %vm164_vm4, %v11534_v58, 0.0  ;;  %v3736_v30 = vadd.f32 %v3735_v16, %v3734_v53  ;;  %v11538_v43 = vmax.f32 %v11537_v38, 0.0  ;;  %v11560_v58 = vld [vmem:[#allocation37_spill] sm:$0xff]  ;;  %v11564_v38 = vld [vmem:[#allocation91_spill] sm:$0xff] }
 0xa1d   :  { %v3912_v39 = vadd.f32 %v3911_v8, %v3910_v32  ;;  %v4083_v29 = vadd.f32 %v4082_v51, %v4081_v62  ;;  %v3568_v12 = vsel %vm164_vm4, %v11536_v60, 0.0  ;;  %v11540_v0 = vmax.f32 %v11539_v42, 0.0  ;;  %v11566_v42 = vld [vmem:[#allocation9_spill] sm:$0xff] }
 0xa1e   :  { %v3737_v11 = vsel %vm164_vm4, %v11538_v43, 0.0  ;;  %v11541_v52 = vmax.f32 %v11451_v59, 0.0  ;;  %v3567_v23 = vadd.f32 %v3566_v50, %v3565_v17  ;;  %v11543_v9 = vmax.f32 %v11542_v6, 0.0 }
 0xa1f   :  { %v3913_v33 = vsel %vm164_vm4, %v11540_v0, 0.0  ;;  %v3738_v55 = vadd.f32 %v3737_v11, %v3736_v30  ;;  %v11545_v5 = vmax.f32 %v11544_v56, 0.0  ;;  %v11547_v47 = vmax.f32 %v11546_v3, 0.0 }
 0xa20   :  { %v4084_v14 = vsel %vm164_vm4, %v11541_v52, 0.0  ;;  %v3914_v22 = vadd.f32 %v3913_v33, %v3912_v39  ;;  %v3570_v26 = vsel %vm164_vm4, %v11543_v9, 0.0  ;;  %v11548_v59 = vmax.f32 %v11452_v57, 0.0  ;;  %v11562_v39 = vld [vmem:[#allocation105_spill] sm:$0xff]  ;;  %v11568_v52 = vld [vmem:[#allocation39_spill] sm:$0xff] }
 0xa21   :  { %v4085_v48 = vadd.f32 %v4084_v14, %v4083_v29  ;;  %v3739_v61 = vsel %vm164_vm4, %v11545_v5, 0.0  ;;  %v3915_v40 = vsel %vm164_vm4, %v11547_v47, 0.0  ;;  %v3569_v35 = vadd.f32 %v3568_v12, %v3567_v23  ;;  %v11572_v5 = vld [vmem:[#allocation92_spill] sm:$0xff]  ;;  %v11574_v47 = vld [vmem:[#allocation6_spill] sm:$0xff] }
 0xa22   :  { %v4086_v25 = vsel %vm164_vm4, %v11548_v59, 0.0  ;;  %v3916_v27 = vadd.f32 %v3915_v40, %v3914_v22  ;;  %v3740_v37 = vadd.f32 %v3739_v61, %v3738_v55  ;;  %v11550_v45 = vmax.f32 %v11549_v44, 0.0  ;;  %v11570_v22 = vld [vmem:[#allocation106_spill] sm:$0xff] }
 0xa23   :  { %v4087_v4 = vadd.f32 %v4086_v25, %v4085_v48  ;;  %v11552_v10 = vmax.f32 %v11551_v36, 0.0  ;;  %v11554_v18 = vmax.f32 %v11553_v31, 0.0  ;;  %v11555_v57 = vmax.f32 %v11453_v49, 0.0  ;;  %v11576_v25 = vld [vmem:[#allocation36_spill] sm:$0xff] }
 0xa24   :  { %v3572_v54 = vsel %vm164_vm4, %v11550_v45, 0.0  ;;  %v3571_v62 = vadd.f32 %v3570_v26, %v3569_v35  ;;  %v11557_v41 = vmax.f32 %v11556_v46, 0.0  ;;  %v11559_v24 = vmax.f32 %v11558_v13, 0.0 }
 0xa25   :  { %v3741_v15 = vsel %vm164_vm4, %v11552_v10, 0.0  ;;  %v3917_v32 = vsel %vm164_vm4, %v11554_v18, 0.0  ;;  %v4088_v53 = vsel %vm164_vm4, %v11555_v57, 0.0  ;;  %v11561_v51 = vmax.f32 %v11560_v58, 0.0  ;;  %v11588_v58 = vld [vmem:[#allocation94_spill] sm:$0xff] }
 0xa26   :  { %v3918_v20 = vadd.f32 %v3917_v32, %v3916_v27  ;;  %v3742_v63 = vadd.f32 %v3741_v15, %v3740_v37  ;;  %v4089_v50 = vadd.f32 %v4088_v53, %v4087_v4  ;;  %v3574_v16 = vsel %vm164_vm4, %v11557_v41, 0.0  ;;  %v11578_v37 = vld [vmem:[#allocation64_spill] sm:$0xff]  ;;  %v11580_v15 = vld [vmem:[#allocation93_spill] sm:$0xff] }
 0xa27   :  { %v3743_v8 = vsel %vm164_vm4, %v11559_v24, 0.0  ;;  %v3919_v17 = vsel %vm164_vm4, %v11561_v51, 0.0  ;;  %v11563_v49 = vmax.f32 %v11562_v39, 0.0  ;;  %v3573_v29 = vadd.f32 %v3572_v54, %v3571_v62  ;;  %v11582_v32 = vld [vmem:[#allocation8_spill] sm:$0xff]  ;;  %v11584_v62 = vld [vmem:[#allocation38_spill] sm:$0xff]  ;;  %v11590_v39 = vld [vmem:[#allocation11_spill] sm:$0xff] }
 0xa28   :  { %v3920_v2 = vadd.f32 %v3919_v17, %v3918_v20  ;;  %v3744_v60 = vadd.f32 %v3743_v8, %v3742_v63  ;;  %v11565_v43 = vmax.f32 %v11564_v38, 0.0  ;;  %v11567_v0 = vmax.f32 %v11566_v42, 0.0 }
 0xa29   :  { %v4090_v30 = vsel %vm164_vm4, %v11563_v49, 0.0  ;;  %v11569_v14 = vmax.f32 %v11568_v52, 0.0  ;;  %v11571_v55 = vmax.f32 %v11570_v22, 0.0  ;;  %v3575_v6 = vadd.f32 %v3574_v16, %v3573_v29  ;;  %v11592_v29 = vld [vmem:[#allocation41_spill] sm:$0xff]  ;;  %v11596_v52 = vld [vmem:[#allocation95_spill] sm:$0xff] }
 0xa2a   :  { %v4091_v12 = vadd.f32 %v4090_v30, %v4089_v50  ;;  %v3576_v11 = vsel %vm164_vm4, %v11565_v43, 0.0  ;;  %v3745_v33 = vsel %vm164_vm4, %v11567_v0, 0.0  ;;  %v11573_v61 = vmax.f32 %v11572_v5, 0.0  ;;  %v11586_v50 = vld [vmem:[#allocation66_spill] sm:$0xff]  ;;  %v11598_v22 = vld [vmem:[#allocation13_spill] sm:$0xff] }
 0xa2b   :  { %v3921_v23 = vsel %vm164_vm4, %v11569_v14, 0.0  ;;  %v4092_v48 = vsel %vm164_vm4, %v11571_v55, 0.0  ;;  %v3746_v26 = vadd.f32 %v3745_v33, %v3744_v60  ;;  %v11575_v40 = vmax.f32 %v11574_v47, 0.0 }
 0xa2c   :  { %v3922_v9 = vadd.f32 %v3921_v23, %v3920_v2  ;;  %v4093_v56 = vadd.f32 %v4092_v48, %v4091_v12  ;;  %v3578_v3 = vsel %vm164_vm4, %v11573_v61, 0.0  ;;  %v11577_v35 = vmax.f32 %v11576_v25, 0.0  ;;  %v11594_v12 = vld [vmem:[#allocation70_spill] sm:$0xff]  ;;  %v11604_v25 = vld [vmem:[#allocation96_spill] sm:$0xff] }
 0xa2d   :  { %v3747_v59 = vsel %vm164_vm4, %v11575_v40, 0.0  ;;  %v11579_v4 = vmax.f32 %v11578_v37, 0.0  ;;  %v3577_v45 = vadd.f32 %v3576_v11, %v3575_v6  ;;  %v11581_v31 = vmax.f32 %v11580_v15, 0.0  ;;  %v11600_v6 = vld [vmem:[#allocation43_spill] sm:$0xff]  ;;  %v11606_v37 = vld [vmem:[#allocation10_spill] sm:$0xff] }
 0xa2e   :  { %v3923_v27 = vsel %vm164_vm4, %v11577_v35, 0.0  ;;  %v3748_v36 = vadd.f32 %v3747_v59, %v3746_v26  ;;  %v11583_v57 = vmax.f32 %v11582_v32, 0.0  ;;  %v11585_v20 = vmax.f32 %v11584_v62, 0.0 }
 0xa2f   :  { %v4094_v44 = vsel %vm164_vm4, %v11579_v4, 0.0  ;;  %v3924_v54 = vadd.f32 %v3923_v27, %v3922_v9  ;;  %v3580_v18 = vsel %vm164_vm4, %v11581_v31, 0.0  ;;  %v11587_v46 = vmax.f32 %v11586_v50, 0.0 }
 0xa30   :  { %v4095_v10 = vadd.f32 %v4094_v44, %v4093_v56  ;;  %v3749_v53 = vsel %vm164_vm4, %v11583_v57, 0.0  ;;  %v3925_v63 = vsel %vm164_vm4, %v11585_v20, 0.0  ;;  %v3579_v16 = vadd.f32 %v3578_v3, %v3577_v45  ;;  %v11602_v56 = vld [vmem:[#allocation68_spill] sm:$0xff] }
 0xa31   :  { %v4096_v41 = vsel %vm164_vm4, %v11587_v46, 0.0  ;;  %v3926_v13 = vadd.f32 %v3925_v63, %v3924_v54  ;;  %v3750_v24 = vadd.f32 %v3749_v53, %v3748_v36  ;;  %v11589_v51 = vmax.f32 %v11588_v58, 0.0  ;;  %v11608_v45 = vld [vmem:[#allocation40_spill] sm:$0xff]  ;;  %v11612_v63 = vld [vmem:[#allocation97_spill] sm:$0xff] }
 0xa32   :  { %v4097_v8 = vadd.f32 %v4096_v41, %v4095_v10  ;;  %v11591_v49 = vmax.f32 %v11590_v39, 0.0  ;;  %v11593_v2 = vmax.f32 %v11592_v29, 0.0  ;;  %v11595_v38 = vmax.f32 %v11594_v12, 0.0  ;;  %v11610_v10 = vld [vmem:[#allocation107_spill] sm:$0xff]  ;;  %v11614_v41 = vld [vmem:[#allocation12_spill] sm:$0xff]  ;;  %v11619_v12 = vld [vmem:[#allocation98_spill] sm:$0xff] }
 0xa33   :  { %v3582_v17 = vsel %vm164_vm4, %v11589_v51, 0.0  ;;  %v3581_v11 = vadd.f32 %v3580_v18, %v3579_v16  ;;  %v11597_v14 = vmax.f32 %v11596_v52, 0.0  ;;  %v11599_v55 = vmax.f32 %v11598_v22, 0.0  ;;  %v4230_v18 = vpop.f32.mrb[56].mxu1 }
 0xa34   :  { %v3751_v30 = vsel %vm164_vm4, %v11591_v49, 0.0  ;;  %v3927_v60 = vsel %vm164_vm4, %v11593_v2, 0.0  ;;  %v4098_v43 = vsel %vm164_vm4, %v11595_v38, 0.0  ;;  %v11601_v9 = vmax.f32 %v11600_v6, 0.0  ;;  %v6504_v20 = vpop.f32.mrb[57].mxu1 }
 0xa35   :  { %v3928_v42 = vadd.f32 %v3927_v60, %v3926_v13  ;;  %v3752_v0 = vadd.f32 %v3751_v30, %v3750_v24  ;;  %v4099_v33 = vadd.f32 %v4098_v43, %v4097_v8  ;;  %v3584_v23 = vsel %vm164_vm4, %v11597_v14, 0.0  ;;  %v11616_v24 = vld [vmem:[#allocation42_spill] sm:$0xff]  ;;  %v4233_v39 = vpop.f32.mrb[58].mxu1 }
 0xa36   :  { %v3753_v48 = vsel %vm164_vm4, %v11599_v55, 0.0  ;;  %v3929_v26 = vsel %vm164_vm4, %v11601_v9, 0.0  ;;  %v11603_v5 = vmax.f32 %v11602_v56, 0.0  ;;  %v3583_v3 = vadd.f32 %v3582_v17, %v3581_v11  ;;  %v6505_v60 = vpop.f32.mrb[59].mxu1  ;;  %v11621_v11 = vld [vmem:[#allocation15_spill] sm:$0xff] }
 0xa37   :  { %v3930_v47 = vadd.f32 %v3929_v26, %v3928_v42  ;;  %v3754_v40 = vadd.f32 %v3753_v48, %v3752_v0  ;;  %v11605_v35 = vmax.f32 %v11604_v25, 0.0  ;;  %v11607_v4 = vmax.f32 %v11606_v37, 0.0  ;;  %v11626_v9 = vld [vmem:[#allocation99_spill] sm:$0xff] }
 0xa38   :  { %v4100_v61 = vsel %vm164_vm4, %v11603_v5, 0.0  ;;  %v11609_v54 = vmax.f32 %v11608_v45, 0.0  ;;  %v11611_v15 = vmax.f32 %v11610_v10, 0.0  ;;  %v3585_v32 = vadd.f32 %v3584_v23, %v3583_v3  ;;  %v11628_v5 = vld [vmem:[#allocation85_spill] sm:$0xff] }
 0xa39   :  { %v4101_v59 = vadd.f32 %v4100_v61, %v4099_v33  ;;  %v3586_v27 = vsel %vm164_vm4, %v11605_v35, 0.0  ;;  %v3755_v44 = vsel %vm164_vm4, %v11607_v4, 0.0  ;;  %v11613_v50 = vmax.f32 %v11612_v63, 0.0  ;;  %v11623_v33 = vld [vmem:[#allocation45_spill] sm:$0xff] }
 0xa3a   :  { %v3931_v36 = vsel %vm164_vm4, %v11609_v54, 0.0  ;;  %v4102_v31 = vsel %vm164_vm4, %v11611_v15, 0.0  ;;  %v3756_v53 = vadd.f32 %v3755_v44, %v3754_v40  ;;  %v11615_v16 = vmax.f32 %v11614_v41, 0.0  ;;  %v11633_v44 = vld [vmem:[#allocation100_spill] sm:$0xff] }
 0xa3b   :  { %v3932_v57 = vadd.f32 %v3931_v36, %v3930_v47  ;;  %v4103_v62 = vadd.f32 %v4102_v31, %v4101_v59  ;;  %v3588_v46 = vsel %vm164_vm4, %v11613_v50, 0.0  ;;  %v11617_v8 = vmax.f32 %v11616_v24, 0.0  ;;  %v11630_v47 = vld [vmem:[#allocation47_spill] sm:$0xff]  ;;  %v11635_v36 = vld [vmem:[#allocation14_spill] sm:$0xff]  ;;  %v11637_v31 = vld [vmem:[#allocation44_spill] sm:$0xff] }
 0xa3c   :  { %v3757_v13 = vsel %vm164_vm4, %v11615_v16, 0.0  ;;  %v11618_v51 = vmax.f32 %v9903_v34, 0.0  ;;  %v3587_v49 = vadd.f32 %v3586_v27, %v3585_v32  ;;  %v11620_v38 = vmax.f32 %v11619_v12, 0.0  ;;  %v11640_v16 = vld [vmem:[#allocation84_spill] sm:$0xff] }
 0xa3d   :  { %v3933_v58 = vsel %vm164_vm4, %v11617_v8, 0.0  ;;  %v3758_v29 = vadd.f32 %v3757_v13, %v3756_v53  ;;  %v11622_v42 = vmax.f32 %v11621_v11, 0.0  ;;  %v11624_v52 = vmax.f32 %v11623_v33, 0.0  ;;  %v11642_v8 = vld [vmem:[#allocation46_spill] sm:$0xff] }
 0xa3e   :  { %v4104_v17 = vsel %vm164_vm4, %v11618_v51, 0.0  ;;  %v3934_v30 = vadd.f32 %v3933_v58, %v3932_v57  ;;  %v3590_v43 = vsel %vm164_vm4, %v11620_v38, 0.0  ;;  %v11625_v14 = vmax.f32 %v11461_v19, 0.0  ;;  %v11645_v38 = vld [vmem:[#allocation101_spill] sm:$0xff] }
 0xa3f   :  { %v4105_v2 = vadd.f32 %v4104_v17, %v4103_v62  ;;  %v3759_v0 = vsel %vm164_vm4, %v11622_v42, 0.0  ;;  %v3935_v34 = vsel %vm164_vm4, %v11624_v52, 0.0  ;;  %v3589_v22 = vadd.f32 %v3588_v46, %v3587_v49  ;;  %v4286_v62 = vpop.f32.mrb[60].mxu1  ;;  %v11647_v42 = vld [vmem:[#allocation17_spill] sm:$0xff] }
 0xa40   :  { %v4106_v23 = vsel %vm164_vm4, %v11625_v14, 0.0  ;;  %v3936_v55 = vadd.f32 %v3935_v34, %v3934_v30  ;;  %v3760_v48 = vadd.f32 %v3759_v0, %v3758_v29  ;;  %v11627_v26 = vmax.f32 %v11626_v9, 0.0  ;;  %v6510_v41 = vpop.f32.mrb[61].mxu1  ;;  %v11649_v52 = vld [vmem:[#allocation49_spill] sm:$0xff] }
 0xa41   :  { %v4107_v6 = vadd.f32 %v4106_v23, %v4105_v2  ;;  %v11629_v61 = vmax.f32 %v11628_v5, 0.0  ;;  %v11631_v40 = vmax.f32 %v11630_v47, 0.0  ;;  %v11632_v19 = vmax.f32 %v11462_v28, 0.0  ;;  %v4289_v49 = vpop.f32.mrb[62].mxu1 }
 0xa42   :  { %v3592_v56 = vsel %vm164_vm4, %v11627_v26, 0.0  ;;  %v3591_v35 = vadd.f32 %v3590_v43, %v3589_v22  ;;  %v11634_v45 = vmax.f32 %v11633_v44, 0.0  ;;  %v11636_v10 = vmax.f32 %v11635_v36, 0.0  ;;  %v6511_v12 = vpop.f32.mrb[63].mxu1 }
 0xa43   :  { %v3761_v3 = vsel %vm164_vm4, %v11629_v61, 0.0  ;;  %v3937_v59 = vsel %vm164_vm4, %v11631_v40, 0.0  ;;  %v4108_v25 = vsel %vm164_vm4, %v11632_v19, 0.0  ;;  %v11638_v32 = vmax.f32 %v11637_v31, 0.0 }
 0xa44   :  { %v3938_v27 = vadd.f32 %v3937_v59, %v3936_v55  ;;  %v3762_v37 = vadd.f32 %v3761_v3, %v3760_v48  ;;  %v4109_v4 = vadd.f32 %v4108_v25, %v4107_v6  ;;  %v3594_v54 = vsel %vm164_vm4, %v11634_v45, 0.0  ;;  %v11652_v6 = vld [vmem:[#allocation102_spill] sm:$0xff]  ;;  %v11656_v3 = vld [vmem:[#allocation51_spill] sm:$0xff] }
 0xa45   :  { %v3763_v15 = vsel %vm164_vm4, %v11636_v10, 0.0  ;;  %v3939_v57 = vsel %vm164_vm4, %v11638_v32, 0.0  ;;  %v11639_v28 = vmax.f32 %v11463_v21, 0.0  ;;  %v3593_v20 = vadd.f32 %v3592_v56, %v3591_v35  ;;  %v11654_v56 = vld [vmem:[#allocation19_spill] sm:$0xff]  ;;  %v11658_v59 = vld [vmem:[#allocation110_spill] sm:$0xff] }
 0xa46   :  { %v3940_v63 = vadd.f32 %v3939_v57, %v3938_v27  ;;  %v3764_v50 = vadd.f32 %v3763_v15, %v3762_v37  ;;  %v11641_v13 = vmax.f32 %v11640_v16, 0.0  ;;  %v11643_v58 = vmax.f32 %v11642_v8, 0.0 }
 0xa47   :  { %v4110_v53 = vsel %vm164_vm4, %v11639_v28, 0.0  ;;  %v11644_v17 = vmax.f32 %v11464_v1, 0.0  ;;  %v10403_v39 = vadd.f32 %v4286_v62, %v4230_v18  ;;  %v3595_v30 = vadd.f32 %v3594_v54, %v3593_v20 }
 0xa48   :  { %v4111_v46 = vadd.f32 %v4110_v53, %v4109_v4  ;;  %v3765_v24 = vsel %vm164_vm4, %v11641_v13, 0.0  ;;  %v3941_v51 = vsel %vm164_vm4, %v11643_v58, 0.0  ;;  %v11646_v43 = vmax.f32 %v11645_v38, 0.0 }
 0xa49   :  { %v4112_v21 = vsel %vm164_vm4, %v11644_v17, 0.0  ;;  %v3942_v29 = vadd.f32 %v3941_v51, %v3940_v63  ;;  %v3766_v2 = vadd.f32 %v3765_v24, %v3764_v50  ;;  %v11648_v0 = vmax.f32 %v11647_v42, 0.0 }
 0xa4a   :  { %v4113_v60 = vadd.f32 %v4112_v21, %v4111_v46  ;;  %v3596_v11 = vsel %vm164_vm4, %v11646_v43, 0.0  ;;  %v11650_v1 = vmax.f32 %v11649_v52, 0.0  ;;  %v11651_v18 = vmax.f32 %v11465_v7, 0.0  ;;  %v11660_v46 = vld [vmem:[#allocation86_spill] sm:$0xff]  ;;  %v6845_v52 = vld [vmem:[%s10669_s20] sm:$0xff]  }
 0xa4b   :  { %v3767_v33 = vsel %vm164_vm4, %v11648_v0, 0.0  ;;  %v3597_v23 = vadd.f32 %v3596_v11, %v3595_v30  ;;  %v11653_v9 = vmax.f32 %v11652_v6, 0.0  ;;  %v11655_v5 = vmax.f32 %v11654_v56, 0.0  ;;  %v6911_v56 = vld [vmem:[%s10667_s18] sm:$0xff]  }
 0xa4c   :  { %v3943_v34 = vsel %vm164_vm4, %v11650_v1, 0.0  ;;  %v4114_v14 = vsel %vm164_vm4, %v11651_v18, 0.0  ;;  %v3768_v55 = vadd.f32 %v3767_v33, %v3766_v2  ;;  %v11657_v47 = vmax.f32 %v11656_v3, 0.0  ;;  %v6847_v18 = vld [vmem:[%s10669_s20 + $0x10] sm:$0xff]  }
 0xa4d   :  { %v3944_v22 = vadd.f32 %v3943_v34, %v3942_v29  ;;  %v4115_v48 = vadd.f32 %v4114_v14, %v4113_v60  ;;  %v3598_v26 = vsel %vm164_vm4, %v11653_v9, 0.0  ;;  %v3769_v61 = vsel %vm164_vm4, %v11655_v5, 0.0  ;;  %v6846_v34 = vld [vmem:[%s10669_s20 + $0x8] sm:$0xff]   ;;  %v6848_v14 = vld [vmem:[%s10669_s20 + $0x18] sm:$0xff]  }
 0xa4e   :  { %v3945_v40 = vsel %vm164_vm4, %v11657_v47, 0.0  ;;  %v11659_v7 = vmax.f32 %v11658_v59, 0.0  ;;  %v3599_v25 = vadd.f32 %v3598_v26, %v3597_v23  ;;  %v3770_v27 = vadd.f32 %v3769_v61, %v3768_v55  ;;  %v5474_v23 = vld [vmem:[%s10668_s19] ss:$0 sm:$0xff]  ;;  %v6912_v5 = vld [vmem:[%s10667_s18 + $0x8] sm:$0xff]   ;;  %v6852_v59 = vld [vmem:[%s10669_s20 + $0x38] sm:$0xff]  }
 0xa4f   :  { %v3946_v35 = vadd.f32 %v3945_v40, %v3944_v22  ;;  %vm3607_vm8 = vcmp.eq.s32.totalorder %v11660_v46, 0  ;;  %vm3954_vm9 = vcmp.eq.s32.totalorder %v11660_v46, 1  ;;  %v11661_v21 = vmov 0.0   ;;  %v6849_v61 = vld [vmem:[%s10669_s20 + $0x20] sm:$0xff]   ;;  %v6850_v47 = vld [vmem:[%s10669_s20 + $0x28] sm:$0xff]   ;;  %v6851_v40 = vld [vmem:[%s10669_s20 + $0x30] sm:$0xff]  }
 0xa50   :  { %v4116_v19 = vsel %vm164_vm4, %v11659_v7, 0.0  ;;  %v3600_v4 = vrot.slane %v3599_v25, 4  ;;  %v3771_v45 = vrot.slane %v3770_v27, 4  ;;  %v5462_v49 = vsel %vm3607_vm8, 1.0, %v11661_v21 }
 0xa51   :  { %v4117_v37 = vadd.f32 %v4116_v19, %v4115_v48  ;;  %v3947_v44 = vrot.slane %v3946_v35, 4  ;;  %v5463_v30 = vsel %vm3954_vm9, 1.0, %v11661_v21 }
 0xa52   :  { %v3601_v36 = vadd.f32 %v3600_v4, %v3599_v25  ;;  %v3772_v15 = vadd.f32 %v3771_v45, %v3770_v27 }
 0xa53   :  { %v4118_v54 = vrot.slane %v4117_v37, 4  ;;  %v3948_v10 = vadd.f32 %v3947_v44, %v3946_v35 }
 0xa54   :  { %v3602_v32 = vrot.slane %v3601_v36, 2  ;;  %v3773_v28 = vrot.slane %v3772_v15, 2 }
 0xa55   :  { %v4119_v31 = vadd.f32 %v4118_v54, %v4117_v37  ;;  %v3949_v57 = vrot.slane %v3948_v10, 2  ;;  %v6853_v54 = vld [vmem:[%s10673_s24] sm:$0xff]  }
 0xa56   :  { %v3603_v62 = vadd.f32 %v3602_v32, %v3601_v36  ;;  %v3774_v63 = vadd.f32 %v3773_v28, %v3772_v15  ;;  %v6855_v15 = vld [vmem:[%s10673_s24 + $0x10] sm:$0xff]   ;;  %v6857_v32 = vld [vmem:[%s10673_s24 + $0x20] sm:$0xff]  }
 0xa57   :  { %v4120_v53 = vrot.slane %v4119_v31, 2  ;;  %v3950_v20 = vadd.f32 %v3949_v57, %v3948_v10  ;;  %v6858_v57 = vld [vmem:[%s10673_s24 + $0x28] sm:$0xff]   ;;  %v6859_v28 = vld [vmem:[%s10673_s24 + $0x30] sm:$0xff]  }
 0xa58   :  { %v3604_v41 = vrot.slane %v3603_v62, 1  ;;  %v3775_v13 = vrot.slane %v3774_v63, 1 }
 0xa59   :  { %v4121_v50 = vadd.f32 %v4120_v53, %v4119_v31  ;;  %v3951_v16 = vrot.slane %v3950_v20, 1  ;;  %v6856_v31 = vld [vmem:[%s10673_s24 + $0x18] sm:$0xff]  }
 0xa5a   :  { %v3605_v8 = vadd.f32 %v3604_v41, %v3603_v62  ;;  %v3776_v51 = vadd.f32 %v3775_v13, %v3774_v63  ;;  %v6860_v53 = vld [vmem:[%s10673_s24 + $0x38] sm:$0xff]  }
 0xa5b   :  { %v4122_v24 = vrot.slane %v4121_v50, 1  ;;  %v3952_v58 = vadd.f32 %v3951_v16, %v3950_v20  ;;  %v5497_v20 = vld [vmem:[%s10672_s23] ss:$0 sm:$0xff]  ;;  %s11662_s23 = sld [smem:[#allocation115_spill]] }
 0xa5c   :  { %v3606_v29 = vmul.f32 0.00390625, %v3605_v8  ;;  %v3777_v60 = vmul.f32 0.00390625, %v3776_v51  ;;  %v6863_v51 = vld [vmem:[%s10673_s24 + $0x50] sm:$0xff]  }
 0xa5d   :  { %v4123_v17 = vadd.f32 %v4122_v24, %v4121_v50  ;;  %v3953_v2 = vmul.f32 0.00390625, %v3952_v58  ;;  %v6861_v24 = vld [vmem:[%s10673_s24 + $0x40] sm:$0xff]   ;;  %v6862_v58 = vld [vmem:[%s10673_s24 + $0x48] sm:$0xff]  }
 0xa5e   :  { %v3610_v38 = vmul.f32 %v5462_v49, %v3606_v29  ;;  %v3778_v11 = vmul.f32 %v5462_v49, %v3777_v60  ;;  %v6865_v49 = vld [vmem:[%s10673_s24 + $0x60] sm:$0xff]   ;;  %v6867_v29 = vld [vmem:[%s10673_s24 + $0x70] sm:$0xff]  }
 0xa5f   :  { %v4124_v12 = vmul.f32 0.00390625, %v4123_v17  ;;  %v3957_v43 = vmul.f32 %v5463_v30, %v3953_v2  ;;  %v6864_v17 = vld [vmem:[%s10673_s24 + $0x58] sm:$0xff]   ;;  %v6869_v60 = vld [vmem:[%s10675_s26] sm:$0xff]  }
 0xa60   :  { %v6868_v2 = vld [vmem:[%s10673_s24 + $0x78] sm:$0xff]   ;;  %6613 = vmatpush3.bf16.msra.mxu0 %v6869_v60 }
 0xa61   :  { %v4125_v42 = vmul.f32 %v5463_v30, %v4124_v12  ;;  %v3958_v0 = vadd.f32 %v3957_v43, %v3610_v38  ;;  %v6866_v30 = vld [vmem:[%s10673_s24 + $0x68] sm:$0xff]   ;;  %6614 = vmatprep.subr.bf16.mxu0 %v11661_v21  ;;  %v5498_v12 = vld [vmem:[%s10674_s25] ss:$0 sm:$0xff] }
 0xa63   :  { %v4126_v33 = vadd.f32 %v4125_v42, %v3778_v11  ;;  %v4292_v1 = vpack.c.bf16 %v3958_v0, %v3958_v0 }
 0xa65   :  { %6517 = vmatmul.mubr.msk.bf16.vlgmr.msra.gmra.mrb[64].mxu1 %vm164_vm4, %v4292_v1  ;;  %v4437_v3 = vpack.c.bf16 %v4126_v33, %v4126_v33 }
 0xa66   :  { %6521 = vmatpush3.bf16.msra.mxu1 %v6845_v52  ;;  %6528 = vmatprep.mubr.msk.bf16.mxu1 %vm6927_vm2, %v11661_v21  ;;  %v6870_v52 = vld [vmem:[%s10673_s24 + $0x80] sm:$0xff]  }
 0xa67   :  { %6522 = vmatprep.subr.bf16.mxu1 %v11661_v21 }
 0xa6a   :  { %6523 = vmatpush3.bf16.msra.mxu1 %v6846_v34  ;;  %v6871_v34 = vld [vmem:[%s10673_s24 + $0x88] sm:$0xff]  }
 0xa6b   :  { %6524 = vmatprep.subr.bf16.mxu1 %v11661_v21 }
 0xa6e   :  { %6525 = vmatpush3.bf16.msra.mxu1 %v6847_v18  ;;  %v6872_v18 = vld [vmem:[%s10673_s24 + $0x90] sm:$0xff]  }
 0xa6f   :  { %6526 = vmatprep.subr.bf16.mxu1 %v11661_v21 }
 0xa72   :  { %6527 = vmatpush3.bf16.msra.mxu1 %v6848_v14  ;;  %v6873_v14 = vld [vmem:[%s10673_s24 + $0x98] sm:$0xff]  }
 0xa73   :  { %6532 = vmatprep.subr.bf16.mxu1 %v11661_v21 }
 0xb38   :  { %v4353_v22 = vpop.f32.mrb[64].mxu1 }
 0xb39   :  { %v4354_v55 = vadd.f32 %v5474_v23, %v4353_v22  ;;  %v6518_v48 = vpop.f32.mrb[65].mxu1  ;;  %v6875_v22 = vld [vmem:[%s10673_s24 + $0xa8] sm:$0xff]  }
 0xb3a   :  { %v4356_v6 = vpop.f32.mrb[66].mxu1  ;;  %v6878_v48 = vld [vmem:[%s10673_s24 + $0xb8] sm:$0xff]  }
 0xb3b   :  { %v4359_v9 = vpack.c.bf16 %v4354_v55, %v4354_v55  ;;  %v6519_v26 = vpop.f32.mrb[67].mxu1  ;;  %v6876_v55 = vld [vmem:[%s10673_s24 + $0xb0] sm:$0xff]   ;;  %v6877_v6 = vld [vmem:[%s10675_s26 + $0x8] sm:$0xff]  }
 0xb3c   :  { %6615 = vmatpush3.bf16.msra.mxu0 %v6877_v6  ;;  %v6880_v26 = vld [vmem:[%s10675_s26 + $0x18] sm:$0xff]  }
 0xb3d   :  { %6529 = vmatmul.mubr.msk.bf16.vlgmr.msra.gmra.mrb[68].mxu1 %vm4392_vm10, %v4359_v9  ;;  %v6879_v9 = vld [vmem:[%s10675_s26 + $0x10] sm:$0xff]   ;;  %6616 = vmatprep.subr.bf16.mxu0 %v11661_v21 }
 0xb3e   :  { %6533 = vmatpush3.bf16.msra.mxu1 %v6911_v56  ;;  %6536 = vmatprep.mubr.msk.bf16.mxu1 %vm6927_vm2, %v11661_v21  ;;  %v6881_v56 = vld [vmem:[%s10675_s26 + $0x20] sm:$0xff]  }
 0xb3f   :  { %6534 = vmatprep.subr.bf16.mxu1 %v11661_v21 }
 0xb40   :  { %6617 = vmatpush3.bf16.msra.mxu0 %v6879_v9 }
 0xb41   :  { %6618 = vmatprep.subr.bf16.mxu0 %v11661_v21 }
 0xb42   :  { %6535 = vmatpush3.bf16.msra.mxu1 %v6912_v5  ;;  %v6882_v5 = vld [vmem:[%s10675_s26 + $0x28] sm:$0xff]  }
 0xb43   :  { %6540 = vmatprep.subr.bf16.mxu1 %v11661_v21 }
 0xb44   :  { %6619 = vmatpush3.bf16.msra.mxu0 %v6880_v26 }
 0xb45   :  { %6537 = vmatmul.mubr.msk.bf16.vlgmr.msra.gmra.mrb[72].mxu1 %vm164_vm4, %v4437_v3  ;;  %6620 = vmatprep.subr.bf16.mxu0 %v11661_v21  ;;  %v6884_v3 = vld [vmem:[%s10675_s26 + $0x38] sm:$0xff]  }
 0xb46   :  { %6541 = vmatpush3.bf16.msra.mxu1 %v6849_v61  ;;  %6548 = vmatprep.mubr.msk.bf16.mxu1 %vm6927_vm2, %v11661_v21  ;;  %v6883_v61 = vld [vmem:[%s10675_s26 + $0x30] sm:$0xff]  }
 0xb47   :  { %6542 = vmatprep.subr.bf16.mxu1 %v11661_v21 }
 0xb48   :  { %6621 = vmatpush3.bf16.msra.mxu0 %v6881_v56 }
 0xb49   :  { %6622 = vmatprep.subr.bf16.mxu0 %v11661_v21 }
 0xb4a   :  { %6543 = vmatpush3.bf16.msra.mxu1 %v6850_v47  ;;  %v5524_v47 = vld [vmem:[%s10674_s25 + $0x1] ss:$0 sm:$0xff] }
 0xb4b   :  { %6544 = vmatprep.subr.bf16.mxu1 %v11661_v21 }
 0xb4c   :  { %6623 = vmatpush3.bf16.msra.mxu0 %v6882_v5 }
 0xb4d   :  { %6624 = vmatprep.subr.bf16.mxu0 %v11661_v21 }
 0xb4e   :  { %6545 = vmatpush3.bf16.msra.mxu1 %v6851_v40 }
 0xb4f   :  { %6546 = vmatprep.subr.bf16.mxu1 %v11661_v21 }
 0xb50   :  { %6625 = vmatpush3.bf16.msra.mxu0 %v6883_v61 }
 0xb51   :  { %6626 = vmatprep.subr.bf16.mxu0 %v11661_v21 }
 0xb52   :  { %6547 = vmatpush3.bf16.msra.mxu1 %v6852_v59 }
 0xb53   :  { %6552 = vmatprep.subr.bf16.mxu1 %v11661_v21 }
 0xb54   :  { %6627 = vmatpush3.bf16.msra.mxu0 %v6884_v3 }
 0xc10   :  { %v4430_v7 = vpop.f32.mrb[68].mxu1 }
 0xc11   :  { %v4436_v19 = vadd.f32 %v4430_v7, %v10403_v39  ;;  %v6530_v25 = vpop.f32.mrb[69].mxu1  ;;  %v6854_v39 = vld [vmem:[%s10673_s24 + $0x8] sm:$0xff]  }
 0xc12   :  { %v4433_v35 = vpop.f32.mrb[70].mxu1 }
 0xc13   :  { %v6531_v27 = vpop.f32.mrb[71].mxu1 }
 0xc18   :  { %v4475_v37 = vpop.f32.mrb[72].mxu1 }
 0xc19   :  { %v4476_v4 = vadd.f32 %v5474_v23, %v4475_v37  ;;  %v6538_v44 = vpop.f32.mrb[73].mxu1  ;;  %v6874_v23 = vld [vmem:[%s10673_s24 + $0xa0] sm:$0xff]  }
 0xc1a   :  { %v4478_v45 = vpop.f32.mrb[74].mxu1  ;;  %v5550_v37 = vld [vmem:[%s10674_s25 + $0x2] ss:$0 sm:$0xff] }
 0xc1b   :  { %v4481_v36 = vpack.c.bf16 %v4476_v4, %v4476_v4  ;;  %v6539_v10 = vpop.f32.mrb[75].mxu1 }
 0xc1d   :  { %6549 = vmatmul.mubr.msk.bf16.vlgmr.msra.gmra.mrb[76].mxu1 %vm4392_vm10, %v4481_v36 }
 0xc1e   :  { %6553 = vmatpush3.bf16.msra.mxu1 %v6853_v54  ;;  %6568 = vmatprep.mubr.msk.bf16.mxu1 %vm6927_vm2, %v11661_v21 }
 0xc1f   :  { %6554 = vmatprep.subr.bf16.mxu1 %v11661_v21 }
 0xc22   :  { %6555 = vmatpush3.bf16.msra.mxu1 %v6854_v39  ;;  %v5559_v39 = vld [vmem:[%s10676_s27] ss:$0 sm:$0xff] }
 0xc23   :  { %6556 = vmatprep.subr.bf16.mxu1 %v11661_v21 }
 0xc26   :  { %6557 = vmatpush3.bf16.msra.mxu1 %v6855_v15 }
 0xc27   :  { %6558 = vmatprep.subr.bf16.mxu1 %v11661_v21 }
 0xc2a   :  { %6559 = vmatpush3.bf16.msra.mxu1 %v6856_v31  ;;  %v5023_v31 = vld [vmem:[%s11662_s23] sm:$0x3] }
 0xc2b   :  { %6560 = vmatprep.subr.bf16.mxu1 %v11661_v21 }
 0xc2e   :  { %6561 = vmatpush3.bf16.msra.mxu1 %v6857_v32 }
 0xc2f   :  { %6562 = vmatprep.subr.bf16.mxu1 %v11661_v21 }
 0xc32   :  { %6563 = vmatpush3.bf16.msra.mxu1 %v6858_v57 }
 0xc33   :  { %6564 = vmatprep.subr.bf16.mxu1 %v11661_v21 }
 0xc36   :  { %6565 = vmatpush3.bf16.msra.mxu1 %v6859_v28 }
 0xc37   :  { %6566 = vmatprep.subr.bf16.mxu1 %v11661_v21 }
 0xc3a   :  { %6567 = vmatpush3.bf16.msra.mxu1 %v6860_v53 }
 0xc3b   :  { %6572 = vmatprep.subr.bf16.mxu1 %v11661_v21 }
 0xcf0   :  { %v4552_v62 = vpop.f32.mrb[76].mxu1 }
 0xcf1   :  { %v4558_v63 = vadd.f32 %v4552_v62, %v4436_v19  ;;  %v6550_v50 = vpop.f32.mrb[77].mxu1 }
 0xcf2   :  { %v4555_v46 = vpop.f32.mrb[78].mxu1 }
 0xcf3   :  { %v4566_v41 = vadd.f32 %v5497_v20, %v4558_v63  ;;  %v6551_v16 = vpop.f32.mrb[79].mxu1 }
 0xcf5   :  { %v4567_v13 = vmax.f32 %v4566_v41, 0.0 }
 0xcf7   :  { %v4568_v8 = vpack.c.bf16 %v4567_v13, %v4567_v13 }
 0xcf9   :  { %6569 = vmatmul.mubr.bf16.vlgmr.msra.gmra.mrb[80].mxu1 %v4568_v8 }
 0xcfa   :  { %6573 = vmatpush3.bf16.msra.mxu1 %v6861_v24  ;;  %6588 = vmatprep.mubr.msk.bf16.mxu1 %vm6927_vm2, %v11661_v21 }
 0xcfb   :  { %6574 = vmatprep.subr.bf16.mxu1 %v11661_v21 }
 0xcfe   :  { %6575 = vmatpush3.bf16.msra.mxu1 %v6862_v58 }
 0xcff   :  { %6576 = vmatprep.subr.bf16.mxu1 %v11661_v21 }
 0xd02   :  { %6577 = vmatpush3.bf16.msra.mxu1 %v6863_v51 }
 0xd03   :  { %6578 = vmatprep.subr.bf16.mxu1 %v11661_v21 }
 0xd06   :  { %6579 = vmatpush3.bf16.msra.mxu1 %v6864_v17 }
 0xd07   :  { %6580 = vmatprep.subr.bf16.mxu1 %v11661_v21 }
 0xd0a   :  { %6581 = vmatpush3.bf16.msra.mxu1 %v6865_v49 }
 0xd0b   :  { %6582 = vmatprep.subr.bf16.mxu1 %v11661_v21 }
 0xd0e   :  { %6583 = vmatpush3.bf16.msra.mxu1 %v6866_v30 }
 0xd0f   :  { %6584 = vmatprep.subr.bf16.mxu1 %v11661_v21 }
 0xd12   :  { %6585 = vmatpush3.bf16.msra.mxu1 %v6867_v29 }
 0xd13   :  { %6586 = vmatprep.subr.bf16.mxu1 %v11661_v21 }
 0xd16   :  { %6587 = vmatpush3.bf16.msra.mxu1 %v6868_v2 }
 0xd17   :  { %6592 = vmatprep.subr.bf16.mxu1 %v11661_v21 }
 0xdcc   :  { %v4674_v38 = vpop.f32.mrb[80].mxu1 }
 0xdcd   :  { %v4675_v43 = vadd.f32 %v5498_v12, %v4674_v38  ;;  %v6570_v11 = vpop.f32.mrb[81].mxu1 }
 0xdce   :  { %v4677_v42 = vpop.f32.mrb[82].mxu1 }
 0xdcf   :  { %v4680_v0 = vmax.f32 %v4675_v43, 0.0  ;;  %v6571_v33 = vpop.f32.mrb[83].mxu1 }
 0xdd1   :  { %v4681_v1 = vpack.c.bf16 %v4680_v0, %v4680_v0 }
 0xdd3   :  { %6589 = vmatmul.mubr.bf16.vlgmr.msra.gmra.mrb[84].mxu1 %v4681_v1 }
 0xdd4   :  { %6593 = vmatpush3.bf16.msra.mxu1 %v6870_v52  ;;  %6608 = vmatprep.mubr.msk.bf16.mxu1 %vm6927_vm2, %v11661_v21 }
 0xdd5   :  { %6594 = vmatprep.subr.bf16.mxu1 %v11661_v21 }
 0xdd8   :  { %6595 = vmatpush3.bf16.msra.mxu1 %v6871_v34 }
 0xdd9   :  { %6596 = vmatprep.subr.bf16.mxu1 %v11661_v21 }
 0xddc   :  { %6597 = vmatpush3.bf16.msra.mxu1 %v6872_v18 }
 0xddd   :  { %6598 = vmatprep.subr.bf16.mxu1 %v11661_v21 }
 0xde0   :  { %6599 = vmatpush3.bf16.msra.mxu1 %v6873_v14 }
 0xde1   :  { %6600 = vmatprep.subr.bf16.mxu1 %v11661_v21 }
 0xde4   :  { %6601 = vmatpush3.bf16.msra.mxu1 %v6874_v23 }
 0xde5   :  { %6602 = vmatprep.subr.bf16.mxu1 %v11661_v21 }
 0xde8   :  { %6603 = vmatpush3.bf16.msra.mxu1 %v6875_v22 }
 0xde9   :  { %6604 = vmatprep.subr.bf16.mxu1 %v11661_v21 }
 0xdec   :  { %6605 = vmatpush3.bf16.msra.mxu1 %v6876_v55 }
 0xded   :  { %6606 = vmatprep.subr.bf16.mxu1 %v11661_v21 }
 0xdf0   :  { %6607 = vmatpush3.bf16.msra.mxu1 %v6878_v48 }
 0xea6   :  { %v4789_v40 = vpop.f32.mrb[84].mxu1 }
 0xea7   :  { %v4790_v59 = vadd.f32 %v5524_v47, %v4789_v40  ;;  %v6590_v7 = vpop.f32.mrb[85].mxu1 }
 0xea8   :  { %v4792_v19 = vpop.f32.mrb[86].mxu1 }
 0xea9   :  { %v4795_v25 = vmax.f32 %v4790_v59, 0.0  ;;  %v6591_v35 = vpop.f32.mrb[87].mxu1 }
 0xeab   :  { %v4796_v27 = vpack.c.bf16 %v4795_v25, %v4795_v25 }
 0xead   :  { %6609 = vmatmul.mubr.bf16.vlgmr.msra.gmra.mrb[88].mxu1 %v4796_v27 }
 0xf80   :  { %v4904_v4 = vpop.f32.mrb[88].mxu1 }
 0xf81   :  { %v4905_v44 = vadd.f32 %v5550_v37, %v4904_v4  ;;  %v6610_v21 = vpop.f32.mrb[89].mxu1 }
 0xf82   :  { %v4907_v45 = vpop.f32.mrb[90].mxu1 }
 0xf83   :  { %v4910_v54 = vmax.f32 %v4905_v44, 0.0  ;;  %v6611_v36 = vpop.f32.mrb[91].mxu1 }
 0xf85   :  { %v4911_v10 = vpack.c.bf16 %v4910_v54, %v4910_v54 }
 0xf87   :  { %6629 = vmatmul.mubr.bf16.vlgmr.msra.gmra.mrb[168].mxu0 %v4911_v10 }
0x105a   :  { %v5017_v15 = vpop.f32.mrb[168].mxu0 }
0x105b   :  { %v5018_v32 = vadd.f32 %v5559_v39, %v5017_v15  ;;  %v6630_v57 = vpop.f32.mrb[169].mxu0 }
0x105c   :  { %v5020_v28 = vpop.f32.mrb[170].mxu0 }
0x105d   :  { %v5024_v53 = vsub.f32 %v5018_v32, %v5023_v31  ;;  %v6631_v62 = vpop.f32.mrb[171].mxu0 }
0x105f   :  { %v5025_v20 = vmul.f32 %v5024_v53, %v5024_v53 }
0x1061   :  { %v5027_v63 = vsel %vm5026_vm11, %v5025_v20, 0.0 }
0x1062   :  { %5028 = vadd.xlane.f32.xlu0 %v5027_v63 }
0x10ef   :  { %v5029_v50 = vpop.xlane.xlu0 %5028 }
0x10f0   :  { %v5030_v46 = vrot.slane %v5029_v50, 4 }
0x10f2   :  { %v5031_v41 = vadd.f32 %v5030_v46, %v5029_v50 }
0x10f4   :  { %v5032_v16 = vrot.slane %v5031_v41, 2 }
0x10f6   :  { %v5033_v13 = vadd.f32 %v5032_v16, %v5031_v41 }
0x10f8   :  { %v5034_v24 = vrot.slane %v5033_v13, 1 }
0x10fa   :  { %v5035_v8 = vadd.f32 %v5034_v24, %v5033_v13 }
0x10fc   :  { %6632 = vpush %v5035_v8 }
0x112d   :  { %s6633_s25 = spop %6632 }
0x112e   :  { %s5037_s27 = smul.f32 0.017857144, %s6633_s25 }
0x1130   :  { %5039 = sst [smem:[#allocation2]] %s5037_s27 }
0x1131   :  { %6922 = shalt.err (!%p6919_p2)
}
0x1132   :  { %s6928_s0 = smov [#allocation2]  }
0x1133   :  { %5047 = dma.smem_to_hbm %s6928_s0, 16, %s10677_s28, [#allocation3]  }
0x1134   :  { %6923 = dma.done.wait [#allocation3], 16  }
0x1135   :  { %6924 = vsyncadd [#allocation3], 4294967280 }
0x1136   :  { %5051 = sfence }
0x1137   :  { %5052 = vsyncpa [#allocation3], 1 }

</bundles_post_ra>
